<compile_context>
chip_gen: v5e
topology: v5e:2x2
jax: 0.10.0
libtpu: 0.0.40
codegen_flags: <defaults>
</compile_context>

<pallas_src>
import numpy as np
import jax
import jax.numpy as jnp
from jax import lax
from jax.experimental import pallas as pl
from jax.experimental.pallas import tpu as pltpu


def _round_up(a, m):
    return (a + m - 1) // m * m


# ----------------------------------------------------------------------------- kernel

def _bigru_kernel(x_ref,                     # (S, BT, D)  bf16 embedded tokens (time-major tile)
                  len_ref,                   # (BT, 1)     int32 sequence lengths for this tile
                  wih_ref,                   # (D, 6*Hp)   bf16 input weights, fwd|bwd fused
                  whh_f_ref, whh_b_ref,      # (Hp, 3*Hp)  bf16 hidden weights per direction
                  bias_ref,                  # (1, 6*Hp)   f32 folded biases, fwd|bwd fused
                  bhn_f_ref, bhn_b_ref,      # (1, Hp)     f32 n-gate hidden biases
                  out_ref,                   # (S, BT, Hp) f32 averaged bidirectional output
                  xg_ref,                    # scratch (S*BT, 6*Hp): precomputed input gates
                  bacc_ref):                 # scratch (S*BT, Hp):   backward-direction outputs
    S, BT, D = x_ref.shape
    Hp = out_ref.shape[2]                    # lane-padded hidden size (multiple of 128)
    G3 = 3 * Hp
    SB = S * BT

    # Single fused input projection for BOTH directions: (S*BT, D) @ (D, 6*Hp) on the MXU
    # (bf16 in, f32 accumulate).  bias_ref already holds [b_ir+b_hr, b_iz+b_hz, b_in] per dir.
    x2d = x_ref[...].reshape(SB, D)
    xg_ref[...] = (jnp.dot(x2d, wih_ref[...], preferred_element_type=jnp.float32)
                   + bias_ref[...])

    # Hoist loop-invariants (weights + bias broadcasts) out of the unrolled time loop.
    whh_f = whh_f_ref[...]                                  # (Hp, 3Hp) bf16
    whh_b = whh_b_ref[...]
    bhn_f = jnp.broadcast_to(bhn_f_ref[...], (BT, Hp))      # broadcast once, not per step
    bhn_b = jnp.broadcast_to(bhn_b_ref[...], (BT, Hp))
    L = len_ref[...]                                        # (BT, 1) int32

    def sigmoid(v):
        # one EUP push (tanh) instead of exp + divide
        return 0.5 * (jnp.tanh(0.5 * v) + 1.0)

    def gru_cell(h, xg, whh, bhn_bc):
        # h: (BT, Hp) f32, xg: (BT, 3Hp) f32.  Gate columns are 128-lane aligned.
        hg = jnp.dot(h.astype(jnp.bfloat16), whh, preferred_element_type=jnp.float32)
        r = sigmoid(xg[:, :Hp] + hg[:, :Hp])
        z = sigmoid(xg[:, Hp:2 * Hp] + hg[:, Hp:2 * Hp])
        n = jnp.tanh(xg[:, 2 * Hp:] + r * (hg[:, 2 * Hp:] + bhn_bc))
        return (1.0 - z) * n + z * h

    # Fused forward/backward recurrence: fwd processes time t, bwd processes time S-1-t
    # (two independent chains for the scheduler to overlap on the serial critical path).
    def body(t, carry):
        h_f, h_b = carry
        tb = S - 1 - t
        rf = pl.multiple_of(t * BT, BT)
        rb = pl.multiple_of(tb * BT, BT)
        xg_f = xg_ref[pl.ds(rf, BT), :G3]
        xg_b = xg_ref[pl.ds(rb, BT), G3:]

        hf_new = gru_cell(h_f, xg_f, whh_f, bhn_f)
        hb_new = gru_cell(h_b, xg_b, whh_b, bhn_b)

        vf = t < L                                          # (BT, 1) valid mask (forward)
        vb = tb < L                                         # (BT, 1) valid mask (backward)
        h_f = jnp.where(vf, hf_new, h_f)
        h_b = jnp.where(vb, hb_new, h_b)

        # Forward half goes straight into the lane-dense output block (no forward scratch);
        # backward half into a single (S*BT, Hp) scratch, added in the epilogue.
        out_ref[t] = jnp.where(vf, 0.5 * h_f, 0.0)
        bacc_ref[pl.ds(rb, BT), :] = jnp.where(vb, 0.5 * h_b, 0.0)
        return (h_f, h_b)

    h0 = jnp.zeros((BT, Hp), jnp.float32)
    # Bounded unroll: fully unrolled for short S, capped at 8 to bound vreg pressure at long S.
    lax.fori_loop(0, S, body, (h0, h0), unroll=min(S, 8))

    # cap_emb = (fwd + bwd) / 2 ; the forward halves are already in out_ref.
    out_ref[...] = out_ref[...] + bacc_ref[...].reshape(S, BT, Hp)


# ----------------------------------------------------------------------------- host-side helpers

def _stack_gates(w3, Hp):
    """(3, in, H) in (r, z, n) order -> (in, 3*Hp), each gate in its own 128-lane-aligned column."""
    H = w3.shape[2]
    pad = ((0, 0), (0, Hp - H))
    return jnp.concatenate([jnp.pad(w3[g], pad) for g in range(3)], axis=1)


def _stack_hidden_gates(w3, Hp):
    """(3, H, H) -> (Hp, 3*Hp): rows also padded to Hp (padded hidden units stay exactly zero)."""
    H = w3.shape[2]
    pad = ((0, Hp - w3.shape[1]), (0, Hp - H))
    return jnp.concatenate([jnp.pad(w3[g], pad) for g in range(3)], axis=1)


def _fold_bias(bih, bhh, Hp):
    """(3,1,H)+(3,1,H) -> (1, 3*Hp): [b_ir+b_hr, b_iz+b_hz, b_in] (b_hn stays inside the r term)."""
    H = bih.shape[2]
    pad = ((0, 0), (0, Hp - H))
    return jnp.concatenate([jnp.pad(bih[0] + bhh[0], pad),
                            jnp.pad(bih[1] + bhh[1], pad),
                            jnp.pad(bih[2], pad)], axis=1)


def _vmem_bytes(S, BT, D, Hp):
    xg = S * BT * 6 * Hp * 4                   # input-gate scratch (f32, both directions)
    bacc = S * BT * Hp * 4                     # backward-output scratch (f32)
    x_blk = 2 * S * BT * D * 2                 # bf16 x block, double-buffered
    out_blk = 2 * S * BT * Hp * 4              # f32 out block, double-buffered
    w = (D * 6 * Hp + 2 * Hp * 3 * Hp) * 2     # bf16 weights, single-buffered
    misc = (6 * Hp + 2 * Hp) * 4 + BT * 4
    return xg + bacc + x_blk + out_blk + w + misc


def _pick_bt(B, S, D, Hp, budget=40 * 1024 * 1024):
    """Largest batch tile (multiple of 8, up to 256, never much beyond B) that fits the budget."""
    bt = min(256, _round_up(max(B, 8), 8))
    while bt > 8 and _vmem_bytes(S, bt, D, Hp) > budget:
        bt = _round_up(bt // 2, 8)
    return bt


# ----------------------------------------------------------------------------- forward pass

def text_extract_feature(tokens, lengths, params):
    """Forward pass of TextExtractFeature (eval mode, num_layers=1, bidirectional=True)."""
    # Embedding lookup in bf16 (table is bf16-representable): halves x DMA bytes / VMEM.
    x = params["embed"].astype(jnp.bfloat16)[tokens]            # (B, S, D) bf16
    # nn.Dropout(0.4) -> identity (eval mode).
    B, S, D = x.shape
    H = params["whh_f"].shape[2]
    # Lane-pad the hidden size: aligned gate slices + lane-dense output store.  No-op if H%128==0.
    Hp = _round_up(H, 128)

    BT = _pick_bt(B, S, D, Hp)
    B_pad = _round_up(B, BT)
    pad = B_pad - B

    # Time-major layout for the kernel: per-timestep slices are leading-dim (sublane-aligned).
    x_t = jnp.transpose(x, (1, 0, 2))                           # (S, B, D)
    if pad:
        x_t = jnp.pad(x_t, ((0, 0), (0, pad), (0, 0)))
    lens = jnp.pad(lengths.astype(jnp.int32), (0, pad)).reshape(B_pad, 1)

    # Gate-stacked, lane-aligned weights (bf16 for the MXU); fwd|bwd fused along the output dim.
    wih_cat = jnp.concatenate([_stack_gates(params["wih_f"], Hp),
                               _stack_gates(params["wih_b"], Hp)], axis=1).astype(jnp.bfloat16)
    bias_cat = jnp.concatenate([_fold_bias(params["bih_f"], params["bhh_f"], Hp),
                                _fold_bias(params["bih_b"], params["bhh_b"], Hp)], axis=1)
    whh_f = _stack_hidden_gates(params["whh_f"], Hp).astype(jnp.bfloat16)
    whh_b = _stack_hidden_gates(params["whh_b"], Hp).astype(jnp.bfloat16)
    bhn_f = jnp.pad(params["bhh_f"][2], ((0, 0), (0, Hp - H)))  # (1, Hp)
    bhn_b = jnp.pad(params["bhh_b"][2], ((0, 0), (0, Hp - H)))

    # Constant-index operands: single-buffer them (double-buffering weights only burns VMEM).
    def _const_spec(shape):
        return pl.BlockSpec(shape, lambda i: (0,) * len(shape),
                            pipeline_mode=pl.Buffered(1))

    grid_spec = pltpu.PrefetchScalarGridSpec(
        num_scalar_prefetch=0,
        grid=(B_pad // BT,),
        in_specs=[
            pl.BlockSpec((S, BT, D), lambda i: (0, i, 0)),      # x (bf16, time-major batch tile)
            pl.BlockSpec((BT, 1), lambda i: (i, 0)),            # lengths column
            _const_spec((D, 6 * Hp)),                           # wih fwd|bwd fused
            _const_spec((Hp, 3 * Hp)),                          # whh_f
            _const_spec((Hp, 3 * Hp)),                          # whh_b
            _const_spec((1, 6 * Hp)),                           # folded biases fwd|bwd fused
            _const_spec((1, Hp)),                               # bhn_f
            _const_spec((1, Hp)),                               # bhn_b
        ],
        out_specs=pl.BlockSpec((S, BT, Hp), lambda i: (0, i, 0)),
        scratch_shapes=[
            pltpu.VMEM((S * BT, 6 * Hp), jnp.float32),          # precomputed input gates (both dirs)
            pltpu.VMEM((S * BT, Hp), jnp.float32),              # backward-direction outputs
        ],
    )

    # Explicit VMEM limit sized from the actual footprint (v7x has only 64 MiB per TensorCore).
    # TODO(synk): at very long S, chunk the xg precompute over time to stay inside this budget.
    est = _vmem_bytes(S, BT, D, Hp)
    vmem_limit = int(min(60 * 1024 * 1024, max(32 * 1024 * 1024, 2 * est)))

    # TODO(synk): on v7x with a single batch tile (grid == 1) the 2nd TensorCore is idle; a
    # direction-parallel grid axis would engage it at the cost of un-fusing the fwd/bwd chains.
    out_t = pl.pallas_call(
        _bigru_kernel,
        out_shape=jax.ShapeDtypeStruct((S, B_pad, Hp), jnp.float32),
        grid_spec=grid_spec,
        compiler_params=pltpu.CompilerParams(
            dimension_semantics=("parallel",),
            vmem_limit_bytes=vmem_limit),
    )(x_t, lens, wih_cat, whh_f, whh_b, bias_cat, bhn_f, bhn_b)

    return jnp.transpose(out_t, (1, 0, 2))[:B, :, :H]            # (B, S, H)


# ----------------------------------------------------------------------------- reference & params

def _gru_reference(x, lengths, p):
    """Pure numpy reference for the masked bidirectional GRU (PyTorch GRU equations)."""
    x = np.asarray(x, np.float32)
    B, S, _ = x.shape
    H = p["whh_f"].shape[2]

    def sigmoid(v):
        return 1.0 / (1.0 + np.exp(-v))

    def step(xt, h, wih, whh, bih, bhh):
        r = sigmoid(xt @ wih[0] + bih[0, 0] + h @ whh[0] + bhh[0, 0])
        z = sigmoid(xt @ wih[1] + bih[1, 0] + h @ whh[1] + bhh[1, 0])
        n = np.tanh(xt @ wih[2] + bih[2, 0] + r * (h @ whh[2] + bhh[2, 0]))
        return (1.0 - z) * n + z * h

    wih_f, whh_f = np.asarray(p["wih_f"]), np.asarray(p["whh_f"])
    bih_f, bhh_f = np.asarray(p["bih_f"]), np.asarray(p["bhh_f"])
    wih_b, whh_b = np.asarray(p["wih_b"]), np.asarray(p["whh_b"])
    bih_b, bhh_b = np.asarray(p["bih_b"]), np.asarray(p["bhh_b"])

    out = np.zeros((B, S, H), np.float32)
    for b in range(B):
        L = int(lengths[b])
        h = np.zeros((H,), np.float32)
        fwd = np.zeros((S, H), np.float32)
        for t in range(L):
            h = step(x[b, t], h, wih_f, whh_f, bih_f, bhh_f)
            fwd[t] = h
        h = np.zeros((H,), np.float32)
        bwd = np.zeros((S, H), np.float32)
        for t in range(L - 1, -1, -1):
            h = step(x[b, t], h, wih_b, whh_b, bih_b, bhh_b)
            bwd[t] = h
        out[b] = 0.5 * (fwd + bwd)
    return out


def make_params(key, vocab_size, word_dim, embed_dim):
    ks = jax.random.split(key, 9)
    scale = 1.0 / np.sqrt(embed_dim)

    def q(a):
        # Round-trip through bf16 so kernel (bf16 MXU) and f32 reference use identical weights.
        return a.astype(jnp.bfloat16).astype(jnp.float32)

    def u(k, shape):
        return q(jax.random.uniform(k, shape, jnp.float32, -scale, scale))

    return {
        "embed": q(jax.random.normal(ks[0], (vocab_size, word_dim), jnp.float32) * 0.1),
        # gate-stacked, pre-transposed weights: (3 gates [r,z,n], in_dim, H)
        "wih_f": u(ks[1], (3, word_dim, embed_dim)),
        "whh_f": u(ks[2], (3, embed_dim, embed_dim)),
        "bih_f": u(ks[3], (3, 1, embed_dim)),
        "bhh_f": u(ks[4], (3, 1, embed_dim)),
        "wih_b": u(ks[5], (3, word_dim, embed_dim)),
        "whh_b": u(ks[6], (3, embed_dim, embed_dim)),
        "bih_b": u(ks[7], (3, 1, embed_dim)),
        "bhh_b": u(ks[8], (3, 1, embed_dim)),
    }


if __name__ == "__main__":
    vocab_size = 8590     # hardcoded in the module
    word_dim = 32         # args.word_dim
    embed_dim = 32        # args.embed_dim
    B, S = 2, 8

    key = jax.random.PRNGKey(0)
    kp, kt = jax.random.split(key)
    params = make_params(kp, vocab_size, word_dim, embed_dim)

    tokens = jax.random.randint(kt, (B, S), 0, vocab_size, dtype=jnp.int32)
    lengths = jnp.array([8, 5], dtype=jnp.int32)   # max(lengths) == S (pad_packed_sequence pads to max)

    cap_emb = text_extract_feature(tokens, lengths, params)
    cap_emb = jax.block_until_ready(cap_emb)

    # Verify against a pure numpy f32 reference of the same forward semantics.
    # Weights/embeddings are bf16-representable, so the only kernel-side rounding is the per-step
    # bf16 cast of the hidden state fed to the MXU -> slightly relaxed tolerance.
    x_emb = np.asarray(params["embed"])[np.asarray(tokens)]
    ref = _gru_reference(x_emb, np.asarray(lengths), params)
    np.testing.assert_allclose(np.asarray(cap_emb), ref, atol=2e-2, rtol=2e-2)

    print("KERNEL_OK")
</pallas_src>

<mosaic_0001>
module attributes {stable_mosaic.version = 11 : i64} {
  func.func @_bigru_kernel(%arg0: i32, %arg1: memref<8x8x32xbf16, #tpu.memory_space<vmem>>, %arg2: memref<8x1xi32, #tpu.memory_space<vmem>>, %arg3: memref<32x768xbf16, #tpu.memory_space<vmem>>, %arg4: memref<128x384xbf16, #tpu.memory_space<vmem>>, %arg5: memref<128x384xbf16, #tpu.memory_space<vmem>>, %arg6: memref<1x768xf32, #tpu.memory_space<vmem>>, %arg7: memref<1x128xf32, #tpu.memory_space<vmem>>, %arg8: memref<1x128xf32, #tpu.memory_space<vmem>>, %arg9: memref<8x8x128xf32, #tpu.memory_space<vmem>>, %arg10: memref<64x768xf32, #tpu.memory_space<vmem>>, %arg11: memref<64x128xf32, #tpu.memory_space<vmem>>) attributes {dimension_semantics = [#tpu.dimension_semantics<parallel>], iteration_bounds = array<i64: 1>, scalar_prefetch = 0 : i64, scratch_operands = 2 : i64, tpu.core_type = #tpu.core_type<tc>, window_params = [{transform_indices = @transform_0, window_bounds = array<i64: 8, 8, 32>}, {transform_indices = @transform_1, window_bounds = array<i64: 8, 1>}, {pipeline_mode = #tpu.pipeline_mode<synchronous>, transform_indices = @transform_2, window_bounds = array<i64: 32, 768>}, {pipeline_mode = #tpu.pipeline_mode<synchronous>, transform_indices = @transform_3, window_bounds = array<i64: 128, 384>}, {pipeline_mode = #tpu.pipeline_mode<synchronous>, transform_indices = @transform_4, window_bounds = array<i64: 128, 384>}, {pipeline_mode = #tpu.pipeline_mode<synchronous>, transform_indices = @transform_5, window_bounds = array<i64: 1, 768>}, {pipeline_mode = #tpu.pipeline_mode<synchronous>, transform_indices = @transform_6, window_bounds = array<i64: 1, 128>}, {pipeline_mode = #tpu.pipeline_mode<synchronous>, transform_indices = @transform_7, window_bounds = array<i64: 1, 128>}, {transform_indices = @transform_8, window_bounds = array<i64: 8, 8, 128>}]} {
    %c0 = arith.constant 0 : index
    %c0_0 = arith.constant 0 : index
    %c0_1 = arith.constant 0 : index
    %0 = vector.load %arg1[%c0, %c0_0, %c0_1] : memref<8x8x32xbf16, #tpu.memory_space<vmem>>, vector<8x8x32xbf16>
    %1 = vector.shape_cast %0 : vector<8x8x32xbf16> to vector<64x32xbf16>
    %c0_2 = arith.constant 0 : index
    %c0_3 = arith.constant 0 : index
    %2 = vector.load %arg3[%c0_2, %c0_3] : memref<32x768xbf16, #tpu.memory_space<vmem>>, vector<32x768xbf16>
    %cst = arith.constant dense<0.000000e+00> : vector<64x768xf32>
    %3 = tpu.matmul %1, %2, %cst {dimension_numbers = #tpu.dot_dimension_numbers<[1], [0], [0], [1], [0, 0, 1, 1], [], []>} : vector<64x32xbf16>, vector<32x768xbf16>, vector<64x768xf32> -> vector<64x768xf32>
    %c0_4 = arith.constant 0 : index
    %c0_5 = arith.constant 0 : index
    %4 = vector.load %arg6[%c0_4, %c0_5] : memref<1x768xf32, #tpu.memory_space<vmem>>, vector<1x768xf32>
    %5 = vector.broadcast %4 : vector<1x768xf32> to vector<64x768xf32>
    %6 = arith.addf %3, %5 : vector<64x768xf32>
    %c0_6 = arith.constant 0 : index
    %c0_7 = arith.constant 0 : index
    %7 = vector.load %arg10[%c0_6, %c0_7] : memref<64x768xf32, #tpu.memory_space<vmem>>, vector<64x768xf32>
    tpu.vector_store %arg10[%c0_6, %c0_7], %6 {strides = array<i32>} : memref<64x768xf32, #tpu.memory_space<vmem>>, vector<64x768xf32>,
    %c0_8 = arith.constant 0 : index
    %c0_9 = arith.constant 0 : index
    %8 = vector.load %arg4[%c0_8, %c0_9] : memref<128x384xbf16, #tpu.memory_space<vmem>>, vector<128x384xbf16>
    %c0_10 = arith.constant 0 : index
    %c0_11 = arith.constant 0 : index
    %9 = vector.load %arg5[%c0_10, %c0_11] : memref<128x384xbf16, #tpu.memory_space<vmem>>, vector<128x384xbf16>
    %c0_12 = arith.constant 0 : index
    %c0_13 = arith.constant 0 : index
    %10 = vector.load %arg7[%c0_12, %c0_13] : memref<1x128xf32, #tpu.memory_space<vmem>>, vector<1x128xf32>
    %11 = vector.shape_cast %10 : vector<1x128xf32> to vector<1x128xf32>
    %12 = vector.broadcast %11 : vector<1x128xf32> to vector<8x128xf32>
    %c0_14 = arith.constant 0 : index
    %c0_15 = arith.constant 0 : index
    %13 = vector.load %arg8[%c0_14, %c0_15] : memref<1x128xf32, #tpu.memory_space<vmem>>, vector<1x128xf32>
    %14 = vector.shape_cast %13 : vector<1x128xf32> to vector<1x128xf32>
    %15 = vector.broadcast %14 : vector<1x128xf32> to vector<8x128xf32>
    %c0_16 = arith.constant 0 : index
    %c0_17 = arith.constant 0 : index
    %16 = vector.load %arg2[%c0_16, %c0_17] : memref<8x1xi32, #tpu.memory_space<vmem>>, vector<8x1xi32>
    %cst_18 = arith.constant 0.000000e+00 : f32
    %17 = vector.broadcast %cst_18 : f32 to vector<8x128xf32>
    %c0_i32 = arith.constant 0 : i32
    %c7_i32 = arith.constant 7 : i32
    %18 = arith.subi %c7_i32, %c0_i32 : i32
    %c8_i32 = arith.constant 8 : i32
    %19 = arith.muli %c0_i32, %c8_i32 : i32
    %20 = tpu.assume_multiple %19, 8 : i32
    %c8_i32_19 = arith.constant 8 : i32
    %21 = arith.muli %18, %c8_i32_19 : i32
    %22 = tpu.assume_multiple %21, 8 : i32
    %23 = arith.index_cast %20 : i32 to index
    %c0_20 = arith.constant 0 : index
    %24 = vector.load %arg10[%23, %c0_20] : memref<64x768xf32, #tpu.memory_space<vmem>>, vector<8x384xf32>
    %25 = arith.index_cast %22 : i32 to index
    %c384 = arith.constant 384 : index
    %26 = vector.load %arg10[%25, %c384] : memref<64x768xf32, #tpu.memory_space<vmem>>, vector<8x384xf32>
    %27 = arith.truncf %17 : vector<8x128xf32> to vector<8x128xbf16>
    %cst_21 = arith.constant dense<0.000000e+00> : vector<8x384xf32>
    %28 = tpu.matmul %27, %8, %cst_21 {dimension_numbers = #tpu.dot_dimension_numbers<[1], [0], [0], [1], [0, 0, 1, 1], [], []>} : vector<8x128xbf16>, vector<128x384xbf16>, vector<8x384xf32> -> vector<8x384xf32>
    %29 = vector.extract_strided_slice %24 {offsets = [0, 0], sizes = [8, 128], strides = [1, 1]} : vector<8x384xf32> to vector<8x128xf32>
    %30 = vector.extract_strided_slice %28 {offsets = [0, 0], sizes = [8, 128], strides = [1, 1]} : vector<8x384xf32> to vector<8x128xf32>
    %31 = arith.addf %29, %30 : vector<8x128xf32>
    %cst_22 = arith.constant 5.000000e-01 : f32
    %32 = vector.broadcast %cst_22 : f32 to vector<8x128xf32>
    %33 = arith.mulf %32, %31 : vector<8x128xf32>
    %34 = math.tanh %33 : vector<8x128xf32>
    %cst_23 = arith.constant 1.000000e+00 : f32
    %35 = vector.broadcast %cst_23 : f32 to vector<8x128xf32>
    %36 = arith.addf %34, %35 : vector<8x128xf32>
    %cst_24 = arith.constant 5.000000e-01 : f32
    %37 = vector.broadcast %cst_24 : f32 to vector<8x128xf32>
    %38 = arith.mulf %37, %36 : vector<8x128xf32>
    %39 = vector.extract_strided_slice %24 {offsets = [0, 128], sizes = [8, 128], strides = [1, 1]} : vector<8x384xf32> to vector<8x128xf32>
    %40 = vector.extract_strided_slice %28 {offsets = [0, 128], sizes = [8, 128], strides = [1, 1]} : vector<8x384xf32> to vector<8x128xf32>
    %41 = arith.addf %39, %40 : vector<8x128xf32>
    %cst_25 = arith.constant 5.000000e-01 : f32
    %42 = vector.broadcast %cst_25 : f32 to vector<8x128xf32>
    %43 = arith.mulf %42, %41 : vector<8x128xf32>
    %44 = math.tanh %43 : vector<8x128xf32>
    %cst_26 = arith.constant 1.000000e+00 : f32
    %45 = vector.broadcast %cst_26 : f32 to vector<8x128xf32>
    %46 = arith.addf %44, %45 : vector<8x128xf32>
    %cst_27 = arith.constant 5.000000e-01 : f32
    %47 = vector.broadcast %cst_27 : f32 to vector<8x128xf32>
    %48 = arith.mulf %47, %46 : vector<8x128xf32>
    %49 = vector.extract_strided_slice %24 {offsets = [0, 256], sizes = [8, 128], strides = [1, 1]} : vector<8x384xf32> to vector<8x128xf32>
    %50 = vector.extract_strided_slice %28 {offsets = [0, 256], sizes = [8, 128], strides = [1, 1]} : vector<8x384xf32> to vector<8x128xf32>
    %51 = arith.addf %50, %12 : vector<8x128xf32>
    %52 = arith.mulf %38, %51 : vector<8x128xf32>
    %53 = arith.addf %49, %52 : vector<8x128xf32>
    %54 = math.tanh %53 : vector<8x128xf32>
    %cst_28 = arith.constant 1.000000e+00 : f32
    %55 = vector.broadcast %cst_28 : f32 to vector<8x128xf32>
    %56 = arith.subf %55, %48 : vector<8x128xf32>
    %57 = arith.mulf %56, %54 : vector<8x128xf32>
    %58 = arith.mulf %48, %17 : vector<8x128xf32>
    %59 = arith.addf %57, %58 : vector<8x128xf32>
    %60 = arith.truncf %17 : vector<8x128xf32> to vector<8x128xbf16>
    %cst_29 = arith.constant dense<0.000000e+00> : vector<8x384xf32>
    %61 = tpu.matmul %60, %9, %cst_29 {dimension_numbers = #tpu.dot_dimension_numbers<[1], [0], [0], [1], [0, 0, 1, 1], [], []>} : vector<8x128xbf16>, vector<128x384xbf16>, vector<8x384xf32> -> vector<8x384xf32>
    %62 = vector.extract_strided_slice %26 {offsets = [0, 0], sizes = [8, 128], strides = [1, 1]} : vector<8x384xf32> to vector<8x128xf32>
    %63 = vector.extract_strided_slice %61 {offsets = [0, 0], sizes = [8, 128], strides = [1, 1]} : vector<8x384xf32> to vector<8x128xf32>
    %64 = arith.addf %62, %63 : vector<8x128xf32>
    %cst_30 = arith.constant 5.000000e-01 : f32
    %65 = vector.broadcast %cst_30 : f32 to vector<8x128xf32>
    %66 = arith.mulf %65, %64 : vector<8x128xf32>
    %67 = math.tanh %66 : vector<8x128xf32>
    %cst_31 = arith.constant 1.000000e+00 : f32
    %68 = vector.broadcast %cst_31 : f32 to vector<8x128xf32>
    %69 = arith.addf %67, %68 : vector<8x128xf32>
    %cst_32 = arith.constant 5.000000e-01 : f32
    %70 = vector.broadcast %cst_32 : f32 to vector<8x128xf32>
    %71 = arith.mulf %70, %69 : vector<8x128xf32>
    %72 = vector.extract_strided_slice %26 {offsets = [0, 128], sizes = [8, 128], strides = [1, 1]} : vector<8x384xf32> to vector<8x128xf32>
    %73 = vector.extract_strided_slice %61 {offsets = [0, 128], sizes = [8, 128], strides = [1, 1]} : vector<8x384xf32> to vector<8x128xf32>
    %74 = arith.addf %72, %73 : vector<8x128xf32>
    %cst_33 = arith.constant 5.000000e-01 : f32
    %75 = vector.broadcast %cst_33 : f32 to vector<8x128xf32>
    %76 = arith.mulf %75, %74 : vector<8x128xf32>
    %77 = math.tanh %76 : vector<8x128xf32>
    %cst_34 = arith.constant 1.000000e+00 : f32
    %78 = vector.broadcast %cst_34 : f32 to vector<8x128xf32>
    %79 = arith.addf %77, %78 : vector<8x128xf32>
    %cst_35 = arith.constant 5.000000e-01 : f32
    %80 = vector.broadcast %cst_35 : f32 to vector<8x128xf32>
    %81 = arith.mulf %80, %79 : vector<8x128xf32>
    %82 = vector.extract_strided_slice %26 {offsets = [0, 256], sizes = [8, 128], strides = [1, 1]} : vector<8x384xf32> to vector<8x128xf32>
    %83 = vector.extract_strided_slice %61 {offsets = [0, 256], sizes = [8, 128], strides = [1, 1]} : vector<8x384xf32> to vector<8x128xf32>
    %84 = arith.addf %83, %15 : vector<8x128xf32>
    %85 = arith.mulf %71, %84 : vector<8x128xf32>
    %86 = arith.addf %82, %85 : vector<8x128xf32>
    %87 = math.tanh %86 : vector<8x128xf32>
    %cst_36 = arith.constant 1.000000e+00 : f32
    %88 = vector.broadcast %cst_36 : f32 to vector<8x128xf32>
    %89 = arith.subf %88, %81 : vector<8x128xf32>
    %90 = arith.mulf %89, %87 : vector<8x128xf32>
    %91 = arith.mulf %81, %17 : vector<8x128xf32>
    %92 = arith.addf %90, %91 : vector<8x128xf32>
    %93 = vector.broadcast %c0_i32 : i32 to vector<8x1xi32>
    %94 = arith.cmpi slt, %93, %16 : vector<8x1xi32>
    %95 = vector.broadcast %18 : i32 to vector<8x1xi32>
    %96 = arith.cmpi slt, %95, %16 : vector<8x1xi32>
    %97 = vector.shape_cast %94 : vector<8x1xi1> to vector<8x1xi1>
    %98 = vector.broadcast %97 : vector<8x1xi1> to vector<8x128xi1>
    %99 = arith.select %98, %59, %17 : vector<8x128xi1>, vector<8x128xf32>
    %100 = vector.shape_cast %96 : vector<8x1xi1> to vector<8x1xi1>
    %101 = vector.broadcast %100 : vector<8x1xi1> to vector<8x128xi1>
    %102 = arith.select %101, %92, %17 : vector<8x128xi1>, vector<8x128xf32>
    %cst_37 = arith.constant 5.000000e-01 : f32
    %103 = vector.broadcast %cst_37 : f32 to vector<8x128xf32>
    %104 = arith.mulf %103, %99 : vector<8x128xf32>
    %cst_38 = arith.constant 0.000000e+00 : f32
    %105 = vector.shape_cast %94 : vector<8x1xi1> to vector<8x1xi1>
    %106 = vector.broadcast %105 : vector<8x1xi1> to vector<8x128xi1>
    %107 = vector.broadcast %cst_38 : f32 to vector<8x128xf32>
    %108 = arith.select %106, %104, %107 : vector<8x128xi1>, vector<8x128xf32>
    %109 = arith.index_cast %c0_i32 : i32 to index
    %c0_39 = arith.constant 0 : index
    %c0_40 = arith.constant 0 : index
    %110 = vector.load %arg9[%109, %c0_39, %c0_40] : memref<8x8x128xf32, #tpu.memory_space<vmem>>, vector<1x8x128xf32>
    %111 = vector.shape_cast %110 : vector<1x8x128xf32> to vector<8x128xf32>
    %112 = vector.shape_cast %108 : vector<8x128xf32> to vector<1x8x128xf32>
    tpu.vector_store %arg9[%109, %c0_39, %c0_40], %112 {strides = array<i32>} : memref<8x8x128xf32, #tpu.memory_space<vmem>>, vector<1x8x128xf32>,
    %cst_41 = arith.constant 5.000000e-01 : f32
    %113 = vector.broadcast %cst_41 : f32 to vector<8x128xf32>
    %114 = arith.mulf %113, %102 : vector<8x128xf32>
    %cst_42 = arith.constant 0.000000e+00 : f32
    %115 = vector.shape_cast %96 : vector<8x1xi1> to vector<8x1xi1>
    %116 = vector.broadcast %115 : vector<8x1xi1> to vector<8x128xi1>
    %117 = vector.broadcast %cst_42 : f32 to vector<8x128xf32>
    %118 = arith.select %116, %114, %117 : vector<8x128xi1>, vector<8x128xf32>
    %119 = arith.index_cast %22 : i32 to index
    %c0_43 = arith.constant 0 : index
    %120 = vector.load %arg11[%119, %c0_43] : memref<64x128xf32, #tpu.memory_space<vmem>>, vector<8x128xf32>
    tpu.vector_store %arg11[%119, %c0_43], %118 {strides = array<i32>} : memref<64x128xf32, #tpu.memory_space<vmem>>, vector<8x128xf32>,
    %c1_i32 = arith.constant 1 : i32
    %c7_i32_44 = arith.constant 7 : i32
    %121 = arith.subi %c7_i32_44, %c1_i32 : i32
    %c8_i32_45 = arith.constant 8 : i32
    %122 = arith.muli %c1_i32, %c8_i32_45 : i32
    %123 = tpu.assume_multiple %122, 8 : i32
    %c8_i32_46 = arith.constant 8 : i32
    %124 = arith.muli %121, %c8_i32_46 : i32
    %125 = tpu.assume_multiple %124, 8 : i32
    %126 = arith.index_cast %123 : i32 to index
    %c0_47 = arith.constant 0 : index
    %127 = vector.load %arg10[%126, %c0_47] : memref<64x768xf32, #tpu.memory_space<vmem>>, vector<8x384xf32>
    %128 = arith.index_cast %125 : i32 to index
    %c384_48 = arith.constant 384 : index
    %129 = vector.load %arg10[%128, %c384_48] : memref<64x768xf32, #tpu.memory_space<vmem>>, vector<8x384xf32>
    %130 = arith.truncf %99 : vector<8x128xf32> to vector<8x128xbf16>
    %cst_49 = arith.constant dense<0.000000e+00> : vector<8x384xf32>
    %131 = tpu.matmul %130, %8, %cst_49 {dimension_numbers = #tpu.dot_dimension_numbers<[1], [0], [0], [1], [0, 0, 1, 1], [], []>} : vector<8x128xbf16>, vector<128x384xbf16>, vector<8x384xf32> -> vector<8x384xf32>
    %132 = vector.extract_strided_slice %127 {offsets = [0, 0], sizes = [8, 128], strides = [1, 1]} : vector<8x384xf32> to vector<8x128xf32>
    %133 = vector.extract_strided_slice %131 {offsets = [0, 0], sizes = [8, 128], strides = [1, 1]} : vector<8x384xf32> to vector<8x128xf32>
    %134 = arith.addf %132, %133 : vector<8x128xf32>
    %cst_50 = arith.constant 5.000000e-01 : f32
    %135 = vector.broadcast %cst_50 : f32 to vector<8x128xf32>
    %136 = arith.mulf %135, %134 : vector<8x128xf32>
    %137 = math.tanh %136 : vector<8x128xf32>
    %cst_51 = arith.constant 1.000000e+00 : f32
    %138 = vector.broadcast %cst_51 : f32 to vector<8x128xf32>
    %139 = arith.addf %137, %138 : vector<8x128xf32>
    %cst_52 = arith.constant 5.000000e-01 : f32
    %140 = vector.broadcast %cst_52 : f32 to vector<8x128xf32>
    %141 = arith.mulf %140, %139 : vector<8x128xf32>
    %142 = vector.extract_strided_slice %127 {offsets = [0, 128], sizes = [8, 128], strides = [1, 1]} : vector<8x384xf32> to vector<8x128xf32>
    %143 = vector.extract_strided_slice %131 {offsets = [0, 128], sizes = [8, 128], strides = [1, 1]} : vector<8x384xf32> to vector<8x128xf32>
    %144 = arith.addf %142, %143 : vector<8x128xf32>
    %cst_53 = arith.constant 5.000000e-01 : f32
    %145 = vector.broadcast %cst_53 : f32 to vector<8x128xf32>
    %146 = arith.mulf %145, %144 : vector<8x128xf32>
    %147 = math.tanh %146 : vector<8x128xf32>
    %cst_54 = arith.constant 1.000000e+00 : f32
    %148 = vector.broadcast %cst_54 : f32 to vector<8x128xf32>
    %149 = arith.addf %147, %148 : vector<8x128xf32>
    %cst_55 = arith.constant 5.000000e-01 : f32
    %150 = vector.broadcast %cst_55 : f32 to vector<8x128xf32>
    %151 = arith.mulf %150, %149 : vector<8x128xf32>
    %152 = vector.extract_strided_slice %127 {offsets = [0, 256], sizes = [8, 128], strides = [1, 1]} : vector<8x384xf32> to vector<8x128xf32>
    %153 = vector.extract_strided_slice %131 {offsets = [0, 256], sizes = [8, 128], strides = [1, 1]} : vector<8x384xf32> to vector<8x128xf32>
    %154 = arith.addf %153, %12 : vector<8x128xf32>
    %155 = arith.mulf %141, %154 : vector<8x128xf32>
    %156 = arith.addf %152, %155 : vector<8x128xf32>
    %157 = math.tanh %156 : vector<8x128xf32>
    %cst_56 = arith.constant 1.000000e+00 : f32
    %158 = vector.broadcast %cst_56 : f32 to vector<8x128xf32>
    %159 = arith.subf %158, %151 : vector<8x128xf32>
    %160 = arith.mulf %159, %157 : vector<8x128xf32>
    %161 = arith.mulf %151, %99 : vector<8x128xf32>
    %162 = arith.addf %160, %161 : vector<8x128xf32>
    %163 = arith.truncf %102 : vector<8x128xf32> to vector<8x128xbf16>
    %cst_57 = arith.constant dense<0.000000e+00> : vector<8x384xf32>
    %164 = tpu.matmul %163, %9, %cst_57 {dimension_numbers = #tpu.dot_dimension_numbers<[1], [0], [0], [1], [0, 0, 1, 1], [], []>} : vector<8x128xbf16>, vector<128x384xbf16>, vector<8x384xf32> -> vector<8x384xf32>
    %165 = vector.extract_strided_slice %129 {offsets = [0, 0], sizes = [8, 128], strides = [1, 1]} : vector<8x384xf32> to vector<8x128xf32>
    %166 = vector.extract_strided_slice %164 {offsets = [0, 0], sizes = [8, 128], strides = [1, 1]} : vector<8x384xf32> to vector<8x128xf32>
    %167 = arith.addf %165, %166 : vector<8x128xf32>
    %cst_58 = arith.constant 5.000000e-01 : f32
    %168 = vector.broadcast %cst_58 : f32 to vector<8x128xf32>
    %169 = arith.mulf %168, %167 : vector<8x128xf32>
    %170 = math.tanh %169 : vector<8x128xf32>
    %cst_59 = arith.constant 1.000000e+00 : f32
    %171 = vector.broadcast %cst_59 : f32 to vector<8x128xf32>
    %172 = arith.addf %170, %171 : vector<8x128xf32>
    %cst_60 = arith.constant 5.000000e-01 : f32
    %173 = vector.broadcast %cst_60 : f32 to vector<8x128xf32>
    %174 = arith.mulf %173, %172 : vector<8x128xf32>
    %175 = vector.extract_strided_slice %129 {offsets = [0, 128], sizes = [8, 128], strides = [1, 1]} : vector<8x384xf32> to vector<8x128xf32>
    %176 = vector.extract_strided_slice %164 {offsets = [0, 128], sizes = [8, 128], strides = [1, 1]} : vector<8x384xf32> to vector<8x128xf32>
    %177 = arith.addf %175, %176 : vector<8x128xf32>
    %cst_61 = arith.constant 5.000000e-01 : f32
    %178 = vector.broadcast %cst_61 : f32 to vector<8x128xf32>
    %179 = arith.mulf %178, %177 : vector<8x128xf32>
    %180 = math.tanh %179 : vector<8x128xf32>
    %cst_62 = arith.constant 1.000000e+00 : f32
    %181 = vector.broadcast %cst_62 : f32 to vector<8x128xf32>
    %182 = arith.addf %180, %181 : vector<8x128xf32>
    %cst_63 = arith.constant 5.000000e-01 : f32
    %183 = vector.broadcast %cst_63 : f32 to vector<8x128xf32>
    %184 = arith.mulf %183, %182 : vector<8x128xf32>
    %185 = vector.extract_strided_slice %129 {offsets = [0, 256], sizes = [8, 128], strides = [1, 1]} : vector<8x384xf32> to vector<8x128xf32>
    %186 = vector.extract_strided_slice %164 {offsets = [0, 256], sizes = [8, 128], strides = [1, 1]} : vector<8x384xf32> to vector<8x128xf32>
    %187 = arith.addf %186, %15 : vector<8x128xf32>
    %188 = arith.mulf %174, %187 : vector<8x128xf32>
    %189 = arith.addf %185, %188 : vector<8x128xf32>
    %190 = math.tanh %189 : vector<8x128xf32>
    %cst_64 = arith.constant 1.000000e+00 : f32
    %191 = vector.broadcast %cst_64 : f32 to vector<8x128xf32>
    %192 = arith.subf %191, %184 : vector<8x128xf32>
    %193 = arith.mulf %192, %190 : vector<8x128xf32>
    %194 = arith.mulf %184, %102 : vector<8x128xf32>
    %195 = arith.addf %193, %194 : vector<8x128xf32>
    %196 = vector.broadcast %c1_i32 : i32 to vector<8x1xi32>
    %197 = arith.cmpi slt, %196, %16 : vector<8x1xi32>
    %198 = vector.broadcast %121 : i32 to vector<8x1xi32>
    %199 = arith.cmpi slt, %198, %16 : vector<8x1xi32>
    %200 = vector.shape_cast %197 : vector<8x1xi1> to vector<8x1xi1>
    %201 = vector.broadcast %200 : vector<8x1xi1> to vector<8x128xi1>
    %202 = arith.select %201, %162, %99 : vector<8x128xi1>, vector<8x128xf32>
    %203 = vector.shape_cast %199 : vector<8x1xi1> to vector<8x1xi1>
    %204 = vector.broadcast %203 : vector<8x1xi1> to vector<8x128xi1>
    %205 = arith.select %204, %195, %102 : vector<8x128xi1>, vector<8x128xf32>
    %cst_65 = arith.constant 5.000000e-01 : f32
    %206 = vector.broadcast %cst_65 : f32 to vector<8x128xf32>
    %207 = arith.mulf %206, %202 : vector<8x128xf32>
    %cst_66 = arith.constant 0.000000e+00 : f32
    %208 = vector.shape_cast %197 : vector<8x1xi1> to vector<8x1xi1>
    %209 = vector.broadcast %208 : vector<8x1xi1> to vector<8x128xi1>
    %210 = vector.broadcast %cst_66 : f32 to vector<8x128xf32>
    %211 = arith.select %209, %207, %210 : vector<8x128xi1>, vector<8x128xf32>
    %212 = arith.index_cast %c1_i32 : i32 to index
    %c0_67 = arith.constant 0 : index
    %c0_68 = arith.constant 0 : index
    %213 = vector.load %arg9[%212, %c0_67, %c0_68] : memref<8x8x128xf32, #tpu.memory_space<vmem>>, vector<1x8x128xf32>
    %214 = vector.shape_cast %213 : vector<1x8x128xf32> to vector<8x128xf32>
    %215 = vector.shape_cast %211 : vector<8x128xf32> to vector<1x8x128xf32>
    tpu.vector_store %arg9[%212, %c0_67, %c0_68], %215 {strides = array<i32>} : memref<8x8x128xf32, #tpu.memory_space<vmem>>, vector<1x8x128xf32>,
    %cst_69 = arith.constant 5.000000e-01 : f32
    %216 = vector.broadcast %cst_69 : f32 to vector<8x128xf32>
    %217 = arith.mulf %216, %205 : vector<8x128xf32>
    %cst_70 = arith.constant 0.000000e+00 : f32
    %218 = vector.shape_cast %199 : vector<8x1xi1> to vector<8x1xi1>
    %219 = vector.broadcast %218 : vector<8x1xi1> to vector<8x128xi1>
    %220 = vector.broadcast %cst_70 : f32 to vector<8x128xf32>
    %221 = arith.select %219, %217, %220 : vector<8x128xi1>, vector<8x128xf32>
    %222 = arith.index_cast %125 : i32 to index
    %c0_71 = arith.constant 0 : index
    %223 = vector.load %arg11[%222, %c0_71] : memref<64x128xf32, #tpu.memory_space<vmem>>, vector<8x128xf32>
    tpu.vector_store %arg11[%222, %c0_71], %221 {strides = array<i32>} : memref<64x128xf32, #tpu.memory_space<vmem>>, vector<8x128xf32>,
    %c2_i32 = arith.constant 2 : i32
    %c7_i32_72 = arith.constant 7 : i32
    %224 = arith.subi %c7_i32_72, %c2_i32 : i32
    %c8_i32_73 = arith.constant 8 : i32
    %225 = arith.muli %c2_i32, %c8_i32_73 : i32
    %226 = tpu.assume_multiple %225, 8 : i32
    %c8_i32_74 = arith.constant 8 : i32
    %227 = arith.muli %224, %c8_i32_74 : i32
    %228 = tpu.assume_multiple %227, 8 : i32
    %229 = arith.index_cast %226 : i32 to index
    %c0_75 = arith.constant 0 : index
    %230 = vector.load %arg10[%229, %c0_75] : memref<64x768xf32, #tpu.memory_space<vmem>>, vector<8x384xf32>
    %231 = arith.index_cast %228 : i32 to index
    %c384_76 = arith.constant 384 : index
    %232 = vector.load %arg10[%231, %c384_76] : memref<64x768xf32, #tpu.memory_space<vmem>>, vector<8x384xf32>
    %233 = arith.truncf %202 : vector<8x128xf32> to vector<8x128xbf16>
    %cst_77 = arith.constant dense<0.000000e+00> : vector<8x384xf32>
    %234 = tpu.matmul %233, %8, %cst_77 {dimension_numbers = #tpu.dot_dimension_numbers<[1], [0], [0], [1], [0, 0, 1, 1], [], []>} : vector<8x128xbf16>, vector<128x384xbf16>, vector<8x384xf32> -> vector<8x384xf32>
    %235 = vector.extract_strided_slice %230 {offsets = [0, 0], sizes = [8, 128], strides = [1, 1]} : vector<8x384xf32> to vector<8x128xf32>
    %236 = vector.extract_strided_slice %234 {offsets = [0, 0], sizes = [8, 128], strides = [1, 1]} : vector<8x384xf32> to vector<8x128xf32>
    %237 = arith.addf %235, %236 : vector<8x128xf32>
    %cst_78 = arith.constant 5.000000e-01 : f32
    %238 = vector.broadcast %cst_78 : f32 to vector<8x128xf32>
    %239 = arith.mulf %238, %237 : vector<8x128xf32>
    %240 = math.tanh %239 : vector<8x128xf32>
    %cst_79 = arith.constant 1.000000e+00 : f32
    %241 = vector.broadcast %cst_79 : f32 to vector<8x128xf32>
    %242 = arith.addf %240, %241 : vector<8x128xf32>
    %cst_80 = arith.constant 5.000000e-01 : f32
    %243 = vector.broadcast %cst_80 : f32 to vector<8x128xf32>
    %244 = arith.mulf %243, %242 : vector<8x128xf32>
    %245 = vector.extract_strided_slice %230 {offsets = [0, 128], sizes = [8, 128], strides = [1, 1]} : vector<8x384xf32> to vector<8x128xf32>
    %246 = vector.extract_strided_slice %234 {offsets = [0, 128], sizes = [8, 128], strides = [1, 1]} : vector<8x384xf32> to vector<8x128xf32>
    %247 = arith.addf %245, %246 : vector<8x128xf32>
    %cst_81 = arith.constant 5.000000e-01 : f32
    %248 = vector.broadcast %cst_81 : f32 to vector<8x128xf32>
    %249 = arith.mulf %248, %247 : vector<8x128xf32>
    %250 = math.tanh %249 : vector<8x128xf32>
    %cst_82 = arith.constant 1.000000e+00 : f32
    %251 = vector.broadcast %cst_82 : f32 to vector<8x128xf32>
    %252 = arith.addf %250, %251 : vector<8x128xf32>
    %cst_83 = arith.constant 5.000000e-01 : f32
    %253 = vector.broadcast %cst_83 : f32 to vector<8x128xf32>
    %254 = arith.mulf %253, %252 : vector<8x128xf32>
    %255 = vector.extract_strided_slice %230 {offsets = [0, 256], sizes = [8, 128], strides = [1, 1]} : vector<8x384xf32> to vector<8x128xf32>
    %256 = vector.extract_strided_slice %234 {offsets = [0, 256], sizes = [8, 128], strides = [1, 1]} : vector<8x384xf32> to vector<8x128xf32>
    %257 = arith.addf %256, %12 : vector<8x128xf32>
    %258 = arith.mulf %244, %257 : vector<8x128xf32>
    %259 = arith.addf %255, %258 : vector<8x128xf32>
    %260 = math.tanh %259 : vector<8x128xf32>
    %cst_84 = arith.constant 1.000000e+00 : f32
    %261 = vector.broadcast %cst_84 : f32 to vector<8x128xf32>
    %262 = arith.subf %261, %254 : vector<8x128xf32>
    %263 = arith.mulf %262, %260 : vector<8x128xf32>
    %264 = arith.mulf %254, %202 : vector<8x128xf32>
    %265 = arith.addf %263, %264 : vector<8x128xf32>
    %266 = arith.truncf %205 : vector<8x128xf32> to vector<8x128xbf16>
    %cst_85 = arith.constant dense<0.000000e+00> : vector<8x384xf32>
    %267 = tpu.matmul %266, %9, %cst_85 {dimension_numbers = #tpu.dot_dimension_numbers<[1], [0], [0], [1], [0, 0, 1, 1], [], []>} : vector<8x128xbf16>, vector<128x384xbf16>, vector<8x384xf32> -> vector<8x384xf32>
    %268 = vector.extract_strided_slice %232 {offsets = [0, 0], sizes = [8, 128], strides = [1, 1]} : vector<8x384xf32> to vector<8x128xf32>
    %269 = vector.extract_strided_slice %267 {offsets = [0, 0], sizes = [8, 128], strides = [1, 1]} : vector<8x384xf32> to vector<8x128xf32>
    %270 = arith.addf %268, %269 : vector<8x128xf32>
    %cst_86 = arith.constant 5.000000e-01 : f32
    %271 = vector.broadcast %cst_86 : f32 to vector<8x128xf32>
    %272 = arith.mulf %271, %270 : vector<8x128xf32>
    %273 = math.tanh %272 : vector<8x128xf32>
    %cst_87 = arith.constant 1.000000e+00 : f32
    %274 = vector.broadcast %cst_87 : f32 to vector<8x128xf32>
    %275 = arith.addf %273, %274 : vector<8x128xf32>
    %cst_88 = arith.constant 5.000000e-01 : f32
    %276 = vector.broadcast %cst_88 : f32 to vector<8x128xf32>
    %277 = arith.mulf %276, %275 : vector<8x128xf32>
    %278 = vector.extract_strided_slice %232 {offsets = [0, 128], sizes = [8, 128], strides = [1, 1]} : vector<8x384xf32> to vector<8x128xf32>
    %279 = vector.extract_strided_slice %267 {offsets = [0, 128], sizes = [8, 128], strides = [1, 1]} : vector<8x384xf32> to vector<8x128xf32>
    %280 = arith.addf %278, %279 : vector<8x128xf32>
    %cst_89 = arith.constant 5.000000e-01 : f32
    %281 = vector.broadcast %cst_89 : f32 to vector<8x128xf32>
    %282 = arith.mulf %281, %280 : vector<8x128xf32>
    %283 = math.tanh %282 : vector<8x128xf32>
    %cst_90 = arith.constant 1.000000e+00 : f32
    %284 = vector.broadcast %cst_90 : f32 to vector<8x128xf32>
    %285 = arith.addf %283, %284 : vector<8x128xf32>
    %cst_91 = arith.constant 5.000000e-01 : f32
    %286 = vector.broadcast %cst_91 : f32 to vector<8x128xf32>
    %287 = arith.mulf %286, %285 : vector<8x128xf32>
    %288 = vector.extract_strided_slice %232 {offsets = [0, 256], sizes = [8, 128], strides = [1, 1]} : vector<8x384xf32> to vector<8x128xf32>
    %289 = vector.extract_strided_slice %267 {offsets = [0, 256], sizes = [8, 128], strides = [1, 1]} : vector<8x384xf32> to vector<8x128xf32>
    %290 = arith.addf %289, %15 : vector<8x128xf32>
    %291 = arith.mulf %277, %290 : vector<8x128xf32>
    %292 = arith.addf %288, %291 : vector<8x128xf32>
    %293 = math.tanh %292 : vector<8x128xf32>
    %cst_92 = arith.constant 1.000000e+00 : f32
    %294 = vector.broadcast %cst_92 : f32 to vector<8x128xf32>
    %295 = arith.subf %294, %287 : vector<8x128xf32>
    %296 = arith.mulf %295, %293 : vector<8x128xf32>
    %297 = arith.mulf %287, %205 : vector<8x128xf32>
    %298 = arith.addf %296, %297 : vector<8x128xf32>
    %299 = vector.broadcast %c2_i32 : i32 to vector<8x1xi32>
    %300 = arith.cmpi slt, %299, %16 : vector<8x1xi32>
    %301 = vector.broadcast %224 : i32 to vector<8x1xi32>
    %302 = arith.cmpi slt, %301, %16 : vector<8x1xi32>
    %303 = vector.shape_cast %300 : vector<8x1xi1> to vector<8x1xi1>
    %304 = vector.broadcast %303 : vector<8x1xi1> to vector<8x128xi1>
    %305 = arith.select %304, %265, %202 : vector<8x128xi1>, vector<8x128xf32>
    %306 = vector.shape_cast %302 : vector<8x1xi1> to vector<8x1xi1>
    %307 = vector.broadcast %306 : vector<8x1xi1> to vector<8x128xi1>
    %308 = arith.select %307, %298, %205 : vector<8x128xi1>, vector<8x128xf32>
    %cst_93 = arith.constant 5.000000e-01 : f32
    %309 = vector.broadcast %cst_93 : f32 to vector<8x128xf32>
    %310 = arith.mulf %309, %305 : vector<8x128xf32>
    %cst_94 = arith.constant 0.000000e+00 : f32
    %311 = vector.shape_cast %300 : vector<8x1xi1> to vector<8x1xi1>
    %312 = vector.broadcast %311 : vector<8x1xi1> to vector<8x128xi1>
    %313 = vector.broadcast %cst_94 : f32 to vector<8x128xf32>
    %314 = arith.select %312, %310, %313 : vector<8x128xi1>, vector<8x128xf32>
    %315 = arith.index_cast %c2_i32 : i32 to index
    %c0_95 = arith.constant 0 : index
    %c0_96 = arith.constant 0 : index
    %316 = vector.load %arg9[%315, %c0_95, %c0_96] : memref<8x8x128xf32, #tpu.memory_space<vmem>>, vector<1x8x128xf32>
    %317 = vector.shape_cast %316 : vector<1x8x128xf32> to vector<8x128xf32>
    %318 = vector.shape_cast %314 : vector<8x128xf32> to vector<1x8x128xf32>
    tpu.vector_store %arg9[%315, %c0_95, %c0_96], %318 {strides = array<i32>} : memref<8x8x128xf32, #tpu.memory_space<vmem>>, vector<1x8x128xf32>,
    %cst_97 = arith.constant 5.000000e-01 : f32
    %319 = vector.broadcast %cst_97 : f32 to vector<8x128xf32>
    %320 = arith.mulf %319, %308 : vector<8x128xf32>
    %cst_98 = arith.constant 0.000000e+00 : f32
    %321 = vector.shape_cast %302 : vector<8x1xi1> to vector<8x1xi1>
    %322 = vector.broadcast %321 : vector<8x1xi1> to vector<8x128xi1>
    %323 = vector.broadcast %cst_98 : f32 to vector<8x128xf32>
    %324 = arith.select %322, %320, %323 : vector<8x128xi1>, vector<8x128xf32>
    %325 = arith.index_cast %228 : i32 to index
    %c0_99 = arith.constant 0 : index
    %326 = vector.load %arg11[%325, %c0_99] : memref<64x128xf32, #tpu.memory_space<vmem>>, vector<8x128xf32>
    tpu.vector_store %arg11[%325, %c0_99], %324 {strides = array<i32>} : memref<64x128xf32, #tpu.memory_space<vmem>>, vector<8x128xf32>,
    %c3_i32 = arith.constant 3 : i32
    %c7_i32_100 = arith.constant 7 : i32
    %327 = arith.subi %c7_i32_100, %c3_i32 : i32
    %c8_i32_101 = arith.constant 8 : i32
    %328 = arith.muli %c3_i32, %c8_i32_101 : i32
    %329 = tpu.assume_multiple %328, 8 : i32
    %c8_i32_102 = arith.constant 8 : i32
    %330 = arith.muli %327, %c8_i32_102 : i32
    %331 = tpu.assume_multiple %330, 8 : i32
    %332 = arith.index_cast %329 : i32 to index
    %c0_103 = arith.constant 0 : index
    %333 = vector.load %arg10[%332, %c0_103] : memref<64x768xf32, #tpu.memory_space<vmem>>, vector<8x384xf32>
    %334 = arith.index_cast %331 : i32 to index
    %c384_104 = arith.constant 384 : index
    %335 = vector.load %arg10[%334, %c384_104] : memref<64x768xf32, #tpu.memory_space<vmem>>, vector<8x384xf32>
    %336 = arith.truncf %305 : vector<8x128xf32> to vector<8x128xbf16>
    %cst_105 = arith.constant dense<0.000000e+00> : vector<8x384xf32>
    %337 = tpu.matmul %336, %8, %cst_105 {dimension_numbers = #tpu.dot_dimension_numbers<[1], [0], [0], [1], [0, 0, 1, 1], [], []>} : vector<8x128xbf16>, vector<128x384xbf16>, vector<8x384xf32> -> vector<8x384xf32>
    %338 = vector.extract_strided_slice %333 {offsets = [0, 0], sizes = [8, 128], strides = [1, 1]} : vector<8x384xf32> to vector<8x128xf32>
    %339 = vector.extract_strided_slice %337 {offsets = [0, 0], sizes = [8, 128], strides = [1, 1]} : vector<8x384xf32> to vector<8x128xf32>
    %340 = arith.addf %338, %339 : vector<8x128xf32>
    %cst_106 = arith.constant 5.000000e-01 : f32
    %341 = vector.broadcast %cst_106 : f32 to vector<8x128xf32>
    %342 = arith.mulf %341, %340 : vector<8x128xf32>
    %343 = math.tanh %342 : vector<8x128xf32>
    %cst_107 = arith.constant 1.000000e+00 : f32
    %344 = vector.broadcast %cst_107 : f32 to vector<8x128xf32>
    %345 = arith.addf %343, %344 : vector<8x128xf32>
    %cst_108 = arith.constant 5.000000e-01 : f32
    %346 = vector.broadcast %cst_108 : f32 to vector<8x128xf32>
    %347 = arith.mulf %346, %345 : vector<8x128xf32>
    %348 = vector.extract_strided_slice %333 {offsets = [0, 128], sizes = [8, 128], strides = [1, 1]} : vector<8x384xf32> to vector<8x128xf32>
    %349 = vector.extract_strided_slice %337 {offsets = [0, 128], sizes = [8, 128], strides = [1, 1]} : vector<8x384xf32> to vector<8x128xf32>
    %350 = arith.addf %348, %349 : vector<8x128xf32>
    %cst_109 = arith.constant 5.000000e-01 : f32
    %351 = vector.broadcast %cst_109 : f32 to vector<8x128xf32>
    %352 = arith.mulf %351, %350 : vector<8x128xf32>
    %353 = math.tanh %352 : vector<8x128xf32>
    %cst_110 = arith.constant 1.000000e+00 : f32
    %354 = vector.broadcast %cst_110 : f32 to vector<8x128xf32>
    %355 = arith.addf %353, %354 : vector<8x128xf32>
    %cst_111 = arith.constant 5.000000e-01 : f32
    %356 = vector.broadcast %cst_111 : f32 to vector<8x128xf32>
    %357 = arith.mulf %356, %355 : vector<8x128xf32>
    %358 = vector.extract_strided_slice %333 {offsets = [0, 256], sizes = [8, 128], strides = [1, 1]} : vector<8x384xf32> to vector<8x128xf32>
    %359 = vector.extract_strided_slice %337 {offsets = [0, 256], sizes = [8, 128], strides = [1, 1]} : vector<8x384xf32> to vector<8x128xf32>
    %360 = arith.addf %359, %12 : vector<8x128xf32>
    %361 = arith.mulf %347, %360 : vector<8x128xf32>
    %362 = arith.addf %358, %361 : vector<8x128xf32>
    %363 = math.tanh %362 : vector<8x128xf32>
    %cst_112 = arith.constant 1.000000e+00 : f32
    %364 = vector.broadcast %cst_112 : f32 to vector<8x128xf32>
    %365 = arith.subf %364, %357 : vector<8x128xf32>
    %366 = arith.mulf %365, %363 : vector<8x128xf32>
    %367 = arith.mulf %357, %305 : vector<8x128xf32>
    %368 = arith.addf %366, %367 : vector<8x128xf32>
    %369 = arith.truncf %308 : vector<8x128xf32> to vector<8x128xbf16>
    %cst_113 = arith.constant dense<0.000000e+00> : vector<8x384xf32>
    %370 = tpu.matmul %369, %9, %cst_113 {dimension_numbers = #tpu.dot_dimension_numbers<[1], [0], [0], [1], [0, 0, 1, 1], [], []>} : vector<8x128xbf16>, vector<128x384xbf16>, vector<8x384xf32> -> vector<8x384xf32>
    %371 = vector.extract_strided_slice %335 {offsets = [0, 0], sizes = [8, 128], strides = [1, 1]} : vector<8x384xf32> to vector<8x128xf32>
    %372 = vector.extract_strided_slice %370 {offsets = [0, 0], sizes = [8, 128], strides = [1, 1]} : vector<8x384xf32> to vector<8x128xf32>
    %373 = arith.addf %371, %372 : vector<8x128xf32>
    %cst_114 = arith.constant 5.000000e-01 : f32
    %374 = vector.broadcast %cst_114 : f32 to vector<8x128xf32>
    %375 = arith.mulf %374, %373 : vector<8x128xf32>
    %376 = math.tanh %375 : vector<8x128xf32>
    %cst_115 = arith.constant 1.000000e+00 : f32
    %377 = vector.broadcast %cst_115 : f32 to vector<8x128xf32>
    %378 = arith.addf %376, %377 : vector<8x128xf32>
    %cst_116 = arith.constant 5.000000e-01 : f32
    %379 = vector.broadcast %cst_116 : f32 to vector<8x128xf32>
    %380 = arith.mulf %379, %378 : vector<8x128xf32>
    %381 = vector.extract_strided_slice %335 {offsets = [0, 128], sizes = [8, 128], strides = [1, 1]} : vector<8x384xf32> to vector<8x128xf32>
    %382 = vector.extract_strided_slice %370 {offsets = [0, 128], sizes = [8, 128], strides = [1, 1]} : vector<8x384xf32> to vector<8x128xf32>
    %383 = arith.addf %381, %382 : vector<8x128xf32>
    %cst_117 = arith.constant 5.000000e-01 : f32
    %384 = vector.broadcast %cst_117 : f32 to vector<8x128xf32>
    %385 = arith.mulf %384, %383 : vector<8x128xf32>
    %386 = math.tanh %385 : vector<8x128xf32>
    %cst_118 = arith.constant 1.000000e+00 : f32
    %387 = vector.broadcast %cst_118 : f32 to vector<8x128xf32>
    %388 = arith.addf %386, %387 : vector<8x128xf32>
    %cst_119 = arith.constant 5.000000e-01 : f32
    %389 = vector.broadcast %cst_119 : f32 to vector<8x128xf32>
    %390 = arith.mulf %389, %388 : vector<8x128xf32>
    %391 = vector.extract_strided_slice %335 {offsets = [0, 256], sizes = [8, 128], strides = [1, 1]} : vector<8x384xf32> to vector<8x128xf32>
    %392 = vector.extract_strided_slice %370 {offsets = [0, 256], sizes = [8, 128], strides = [1, 1]} : vector<8x384xf32> to vector<8x128xf32>
    %393 = arith.addf %392, %15 : vector<8x128xf32>
    %394 = arith.mulf %380, %393 : vector<8x128xf32>
    %395 = arith.addf %391, %394 : vector<8x128xf32>
    %396 = math.tanh %395 : vector<8x128xf32>
    %cst_120 = arith.constant 1.000000e+00 : f32
    %397 = vector.broadcast %cst_120 : f32 to vector<8x128xf32>
    %398 = arith.subf %397, %390 : vector<8x128xf32>
    %399 = arith.mulf %398, %396 : vector<8x128xf32>
    %400 = arith.mulf %390, %308 : vector<8x128xf32>
    %401 = arith.addf %399, %400 : vector<8x128xf32>
    %402 = vector.broadcast %c3_i32 : i32 to vector<8x1xi32>
    %403 = arith.cmpi slt, %402, %16 : vector<8x1xi32>
    %404 = vector.broadcast %327 : i32 to vector<8x1xi32>
    %405 = arith.cmpi slt, %404, %16 : vector<8x1xi32>
    %406 = vector.shape_cast %403 : vector<8x1xi1> to vector<8x1xi1>
    %407 = vector.broadcast %406 : vector<8x1xi1> to vector<8x128xi1>
    %408 = arith.select %407, %368, %305 : vector<8x128xi1>, vector<8x128xf32>
    %409 = vector.shape_cast %405 : vector<8x1xi1> to vector<8x1xi1>
    %410 = vector.broadcast %409 : vector<8x1xi1> to vector<8x128xi1>
    %411 = arith.select %410, %401, %308 : vector<8x128xi1>, vector<8x128xf32>
    %cst_121 = arith.constant 5.000000e-01 : f32
    %412 = vector.broadcast %cst_121 : f32 to vector<8x128xf32>
    %413 = arith.mulf %412, %408 : vector<8x128xf32>
    %cst_122 = arith.constant 0.000000e+00 : f32
    %414 = vector.shape_cast %403 : vector<8x1xi1> to vector<8x1xi1>
    %415 = vector.broadcast %414 : vector<8x1xi1> to vector<8x128xi1>
    %416 = vector.broadcast %cst_122 : f32 to vector<8x128xf32>
    %417 = arith.select %415, %413, %416 : vector<8x128xi1>, vector<8x128xf32>
    %418 = arith.index_cast %c3_i32 : i32 to index
    %c0_123 = arith.constant 0 : index
    %c0_124 = arith.constant 0 : index
    %419 = vector.load %arg9[%418, %c0_123, %c0_124] : memref<8x8x128xf32, #tpu.memory_space<vmem>>, vector<1x8x128xf32>
    %420 = vector.shape_cast %419 : vector<1x8x128xf32> to vector<8x128xf32>
    %421 = vector.shape_cast %417 : vector<8x128xf32> to vector<1x8x128xf32>
    tpu.vector_store %arg9[%418, %c0_123, %c0_124], %421 {strides = array<i32>} : memref<8x8x128xf32, #tpu.memory_space<vmem>>, vector<1x8x128xf32>,
    %cst_125 = arith.constant 5.000000e-01 : f32
    %422 = vector.broadcast %cst_125 : f32 to vector<8x128xf32>
    %423 = arith.mulf %422, %411 : vector<8x128xf32>
    %cst_126 = arith.constant 0.000000e+00 : f32
    %424 = vector.shape_cast %405 : vector<8x1xi1> to vector<8x1xi1>
    %425 = vector.broadcast %424 : vector<8x1xi1> to vector<8x128xi1>
    %426 = vector.broadcast %cst_126 : f32 to vector<8x128xf32>
    %427 = arith.select %425, %423, %426 : vector<8x128xi1>, vector<8x128xf32>
    %428 = arith.index_cast %331 : i32 to index
    %c0_127 = arith.constant 0 : index
    %429 = vector.load %arg11[%428, %c0_127] : memref<64x128xf32, #tpu.memory_space<vmem>>, vector<8x128xf32>
    tpu.vector_store %arg11[%428, %c0_127], %427 {strides = array<i32>} : memref<64x128xf32, #tpu.memory_space<vmem>>, vector<8x128xf32>,
    %c4_i32 = arith.constant 4 : i32
    %c7_i32_128 = arith.constant 7 : i32
    %430 = arith.subi %c7_i32_128, %c4_i32 : i32
    %c8_i32_129 = arith.constant 8 : i32
    %431 = arith.muli %c4_i32, %c8_i32_129 : i32
    %432 = tpu.assume_multiple %431, 8 : i32
    %c8_i32_130 = arith.constant 8 : i32
    %433 = arith.muli %430, %c8_i32_130 : i32
    %434 = tpu.assume_multiple %433, 8 : i32
    %435 = arith.index_cast %432 : i32 to index
    %c0_131 = arith.constant 0 : index
    %436 = vector.load %arg10[%435, %c0_131] : memref<64x768xf32, #tpu.memory_space<vmem>>, vector<8x384xf32>
    %437 = arith.index_cast %434 : i32 to index
    %c384_132 = arith.constant 384 : index
    %438 = vector.load %arg10[%437, %c384_132] : memref<64x768xf32, #tpu.memory_space<vmem>>, vector<8x384xf32>
    %439 = arith.truncf %408 : vector<8x128xf32> to vector<8x128xbf16>
    %cst_133 = arith.constant dense<0.000000e+00> : vector<8x384xf32>
    %440 = tpu.matmul %439, %8, %cst_133 {dimension_numbers = #tpu.dot_dimension_numbers<[1], [0], [0], [1], [0, 0, 1, 1], [], []>} : vector<8x128xbf16>, vector<128x384xbf16>, vector<8x384xf32> -> vector<8x384xf32>
    %441 = vector.extract_strided_slice %436 {offsets = [0, 0], sizes = [8, 128], strides = [1, 1]} : vector<8x384xf32> to vector<8x128xf32>
    %442 = vector.extract_strided_slice %440 {offsets = [0, 0], sizes = [8, 128], strides = [1, 1]} : vector<8x384xf32> to vector<8x128xf32>
    %443 = arith.addf %441, %442 : vector<8x128xf32>
    %cst_134 = arith.constant 5.000000e-01 : f32
    %444 = vector.broadcast %cst_134 : f32 to vector<8x128xf32>
    %445 = arith.mulf %444, %443 : vector<8x128xf32>
    %446 = math.tanh %445 : vector<8x128xf32>
    %cst_135 = arith.constant 1.000000e+00 : f32
    %447 = vector.broadcast %cst_135 : f32 to vector<8x128xf32>
    %448 = arith.addf %446, %447 : vector<8x128xf32>
    %cst_136 = arith.constant 5.000000e-01 : f32
    %449 = vector.broadcast %cst_136 : f32 to vector<8x128xf32>
    %450 = arith.mulf %449, %448 : vector<8x128xf32>
    %451 = vector.extract_strided_slice %436 {offsets = [0, 128], sizes = [8, 128], strides = [1, 1]} : vector<8x384xf32> to vector<8x128xf32>
    %452 = vector.extract_strided_slice %440 {offsets = [0, 128], sizes = [8, 128], strides = [1, 1]} : vector<8x384xf32> to vector<8x128xf32>
    %453 = arith.addf %451, %452 : vector<8x128xf32>
    %cst_137 = arith.constant 5.000000e-01 : f32
    %454 = vector.broadcast %cst_137 : f32 to vector<8x128xf32>
    %455 = arith.mulf %454, %453 : vector<8x128xf32>
    %456 = math.tanh %455 : vector<8x128xf32>
    %cst_138 = arith.constant 1.000000e+00 : f32
    %457 = vector.broadcast %cst_138 : f32 to vector<8x128xf32>
    %458 = arith.addf %456, %457 : vector<8x128xf32>
    %cst_139 = arith.constant 5.000000e-01 : f32
    %459 = vector.broadcast %cst_139 : f32 to vector<8x128xf32>
    %460 = arith.mulf %459, %458 : vector<8x128xf32>
    %461 = vector.extract_strided_slice %436 {offsets = [0, 256], sizes = [8, 128], strides = [1, 1]} : vector<8x384xf32> to vector<8x128xf32>
    %462 = vector.extract_strided_slice %440 {offsets = [0, 256], sizes = [8, 128], strides = [1, 1]} : vector<8x384xf32> to vector<8x128xf32>
    %463 = arith.addf %462, %12 : vector<8x128xf32>
    %464 = arith.mulf %450, %463 : vector<8x128xf32>
    %465 = arith.addf %461, %464 : vector<8x128xf32>
    %466 = math.tanh %465 : vector<8x128xf32>
    %cst_140 = arith.constant 1.000000e+00 : f32
    %467 = vector.broadcast %cst_140 : f32 to vector<8x128xf32>
    %468 = arith.subf %467, %460 : vector<8x128xf32>
    %469 = arith.mulf %468, %466 : vector<8x128xf32>
    %470 = arith.mulf %460, %408 : vector<8x128xf32>
    %471 = arith.addf %469, %470 : vector<8x128xf32>
    %472 = arith.truncf %411 : vector<8x128xf32> to vector<8x128xbf16>
    %cst_141 = arith.constant dense<0.000000e+00> : vector<8x384xf32>
    %473 = tpu.matmul %472, %9, %cst_141 {dimension_numbers = #tpu.dot_dimension_numbers<[1], [0], [0], [1], [0, 0, 1, 1], [], []>} : vector<8x128xbf16>, vector<128x384xbf16>, vector<8x384xf32> -> vector<8x384xf32>
    %474 = vector.extract_strided_slice %438 {offsets = [0, 0], sizes = [8, 128], strides = [1, 1]} : vector<8x384xf32> to vector<8x128xf32>
    %475 = vector.extract_strided_slice %473 {offsets = [0, 0], sizes = [8, 128], strides = [1, 1]} : vector<8x384xf32> to vector<8x128xf32>
    %476 = arith.addf %474, %475 : vector<8x128xf32>
    %cst_142 = arith.constant 5.000000e-01 : f32
    %477 = vector.broadcast %cst_142 : f32 to vector<8x128xf32>
    %478 = arith.mulf %477, %476 : vector<8x128xf32>
    %479 = math.tanh %478 : vector<8x128xf32>
    %cst_143 = arith.constant 1.000000e+00 : f32
    %480 = vector.broadcast %cst_143 : f32 to vector<8x128xf32>
    %481 = arith.addf %479, %480 : vector<8x128xf32>
    %cst_144 = arith.constant 5.000000e-01 : f32
    %482 = vector.broadcast %cst_144 : f32 to vector<8x128xf32>
    %483 = arith.mulf %482, %481 : vector<8x128xf32>
    %484 = vector.extract_strided_slice %438 {offsets = [0, 128], sizes = [8, 128], strides = [1, 1]} : vector<8x384xf32> to vector<8x128xf32>
    %485 = vector.extract_strided_slice %473 {offsets = [0, 128], sizes = [8, 128], strides = [1, 1]} : vector<8x384xf32> to vector<8x128xf32>
    %486 = arith.addf %484, %485 : vector<8x128xf32>
    %cst_145 = arith.constant 5.000000e-01 : f32
    %487 = vector.broadcast %cst_145 : f32 to vector<8x128xf32>
    %488 = arith.mulf %487, %486 : vector<8x128xf32>
    %489 = math.tanh %488 : vector<8x128xf32>
    %cst_146 = arith.constant 1.000000e+00 : f32
    %490 = vector.broadcast %cst_146 : f32 to vector<8x128xf32>
    %491 = arith.addf %489, %490 : vector<8x128xf32>
    %cst_147 = arith.constant 5.000000e-01 : f32
    %492 = vector.broadcast %cst_147 : f32 to vector<8x128xf32>
    %493 = arith.mulf %492, %491 : vector<8x128xf32>
    %494 = vector.extract_strided_slice %438 {offsets = [0, 256], sizes = [8, 128], strides = [1, 1]} : vector<8x384xf32> to vector<8x128xf32>
    %495 = vector.extract_strided_slice %473 {offsets = [0, 256], sizes = [8, 128], strides = [1, 1]} : vector<8x384xf32> to vector<8x128xf32>
    %496 = arith.addf %495, %15 : vector<8x128xf32>
    %497 = arith.mulf %483, %496 : vector<8x128xf32>
    %498 = arith.addf %494, %497 : vector<8x128xf32>
    %499 = math.tanh %498 : vector<8x128xf32>
    %cst_148 = arith.constant 1.000000e+00 : f32
    %500 = vector.broadcast %cst_148 : f32 to vector<8x128xf32>
    %501 = arith.subf %500, %493 : vector<8x128xf32>
    %502 = arith.mulf %501, %499 : vector<8x128xf32>
    %503 = arith.mulf %493, %411 : vector<8x128xf32>
    %504 = arith.addf %502, %503 : vector<8x128xf32>
    %505 = vector.broadcast %c4_i32 : i32 to vector<8x1xi32>
    %506 = arith.cmpi slt, %505, %16 : vector<8x1xi32>
    %507 = vector.broadcast %430 : i32 to vector<8x1xi32>
    %508 = arith.cmpi slt, %507, %16 : vector<8x1xi32>
    %509 = vector.shape_cast %506 : vector<8x1xi1> to vector<8x1xi1>
    %510 = vector.broadcast %509 : vector<8x1xi1> to vector<8x128xi1>
    %511 = arith.select %510, %471, %408 : vector<8x128xi1>, vector<8x128xf32>
    %512 = vector.shape_cast %508 : vector<8x1xi1> to vector<8x1xi1>
    %513 = vector.broadcast %512 : vector<8x1xi1> to vector<8x128xi1>
    %514 = arith.select %513, %504, %411 : vector<8x128xi1>, vector<8x128xf32>
    %cst_149 = arith.constant 5.000000e-01 : f32
    %515 = vector.broadcast %cst_149 : f32 to vector<8x128xf32>
    %516 = arith.mulf %515, %511 : vector<8x128xf32>
    %cst_150 = arith.constant 0.000000e+00 : f32
    %517 = vector.shape_cast %506 : vector<8x1xi1> to vector<8x1xi1>
    %518 = vector.broadcast %517 : vector<8x1xi1> to vector<8x128xi1>
    %519 = vector.broadcast %cst_150 : f32 to vector<8x128xf32>
    %520 = arith.select %518, %516, %519 : vector<8x128xi1>, vector<8x128xf32>
    %521 = arith.index_cast %c4_i32 : i32 to index
    %c0_151 = arith.constant 0 : index
    %c0_152 = arith.constant 0 : index
    %522 = vector.load %arg9[%521, %c0_151, %c0_152] : memref<8x8x128xf32, #tpu.memory_space<vmem>>, vector<1x8x128xf32>
    %523 = vector.shape_cast %522 : vector<1x8x128xf32> to vector<8x128xf32>
    %524 = vector.shape_cast %520 : vector<8x128xf32> to vector<1x8x128xf32>
    tpu.vector_store %arg9[%521, %c0_151, %c0_152], %524 {strides = array<i32>} : memref<8x8x128xf32, #tpu.memory_space<vmem>>, vector<1x8x128xf32>,
    %cst_153 = arith.constant 5.000000e-01 : f32
    %525 = vector.broadcast %cst_153 : f32 to vector<8x128xf32>
    %526 = arith.mulf %525, %514 : vector<8x128xf32>
    %cst_154 = arith.constant 0.000000e+00 : f32
    %527 = vector.shape_cast %508 : vector<8x1xi1> to vector<8x1xi1>
    %528 = vector.broadcast %527 : vector<8x1xi1> to vector<8x128xi1>
    %529 = vector.broadcast %cst_154 : f32 to vector<8x128xf32>
    %530 = arith.select %528, %526, %529 : vector<8x128xi1>, vector<8x128xf32>
    %531 = arith.index_cast %434 : i32 to index
    %c0_155 = arith.constant 0 : index
    %532 = vector.load %arg11[%531, %c0_155] : memref<64x128xf32, #tpu.memory_space<vmem>>, vector<8x128xf32>
    tpu.vector_store %arg11[%531, %c0_155], %530 {strides = array<i32>} : memref<64x128xf32, #tpu.memory_space<vmem>>, vector<8x128xf32>,
    %c5_i32 = arith.constant 5 : i32
    %c7_i32_156 = arith.constant 7 : i32
    %533 = arith.subi %c7_i32_156, %c5_i32 : i32
    %c8_i32_157 = arith.constant 8 : i32
    %534 = arith.muli %c5_i32, %c8_i32_157 : i32
    %535 = tpu.assume_multiple %534, 8 : i32
    %c8_i32_158 = arith.constant 8 : i32
    %536 = arith.muli %533, %c8_i32_158 : i32
    %537 = tpu.assume_multiple %536, 8 : i32
    %538 = arith.index_cast %535 : i32 to index
    %c0_159 = arith.constant 0 : index
    %539 = vector.load %arg10[%538, %c0_159] : memref<64x768xf32, #tpu.memory_space<vmem>>, vector<8x384xf32>
    %540 = arith.index_cast %537 : i32 to index
    %c384_160 = arith.constant 384 : index
    %541 = vector.load %arg10[%540, %c384_160] : memref<64x768xf32, #tpu.memory_space<vmem>>, vector<8x384xf32>
    %542 = arith.truncf %511 : vector<8x128xf32> to vector<8x128xbf16>
    %cst_161 = arith.constant dense<0.000000e+00> : vector<8x384xf32>
    %543 = tpu.matmul %542, %8, %cst_161 {dimension_numbers = #tpu.dot_dimension_numbers<[1], [0], [0], [1], [0, 0, 1, 1], [], []>} : vector<8x128xbf16>, vector<128x384xbf16>, vector<8x384xf32> -> vector<8x384xf32>
    %544 = vector.extract_strided_slice %539 {offsets = [0, 0], sizes = [8, 128], strides = [1, 1]} : vector<8x384xf32> to vector<8x128xf32>
    %545 = vector.extract_strided_slice %543 {offsets = [0, 0], sizes = [8, 128], strides = [1, 1]} : vector<8x384xf32> to vector<8x128xf32>
    %546 = arith.addf %544, %545 : vector<8x128xf32>
    %cst_162 = arith.constant 5.000000e-01 : f32
    %547 = vector.broadcast %cst_162 : f32 to vector<8x128xf32>
    %548 = arith.mulf %547, %546 : vector<8x128xf32>
    %549 = math.tanh %548 : vector<8x128xf32>
    %cst_163 = arith.constant 1.000000e+00 : f32
    %550 = vector.broadcast %cst_163 : f32 to vector<8x128xf32>
    %551 = arith.addf %549, %550 : vector<8x128xf32>
    %cst_164 = arith.constant 5.000000e-01 : f32
    %552 = vector.broadcast %cst_164 : f32 to vector<8x128xf32>
    %553 = arith.mulf %552, %551 : vector<8x128xf32>
    %554 = vector.extract_strided_slice %539 {offsets = [0, 128], sizes = [8, 128], strides = [1, 1]} : vector<8x384xf32> to vector<8x128xf32>
    %555 = vector.extract_strided_slice %543 {offsets = [0, 128], sizes = [8, 128], strides = [1, 1]} : vector<8x384xf32> to vector<8x128xf32>
    %556 = arith.addf %554, %555 : vector<8x128xf32>
    %cst_165 = arith.constant 5.000000e-01 : f32
    %557 = vector.broadcast %cst_165 : f32 to vector<8x128xf32>
    %558 = arith.mulf %557, %556 : vector<8x128xf32>
    %559 = math.tanh %558 : vector<8x128xf32>
    %cst_166 = arith.constant 1.000000e+00 : f32
    %560 = vector.broadcast %cst_166 : f32 to vector<8x128xf32>
    %561 = arith.addf %559, %560 : vector<8x128xf32>
    %cst_167 = arith.constant 5.000000e-01 : f32
    %562 = vector.broadcast %cst_167 : f32 to vector<8x128xf32>
    %563 = arith.mulf %562, %561 : vector<8x128xf32>
    %564 = vector.extract_strided_slice %539 {offsets = [0, 256], sizes = [8, 128], strides = [1, 1]} : vector<8x384xf32> to vector<8x128xf32>
    %565 = vector.extract_strided_slice %543 {offsets = [0, 256], sizes = [8, 128], strides = [1, 1]} : vector<8x384xf32> to vector<8x128xf32>
    %566 = arith.addf %565, %12 : vector<8x128xf32>
    %567 = arith.mulf %553, %566 : vector<8x128xf32>
    %568 = arith.addf %564, %567 : vector<8x128xf32>
    %569 = math.tanh %568 : vector<8x128xf32>
    %cst_168 = arith.constant 1.000000e+00 : f32
    %570 = vector.broadcast %cst_168 : f32 to vector<8x128xf32>
    %571 = arith.subf %570, %563 : vector<8x128xf32>
    %572 = arith.mulf %571, %569 : vector<8x128xf32>
    %573 = arith.mulf %563, %511 : vector<8x128xf32>
    %574 = arith.addf %572, %573 : vector<8x128xf32>
    %575 = arith.truncf %514 : vector<8x128xf32> to vector<8x128xbf16>
    %cst_169 = arith.constant dense<0.000000e+00> : vector<8x384xf32>
    %576 = tpu.matmul %575, %9, %cst_169 {dimension_numbers = #tpu.dot_dimension_numbers<[1], [0], [0], [1], [0, 0, 1, 1], [], []>} : vector<8x128xbf16>, vector<128x384xbf16>, vector<8x384xf32> -> vector<8x384xf32>
    %577 = vector.extract_strided_slice %541 {offsets = [0, 0], sizes = [8, 128], strides = [1, 1]} : vector<8x384xf32> to vector<8x128xf32>
    %578 = vector.extract_strided_slice %576 {offsets = [0, 0], sizes = [8, 128], strides = [1, 1]} : vector<8x384xf32> to vector<8x128xf32>
    %579 = arith.addf %577, %578 : vector<8x128xf32>
    %cst_170 = arith.constant 5.000000e-01 : f32
    %580 = vector.broadcast %cst_170 : f32 to vector<8x128xf32>
    %581 = arith.mulf %580, %579 : vector<8x128xf32>
    %582 = math.tanh %581 : vector<8x128xf32>
    %cst_171 = arith.constant 1.000000e+00 : f32
    %583 = vector.broadcast %cst_171 : f32 to vector<8x128xf32>
    %584 = arith.addf %582, %583 : vector<8x128xf32>
    %cst_172 = arith.constant 5.000000e-01 : f32
    %585 = vector.broadcast %cst_172 : f32 to vector<8x128xf32>
    %586 = arith.mulf %585, %584 : vector<8x128xf32>
    %587 = vector.extract_strided_slice %541 {offsets = [0, 128], sizes = [8, 128], strides = [1, 1]} : vector<8x384xf32> to vector<8x128xf32>
    %588 = vector.extract_strided_slice %576 {offsets = [0, 128], sizes = [8, 128], strides = [1, 1]} : vector<8x384xf32> to vector<8x128xf32>
    %589 = arith.addf %587, %588 : vector<8x128xf32>
    %cst_173 = arith.constant 5.000000e-01 : f32
    %590 = vector.broadcast %cst_173 : f32 to vector<8x128xf32>
    %591 = arith.mulf %590, %589 : vector<8x128xf32>
    %592 = math.tanh %591 : vector<8x128xf32>
    %cst_174 = arith.constant 1.000000e+00 : f32
    %593 = vector.broadcast %cst_174 : f32 to vector<8x128xf32>
    %594 = arith.addf %592, %593 : vector<8x128xf32>
    %cst_175 = arith.constant 5.000000e-01 : f32
    %595 = vector.broadcast %cst_175 : f32 to vector<8x128xf32>
    %596 = arith.mulf %595, %594 : vector<8x128xf32>
    %597 = vector.extract_strided_slice %541 {offsets = [0, 256], sizes = [8, 128], strides = [1, 1]} : vector<8x384xf32> to vector<8x128xf32>
    %598 = vector.extract_strided_slice %576 {offsets = [0, 256], sizes = [8, 128], strides = [1, 1]} : vector<8x384xf32> to vector<8x128xf32>
    %599 = arith.addf %598, %15 : vector<8x128xf32>
    %600 = arith.mulf %586, %599 : vector<8x128xf32>
    %601 = arith.addf %597, %600 : vector<8x128xf32>
    %602 = math.tanh %601 : vector<8x128xf32>
    %cst_176 = arith.constant 1.000000e+00 : f32
    %603 = vector.broadcast %cst_176 : f32 to vector<8x128xf32>
    %604 = arith.subf %603, %596 : vector<8x128xf32>
    %605 = arith.mulf %604, %602 : vector<8x128xf32>
    %606 = arith.mulf %596, %514 : vector<8x128xf32>
    %607 = arith.addf %605, %606 : vector<8x128xf32>
    %608 = vector.broadcast %c5_i32 : i32 to vector<8x1xi32>
    %609 = arith.cmpi slt, %608, %16 : vector<8x1xi32>
    %610 = vector.broadcast %533 : i32 to vector<8x1xi32>
    %611 = arith.cmpi slt, %610, %16 : vector<8x1xi32>
    %612 = vector.shape_cast %609 : vector<8x1xi1> to vector<8x1xi1>
    %613 = vector.broadcast %612 : vector<8x1xi1> to vector<8x128xi1>
    %614 = arith.select %613, %574, %511 : vector<8x128xi1>, vector<8x128xf32>
    %615 = vector.shape_cast %611 : vector<8x1xi1> to vector<8x1xi1>
    %616 = vector.broadcast %615 : vector<8x1xi1> to vector<8x128xi1>
    %617 = arith.select %616, %607, %514 : vector<8x128xi1>, vector<8x128xf32>
    %cst_177 = arith.constant 5.000000e-01 : f32
    %618 = vector.broadcast %cst_177 : f32 to vector<8x128xf32>
    %619 = arith.mulf %618, %614 : vector<8x128xf32>
    %cst_178 = arith.constant 0.000000e+00 : f32
    %620 = vector.shape_cast %609 : vector<8x1xi1> to vector<8x1xi1>
    %621 = vector.broadcast %620 : vector<8x1xi1> to vector<8x128xi1>
    %622 = vector.broadcast %cst_178 : f32 to vector<8x128xf32>
    %623 = arith.select %621, %619, %622 : vector<8x128xi1>, vector<8x128xf32>
    %624 = arith.index_cast %c5_i32 : i32 to index
    %c0_179 = arith.constant 0 : index
    %c0_180 = arith.constant 0 : index
    %625 = vector.load %arg9[%624, %c0_179, %c0_180] : memref<8x8x128xf32, #tpu.memory_space<vmem>>, vector<1x8x128xf32>
    %626 = vector.shape_cast %625 : vector<1x8x128xf32> to vector<8x128xf32>
    %627 = vector.shape_cast %623 : vector<8x128xf32> to vector<1x8x128xf32>
    tpu.vector_store %arg9[%624, %c0_179, %c0_180], %627 {strides = array<i32>} : memref<8x8x128xf32, #tpu.memory_space<vmem>>, vector<1x8x128xf32>,
    %cst_181 = arith.constant 5.000000e-01 : f32
    %628 = vector.broadcast %cst_181 : f32 to vector<8x128xf32>
    %629 = arith.mulf %628, %617 : vector<8x128xf32>
    %cst_182 = arith.constant 0.000000e+00 : f32
    %630 = vector.shape_cast %611 : vector<8x1xi1> to vector<8x1xi1>
    %631 = vector.broadcast %630 : vector<8x1xi1> to vector<8x128xi1>
    %632 = vector.broadcast %cst_182 : f32 to vector<8x128xf32>
    %633 = arith.select %631, %629, %632 : vector<8x128xi1>, vector<8x128xf32>
    %634 = arith.index_cast %537 : i32 to index
    %c0_183 = arith.constant 0 : index
    %635 = vector.load %arg11[%634, %c0_183] : memref<64x128xf32, #tpu.memory_space<vmem>>, vector<8x128xf32>
    tpu.vector_store %arg11[%634, %c0_183], %633 {strides = array<i32>} : memref<64x128xf32, #tpu.memory_space<vmem>>, vector<8x128xf32>,
    %c6_i32 = arith.constant 6 : i32
    %c7_i32_184 = arith.constant 7 : i32
    %636 = arith.subi %c7_i32_184, %c6_i32 : i32
    %c8_i32_185 = arith.constant 8 : i32
    %637 = arith.muli %c6_i32, %c8_i32_185 : i32
    %638 = tpu.assume_multiple %637, 8 : i32
    %c8_i32_186 = arith.constant 8 : i32
    %639 = arith.muli %636, %c8_i32_186 : i32
    %640 = tpu.assume_multiple %639, 8 : i32
    %641 = arith.index_cast %638 : i32 to index
    %c0_187 = arith.constant 0 : index
    %642 = vector.load %arg10[%641, %c0_187] : memref<64x768xf32, #tpu.memory_space<vmem>>, vector<8x384xf32>
    %643 = arith.index_cast %640 : i32 to index
    %c384_188 = arith.constant 384 : index
    %644 = vector.load %arg10[%643, %c384_188] : memref<64x768xf32, #tpu.memory_space<vmem>>, vector<8x384xf32>
    %645 = arith.truncf %614 : vector<8x128xf32> to vector<8x128xbf16>
    %cst_189 = arith.constant dense<0.000000e+00> : vector<8x384xf32>
    %646 = tpu.matmul %645, %8, %cst_189 {dimension_numbers = #tpu.dot_dimension_numbers<[1], [0], [0], [1], [0, 0, 1, 1], [], []>} : vector<8x128xbf16>, vector<128x384xbf16>, vector<8x384xf32> -> vector<8x384xf32>
    %647 = vector.extract_strided_slice %642 {offsets = [0, 0], sizes = [8, 128], strides = [1, 1]} : vector<8x384xf32> to vector<8x128xf32>
    %648 = vector.extract_strided_slice %646 {offsets = [0, 0], sizes = [8, 128], strides = [1, 1]} : vector<8x384xf32> to vector<8x128xf32>
    %649 = arith.addf %647, %648 : vector<8x128xf32>
    %cst_190 = arith.constant 5.000000e-01 : f32
    %650 = vector.broadcast %cst_190 : f32 to vector<8x128xf32>
    %651 = arith.mulf %650, %649 : vector<8x128xf32>
    %652 = math.tanh %651 : vector<8x128xf32>
    %cst_191 = arith.constant 1.000000e+00 : f32
    %653 = vector.broadcast %cst_191 : f32 to vector<8x128xf32>
    %654 = arith.addf %652, %653 : vector<8x128xf32>
    %cst_192 = arith.constant 5.000000e-01 : f32
    %655 = vector.broadcast %cst_192 : f32 to vector<8x128xf32>
    %656 = arith.mulf %655, %654 : vector<8x128xf32>
    %657 = vector.extract_strided_slice %642 {offsets = [0, 128], sizes = [8, 128], strides = [1, 1]} : vector<8x384xf32> to vector<8x128xf32>
    %658 = vector.extract_strided_slice %646 {offsets = [0, 128], sizes = [8, 128], strides = [1, 1]} : vector<8x384xf32> to vector<8x128xf32>
    %659 = arith.addf %657, %658 : vector<8x128xf32>
    %cst_193 = arith.constant 5.000000e-01 : f32
    %660 = vector.broadcast %cst_193 : f32 to vector<8x128xf32>
    %661 = arith.mulf %660, %659 : vector<8x128xf32>
    %662 = math.tanh %661 : vector<8x128xf32>
    %cst_194 = arith.constant 1.000000e+00 : f32
    %663 = vector.broadcast %cst_194 : f32 to vector<8x128xf32>
    %664 = arith.addf %662, %663 : vector<8x128xf32>
    %cst_195 = arith.constant 5.000000e-01 : f32
    %665 = vector.broadcast %cst_195 : f32 to vector<8x128xf32>
    %666 = arith.mulf %665, %664 : vector<8x128xf32>
    %667 = vector.extract_strided_slice %642 {offsets = [0, 256], sizes = [8, 128], strides = [1, 1]} : vector<8x384xf32> to vector<8x128xf32>
    %668 = vector.extract_strided_slice %646 {offsets = [0, 256], sizes = [8, 128], strides = [1, 1]} : vector<8x384xf32> to vector<8x128xf32>
    %669 = arith.addf %668, %12 : vector<8x128xf32>
    %670 = arith.mulf %656, %669 : vector<8x128xf32>
    %671 = arith.addf %667, %670 : vector<8x128xf32>
    %672 = math.tanh %671 : vector<8x128xf32>
    %cst_196 = arith.constant 1.000000e+00 : f32
    %673 = vector.broadcast %cst_196 : f32 to vector<8x128xf32>
    %674 = arith.subf %673, %666 : vector<8x128xf32>
    %675 = arith.mulf %674, %672 : vector<8x128xf32>
    %676 = arith.mulf %666, %614 : vector<8x128xf32>
    %677 = arith.addf %675, %676 : vector<8x128xf32>
    %678 = arith.truncf %617 : vector<8x128xf32> to vector<8x128xbf16>
    %cst_197 = arith.constant dense<0.000000e+00> : vector<8x384xf32>
    %679 = tpu.matmul %678, %9, %cst_197 {dimension_numbers = #tpu.dot_dimension_numbers<[1], [0], [0], [1], [0, 0, 1, 1], [], []>} : vector<8x128xbf16>, vector<128x384xbf16>, vector<8x384xf32> -> vector<8x384xf32>
    %680 = vector.extract_strided_slice %644 {offsets = [0, 0], sizes = [8, 128], strides = [1, 1]} : vector<8x384xf32> to vector<8x128xf32>
    %681 = vector.extract_strided_slice %679 {offsets = [0, 0], sizes = [8, 128], strides = [1, 1]} : vector<8x384xf32> to vector<8x128xf32>
    %682 = arith.addf %680, %681 : vector<8x128xf32>
    %cst_198 = arith.constant 5.000000e-01 : f32
    %683 = vector.broadcast %cst_198 : f32 to vector<8x128xf32>
    %684 = arith.mulf %683, %682 : vector<8x128xf32>
    %685 = math.tanh %684 : vector<8x128xf32>
    %cst_199 = arith.constant 1.000000e+00 : f32
    %686 = vector.broadcast %cst_199 : f32 to vector<8x128xf32>
    %687 = arith.addf %685, %686 : vector<8x128xf32>
    %cst_200 = arith.constant 5.000000e-01 : f32
    %688 = vector.broadcast %cst_200 : f32 to vector<8x128xf32>
    %689 = arith.mulf %688, %687 : vector<8x128xf32>
    %690 = vector.extract_strided_slice %644 {offsets = [0, 128], sizes = [8, 128], strides = [1, 1]} : vector<8x384xf32> to vector<8x128xf32>
    %691 = vector.extract_strided_slice %679 {offsets = [0, 128], sizes = [8, 128], strides = [1, 1]} : vector<8x384xf32> to vector<8x128xf32>
    %692 = arith.addf %690, %691 : vector<8x128xf32>
    %cst_201 = arith.constant 5.000000e-01 : f32
    %693 = vector.broadcast %cst_201 : f32 to vector<8x128xf32>
    %694 = arith.mulf %693, %692 : vector<8x128xf32>
    %695 = math.tanh %694 : vector<8x128xf32>
    %cst_202 = arith.constant 1.000000e+00 : f32
    %696 = vector.broadcast %cst_202 : f32 to vector<8x128xf32>
    %697 = arith.addf %695, %696 : vector<8x128xf32>
    %cst_203 = arith.constant 5.000000e-01 : f32
    %698 = vector.broadcast %cst_203 : f32 to vector<8x128xf32>
    %699 = arith.mulf %698, %697 : vector<8x128xf32>
    %700 = vector.extract_strided_slice %644 {offsets = [0, 256], sizes = [8, 128], strides = [1, 1]} : vector<8x384xf32> to vector<8x128xf32>
    %701 = vector.extract_strided_slice %679 {offsets = [0, 256], sizes = [8, 128], strides = [1, 1]} : vector<8x384xf32> to vector<8x128xf32>
    %702 = arith.addf %701, %15 : vector<8x128xf32>
    %703 = arith.mulf %689, %702 : vector<8x128xf32>
    %704 = arith.addf %700, %703 : vector<8x128xf32>
    %705 = math.tanh %704 : vector<8x128xf32>
    %cst_204 = arith.constant 1.000000e+00 : f32
    %706 = vector.broadcast %cst_204 : f32 to vector<8x128xf32>
    %707 = arith.subf %706, %699 : vector<8x128xf32>
    %708 = arith.mulf %707, %705 : vector<8x128xf32>
    %709 = arith.mulf %699, %617 : vector<8x128xf32>
    %710 = arith.addf %708, %709 : vector<8x128xf32>
    %711 = vector.broadcast %c6_i32 : i32 to vector<8x1xi32>
    %712 = arith.cmpi slt, %711, %16 : vector<8x1xi32>
    %713 = vector.broadcast %636 : i32 to vector<8x1xi32>
    %714 = arith.cmpi slt, %713, %16 : vector<8x1xi32>
    %715 = vector.shape_cast %712 : vector<8x1xi1> to vector<8x1xi1>
    %716 = vector.broadcast %715 : vector<8x1xi1> to vector<8x128xi1>
    %717 = arith.select %716, %677, %614 : vector<8x128xi1>, vector<8x128xf32>
    %718 = vector.shape_cast %714 : vector<8x1xi1> to vector<8x1xi1>
    %719 = vector.broadcast %718 : vector<8x1xi1> to vector<8x128xi1>
    %720 = arith.select %719, %710, %617 : vector<8x128xi1>, vector<8x128xf32>
    %cst_205 = arith.constant 5.000000e-01 : f32
    %721 = vector.broadcast %cst_205 : f32 to vector<8x128xf32>
    %722 = arith.mulf %721, %717 : vector<8x128xf32>
    %cst_206 = arith.constant 0.000000e+00 : f32
    %723 = vector.shape_cast %712 : vector<8x1xi1> to vector<8x1xi1>
    %724 = vector.broadcast %723 : vector<8x1xi1> to vector<8x128xi1>
    %725 = vector.broadcast %cst_206 : f32 to vector<8x128xf32>
    %726 = arith.select %724, %722, %725 : vector<8x128xi1>, vector<8x128xf32>
    %727 = arith.index_cast %c6_i32 : i32 to index
    %c0_207 = arith.constant 0 : index
    %c0_208 = arith.constant 0 : index
    %728 = vector.load %arg9[%727, %c0_207, %c0_208] : memref<8x8x128xf32, #tpu.memory_space<vmem>>, vector<1x8x128xf32>
    %729 = vector.shape_cast %728 : vector<1x8x128xf32> to vector<8x128xf32>
    %730 = vector.shape_cast %726 : vector<8x128xf32> to vector<1x8x128xf32>
    tpu.vector_store %arg9[%727, %c0_207, %c0_208], %730 {strides = array<i32>} : memref<8x8x128xf32, #tpu.memory_space<vmem>>, vector<1x8x128xf32>,
    %cst_209 = arith.constant 5.000000e-01 : f32
    %731 = vector.broadcast %cst_209 : f32 to vector<8x128xf32>
    %732 = arith.mulf %731, %720 : vector<8x128xf32>
    %cst_210 = arith.constant 0.000000e+00 : f32
    %733 = vector.shape_cast %714 : vector<8x1xi1> to vector<8x1xi1>
    %734 = vector.broadcast %733 : vector<8x1xi1> to vector<8x128xi1>
    %735 = vector.broadcast %cst_210 : f32 to vector<8x128xf32>
    %736 = arith.select %734, %732, %735 : vector<8x128xi1>, vector<8x128xf32>
    %737 = arith.index_cast %640 : i32 to index
    %c0_211 = arith.constant 0 : index
    %738 = vector.load %arg11[%737, %c0_211] : memref<64x128xf32, #tpu.memory_space<vmem>>, vector<8x128xf32>
    tpu.vector_store %arg11[%737, %c0_211], %736 {strides = array<i32>} : memref<64x128xf32, #tpu.memory_space<vmem>>, vector<8x128xf32>,
    %c7_i32_212 = arith.constant 7 : i32
    %c7_i32_213 = arith.constant 7 : i32
    %739 = arith.subi %c7_i32_213, %c7_i32_212 : i32
    %c8_i32_214 = arith.constant 8 : i32
    %740 = arith.muli %c7_i32_212, %c8_i32_214 : i32
    %741 = tpu.assume_multiple %740, 8 : i32
    %c8_i32_215 = arith.constant 8 : i32
    %742 = arith.muli %739, %c8_i32_215 : i32
    %743 = tpu.assume_multiple %742, 8 : i32
    %744 = arith.index_cast %741 : i32 to index
    %c0_216 = arith.constant 0 : index
    %745 = vector.load %arg10[%744, %c0_216] : memref<64x768xf32, #tpu.memory_space<vmem>>, vector<8x384xf32>
    %746 = arith.index_cast %743 : i32 to index
    %c384_217 = arith.constant 384 : index
    %747 = vector.load %arg10[%746, %c384_217] : memref<64x768xf32, #tpu.memory_space<vmem>>, vector<8x384xf32>
    %748 = arith.truncf %717 : vector<8x128xf32> to vector<8x128xbf16>
    %cst_218 = arith.constant dense<0.000000e+00> : vector<8x384xf32>
    %749 = tpu.matmul %748, %8, %cst_218 {dimension_numbers = #tpu.dot_dimension_numbers<[1], [0], [0], [1], [0, 0, 1, 1], [], []>} : vector<8x128xbf16>, vector<128x384xbf16>, vector<8x384xf32> -> vector<8x384xf32>
    %750 = vector.extract_strided_slice %745 {offsets = [0, 0], sizes = [8, 128], strides = [1, 1]} : vector<8x384xf32> to vector<8x128xf32>
    %751 = vector.extract_strided_slice %749 {offsets = [0, 0], sizes = [8, 128], strides = [1, 1]} : vector<8x384xf32> to vector<8x128xf32>
    %752 = arith.addf %750, %751 : vector<8x128xf32>
    %cst_219 = arith.constant 5.000000e-01 : f32
    %753 = vector.broadcast %cst_219 : f32 to vector<8x128xf32>
    %754 = arith.mulf %753, %752 : vector<8x128xf32>
    %755 = math.tanh %754 : vector<8x128xf32>
    %cst_220 = arith.constant 1.000000e+00 : f32
    %756 = vector.broadcast %cst_220 : f32 to vector<8x128xf32>
    %757 = arith.addf %755, %756 : vector<8x128xf32>
    %cst_221 = arith.constant 5.000000e-01 : f32
    %758 = vector.broadcast %cst_221 : f32 to vector<8x128xf32>
    %759 = arith.mulf %758, %757 : vector<8x128xf32>
    %760 = vector.extract_strided_slice %745 {offsets = [0, 128], sizes = [8, 128], strides = [1, 1]} : vector<8x384xf32> to vector<8x128xf32>
    %761 = vector.extract_strided_slice %749 {offsets = [0, 128], sizes = [8, 128], strides = [1, 1]} : vector<8x384xf32> to vector<8x128xf32>
    %762 = arith.addf %760, %761 : vector<8x128xf32>
    %cst_222 = arith.constant 5.000000e-01 : f32
    %763 = vector.broadcast %cst_222 : f32 to vector<8x128xf32>
    %764 = arith.mulf %763, %762 : vector<8x128xf32>
    %765 = math.tanh %764 : vector<8x128xf32>
    %cst_223 = arith.constant 1.000000e+00 : f32
    %766 = vector.broadcast %cst_223 : f32 to vector<8x128xf32>
    %767 = arith.addf %765, %766 : vector<8x128xf32>
    %cst_224 = arith.constant 5.000000e-01 : f32
    %768 = vector.broadcast %cst_224 : f32 to vector<8x128xf32>
    %769 = arith.mulf %768, %767 : vector<8x128xf32>
    %770 = vector.extract_strided_slice %745 {offsets = [0, 256], sizes = [8, 128], strides = [1, 1]} : vector<8x384xf32> to vector<8x128xf32>
    %771 = vector.extract_strided_slice %749 {offsets = [0, 256], sizes = [8, 128], strides = [1, 1]} : vector<8x384xf32> to vector<8x128xf32>
    %772 = arith.addf %771, %12 : vector<8x128xf32>
    %773 = arith.mulf %759, %772 : vector<8x128xf32>
    %774 = arith.addf %770, %773 : vector<8x128xf32>
    %775 = math.tanh %774 : vector<8x128xf32>
    %cst_225 = arith.constant 1.000000e+00 : f32
    %776 = vector.broadcast %cst_225 : f32 to vector<8x128xf32>
    %777 = arith.subf %776, %769 : vector<8x128xf32>
    %778 = arith.mulf %777, %775 : vector<8x128xf32>
    %779 = arith.mulf %769, %717 : vector<8x128xf32>
    %780 = arith.addf %778, %779 : vector<8x128xf32>
    %781 = arith.truncf %720 : vector<8x128xf32> to vector<8x128xbf16>
    %cst_226 = arith.constant dense<0.000000e+00> : vector<8x384xf32>
    %782 = tpu.matmul %781, %9, %cst_226 {dimension_numbers = #tpu.dot_dimension_numbers<[1], [0], [0], [1], [0, 0, 1, 1], [], []>} : vector<8x128xbf16>, vector<128x384xbf16>, vector<8x384xf32> -> vector<8x384xf32>
    %783 = vector.extract_strided_slice %747 {offsets = [0, 0], sizes = [8, 128], strides = [1, 1]} : vector<8x384xf32> to vector<8x128xf32>
    %784 = vector.extract_strided_slice %782 {offsets = [0, 0], sizes = [8, 128], strides = [1, 1]} : vector<8x384xf32> to vector<8x128xf32>
    %785 = arith.addf %783, %784 : vector<8x128xf32>
    %cst_227 = arith.constant 5.000000e-01 : f32
    %786 = vector.broadcast %cst_227 : f32 to vector<8x128xf32>
    %787 = arith.mulf %786, %785 : vector<8x128xf32>
    %788 = math.tanh %787 : vector<8x128xf32>
    %cst_228 = arith.constant 1.000000e+00 : f32
    %789 = vector.broadcast %cst_228 : f32 to vector<8x128xf32>
    %790 = arith.addf %788, %789 : vector<8x128xf32>
    %cst_229 = arith.constant 5.000000e-01 : f32
    %791 = vector.broadcast %cst_229 : f32 to vector<8x128xf32>
    %792 = arith.mulf %791, %790 : vector<8x128xf32>
    %793 = vector.extract_strided_slice %747 {offsets = [0, 128], sizes = [8, 128], strides = [1, 1]} : vector<8x384xf32> to vector<8x128xf32>
    %794 = vector.extract_strided_slice %782 {offsets = [0, 128], sizes = [8, 128], strides = [1, 1]} : vector<8x384xf32> to vector<8x128xf32>
    %795 = arith.addf %793, %794 : vector<8x128xf32>
    %cst_230 = arith.constant 5.000000e-01 : f32
    %796 = vector.broadcast %cst_230 : f32 to vector<8x128xf32>
    %797 = arith.mulf %796, %795 : vector<8x128xf32>
    %798 = math.tanh %797 : vector<8x128xf32>
    %cst_231 = arith.constant 1.000000e+00 : f32
    %799 = vector.broadcast %cst_231 : f32 to vector<8x128xf32>
    %800 = arith.addf %798, %799 : vector<8x128xf32>
    %cst_232 = arith.constant 5.000000e-01 : f32
    %801 = vector.broadcast %cst_232 : f32 to vector<8x128xf32>
    %802 = arith.mulf %801, %800 : vector<8x128xf32>
    %803 = vector.extract_strided_slice %747 {offsets = [0, 256], sizes = [8, 128], strides = [1, 1]} : vector<8x384xf32> to vector<8x128xf32>
    %804 = vector.extract_strided_slice %782 {offsets = [0, 256], sizes = [8, 128], strides = [1, 1]} : vector<8x384xf32> to vector<8x128xf32>
    %805 = arith.addf %804, %15 : vector<8x128xf32>
    %806 = arith.mulf %792, %805 : vector<8x128xf32>
    %807 = arith.addf %803, %806 : vector<8x128xf32>
    %808 = math.tanh %807 : vector<8x128xf32>
    %cst_233 = arith.constant 1.000000e+00 : f32
    %809 = vector.broadcast %cst_233 : f32 to vector<8x128xf32>
    %810 = arith.subf %809, %802 : vector<8x128xf32>
    %811 = arith.mulf %810, %808 : vector<8x128xf32>
    %812 = arith.mulf %802, %720 : vector<8x128xf32>
    %813 = arith.addf %811, %812 : vector<8x128xf32>
    %814 = vector.broadcast %c7_i32_212 : i32 to vector<8x1xi32>
    %815 = arith.cmpi slt, %814, %16 : vector<8x1xi32>
    %816 = vector.broadcast %739 : i32 to vector<8x1xi32>
    %817 = arith.cmpi slt, %816, %16 : vector<8x1xi32>
    %818 = vector.shape_cast %815 : vector<8x1xi1> to vector<8x1xi1>
    %819 = vector.broadcast %818 : vector<8x1xi1> to vector<8x128xi1>
    %820 = arith.select %819, %780, %717 : vector<8x128xi1>, vector<8x128xf32>
    %821 = vector.shape_cast %817 : vector<8x1xi1> to vector<8x1xi1>
    %822 = vector.broadcast %821 : vector<8x1xi1> to vector<8x128xi1>
    %823 = arith.select %822, %813, %720 : vector<8x128xi1>, vector<8x128xf32>
    %cst_234 = arith.constant 5.000000e-01 : f32
    %824 = vector.broadcast %cst_234 : f32 to vector<8x128xf32>
    %825 = arith.mulf %824, %820 : vector<8x128xf32>
    %cst_235 = arith.constant 0.000000e+00 : f32
    %826 = vector.shape_cast %815 : vector<8x1xi1> to vector<8x1xi1>
    %827 = vector.broadcast %826 : vector<8x1xi1> to vector<8x128xi1>
    %828 = vector.broadcast %cst_235 : f32 to vector<8x128xf32>
    %829 = arith.select %827, %825, %828 : vector<8x128xi1>, vector<8x128xf32>
    %830 = arith.index_cast %c7_i32_212 : i32 to index
    %c0_236 = arith.constant 0 : index
    %c0_237 = arith.constant 0 : index
    %831 = vector.load %arg9[%830, %c0_236, %c0_237] : memref<8x8x128xf32, #tpu.memory_space<vmem>>, vector<1x8x128xf32>
    %832 = vector.shape_cast %831 : vector<1x8x128xf32> to vector<8x128xf32>
    %833 = vector.shape_cast %829 : vector<8x128xf32> to vector<1x8x128xf32>
    tpu.vector_store %arg9[%830, %c0_236, %c0_237], %833 {strides = array<i32>} : memref<8x8x128xf32, #tpu.memory_space<vmem>>, vector<1x8x128xf32>,
    %cst_238 = arith.constant 5.000000e-01 : f32
    %834 = vector.broadcast %cst_238 : f32 to vector<8x128xf32>
    %835 = arith.mulf %834, %823 : vector<8x128xf32>
    %cst_239 = arith.constant 0.000000e+00 : f32
    %836 = vector.shape_cast %817 : vector<8x1xi1> to vector<8x1xi1>
    %837 = vector.broadcast %836 : vector<8x1xi1> to vector<8x128xi1>
    %838 = vector.broadcast %cst_239 : f32 to vector<8x128xf32>
    %839 = arith.select %837, %835, %838 : vector<8x128xi1>, vector<8x128xf32>
    %840 = arith.index_cast %743 : i32 to index
    %c0_240 = arith.constant 0 : index
    %841 = vector.load %arg11[%840, %c0_240] : memref<64x128xf32, #tpu.memory_space<vmem>>, vector<8x128xf32>
    tpu.vector_store %arg11[%840, %c0_240], %839 {strides = array<i32>} : memref<64x128xf32, #tpu.memory_space<vmem>>, vector<8x128xf32>,
    %c8_i32_241 = arith.constant 8 : i32
    %c0_242 = arith.constant 0 : index
    %c0_243 = arith.constant 0 : index
    %c0_244 = arith.constant 0 : index
    %842 = vector.load %arg9[%c0_242, %c0_243, %c0_244] : memref<8x8x128xf32, #tpu.memory_space<vmem>>, vector<8x8x128xf32>
    %c0_245 = arith.constant 0 : index
    %c0_246 = arith.constant 0 : index
    %843 = vector.load %arg11[%c0_245, %c0_246] : memref<64x128xf32, #tpu.memory_space<vmem>>, vector<64x128xf32>
    %844 = vector.shape_cast %843 : vector<64x128xf32> to vector<8x8x128xf32>
    %845 = arith.addf %842, %844 : vector<8x8x128xf32>
    %c0_247 = arith.constant 0 : index
    %c0_248 = arith.constant 0 : index
    %c0_249 = arith.constant 0 : index
    %846 = vector.load %arg9[%c0_247, %c0_248, %c0_249] : memref<8x8x128xf32, #tpu.memory_space<vmem>>, vector<8x8x128xf32>
    tpu.vector_store %arg9[%c0_247, %c0_248, %c0_249], %845 {strides = array<i32>} : memref<8x8x128xf32, #tpu.memory_space<vmem>>, vector<8x8x128xf32>,
    return
  }
  func.func @transform_0(%arg0: i32) -> (i32, i32, i32) {
    %c0_i32 = arith.constant 0 : i32
    %c0_i32_0 = arith.constant 0 : i32
    %c0_i32_1 = arith.constant 0 : i32
    return %c0_i32, %arg0, %c0_i32_0 : i32, i32, i32
  }
  func.func @transform_1(%arg0: i32) -> (i32, i32) {
    %c0_i32 = arith.constant 0 : i32
    %c0_i32_0 = arith.constant 0 : i32
    return %arg0, %c0_i32 : i32, i32
  }
  func.func @transform_2(%arg0: i32) -> (i32, i32) {
    %c0_i32 = arith.constant 0 : i32
    %c0_i32_0 = arith.constant 0 : i32
    %c0_i32_1 = arith.constant 0 : i32
    return %c0_i32, %c0_i32_0 : i32, i32
  }
  func.func @transform_3(%arg0: i32) -> (i32, i32) {
    %c0_i32 = arith.constant 0 : i32
    %c0_i32_0 = arith.constant 0 : i32
    %c0_i32_1 = arith.constant 0 : i32
    return %c0_i32, %c0_i32_0 : i32, i32
  }
  func.func @transform_4(%arg0: i32) -> (i32, i32) {
    %c0_i32 = arith.constant 0 : i32
    %c0_i32_0 = arith.constant 0 : i32
    %c0_i32_1 = arith.constant 0 : i32
    return %c0_i32, %c0_i32_0 : i32, i32
  }
  func.func @transform_5(%arg0: i32) -> (i32, i32) {
    %c0_i32 = arith.constant 0 : i32
    %c0_i32_0 = arith.constant 0 : i32
    %c0_i32_1 = arith.constant 0 : i32
    return %c0_i32, %c0_i32_0 : i32, i32
  }
  func.func @transform_6(%arg0: i32) -> (i32, i32) {
    %c0_i32 = arith.constant 0 : i32
    %c0_i32_0 = arith.constant 0 : i32
    %c0_i32_1 = arith.constant 0 : i32
    return %c0_i32, %c0_i32_0 : i32, i32
  }
  func.func @transform_7(%arg0: i32) -> (i32, i32) {
    %c0_i32 = arith.constant 0 : i32
    %c0_i32_0 = arith.constant 0 : i32
    %c0_i32_1 = arith.constant 0 : i32
    return %c0_i32, %c0_i32_0 : i32, i32
  }
  func.func @transform_8(%arg0: i32) -> (i32, i32, i32) {
    %c0_i32 = arith.constant 0 : i32
    %c0_i32_0 = arith.constant 0 : i32
    %c0_i32_1 = arith.constant 0 : i32
    return %c0_i32, %arg0, %c0_i32_0 : i32, i32, i32
  }
}

</mosaic_0001>

<bundles_post_ra>
// kernel: tpu_custom_call.1
= control target key start
LH: loop header
LB: loop body
LE: loop exit
PB: predicated region body
PF: predicated region fallthrough
CT: control target
= control target key end

     0   :  { %13 = vsyncpa [#allocation5], 0  ;;  %s3638_s0 = inlined_call_operand.hbm [shape: bf16[8,8,32], index: 0, kind: input, shape index: {}]   ;;  %s3639_s1 = inlined_call_operand.vmem [shape: s32[8,1], index: 1, kind: input, shape index: {}]   ;;  %s3640_s2 = inlined_call_operand.hbm [shape: bf16[32,768], index: 2, kind: input, shape index: {}]   ;;  %s3641_s3 = inlined_call_operand.hbm [shape: bf16[128,384], index: 3, kind: input, shape index: {}]   ;;  %s3642_s4 = inlined_call_operand.hbm [shape: bf16[128,384], index: 4, kind: input, shape index: {}]   ;;  %s3643_s5 = inlined_call_operand.vmem [shape: f32[1,768], index: 5, kind: input, shape index: {}]   ;;  %s3644_s6 = inlined_call_operand.vmem [shape: f32[1,128], index: 6, kind: input, shape index: {}]   ;;  %s3645_s7 = inlined_call_operand.vmem [shape: f32[1,128], index: 7, kind: input, shape index: {}]   ;;  %s3646_s8 = inlined_call_operand.hbm [shape: f32[8,8,128], index: 8, kind: output, shape index: {}]  }
   0x1   :  { %14 = vsyncpa [#allocation8], 0 }
   0x2   :  { %15 = vsyncpa [#allocation11], 0  ;;  %s36_s29 = sshll.u32 %s3640_s2, 4  ;;  %s37_s29 = int_to_ptr.hbm [resolvable:$true] %s36_s29 }
   0x3   :  { %16 = vsyncpa [#allocation6], 0  ;;  %s2563_s30 = smov [#allocation7]   ;;  %s21_s12 = sshll.u32 %s3638_s0, 4  ;;  %s22_s12 = int_to_ptr.hbm [resolvable:$true] %s21_s12 }
   0x4   :  { %s38_s9 = sshll.u32 %s2563_s30, 4  ;;  %s2564_s13 = smov 384   ;;  %s39_s9 = int_to_ptr.vmem [resolvable:$true] %s38_s9 }
   0x5   :  { %s2565_s14 = smov 24   ;;  %s2566_s15 = smov [#allocation4]  }
   0x6   :  { %44 = dma.hbm_to_vmem [thread:$0]  %s37_s29, 1536, %s39_s9, [#allocation8], %s2564_s13, %s2564_s13, %s2565_s14  }
   0x7   :  { %s23_s16 = sshll.u32 %s2566_s15, 4  ;;  %s2567_s17 = smov 64   ;;  %s24_s16 = int_to_ptr.vmem [resolvable:$true] %s23_s16 }
   0x8   :  { %s2568_s18 = smov 4   ;;  %s49_s20 = sshll.u32 %s3641_s3, 4  ;;  %s50_s20 = int_to_ptr.hbm [resolvable:$true] %s49_s20 }
   0x9   :  { %29 = dma.hbm_to_vmem [thread:$0]  %s22_s12, 512, %s24_s16, [#allocation5], %s2567_s17, %s2567_s17, %s2568_s18  }
   0xa   :  { %s2569_s21 = smov [#allocation9]   ;;  %s62_s24 = sshll.u32 %s3642_s4, 4  ;;  %s63_s24 = int_to_ptr.hbm [resolvable:$true] %s62_s24 }
   0xb   :  { %s51_s22 = sshll.u32 %s2569_s21, 4  ;;  %s2570_s25 = smov 192   ;;  %s52_s22 = int_to_ptr.vmem [resolvable:$true] %s51_s22 }
   0xc   :  { %s2571_s26 = smov 12   ;;  %s2572_s27 = smov [#allocation10]  }
   0xd   :  { %57 = dma.hbm_to_vmem [thread:$0]  %s50_s20, 3072, %s52_s22, [#allocation8], %s2570_s25, %s2570_s25, %s2571_s26  }
   0xe   :  { %s64_s28 = sshll.u32 %s2572_s27, 4  ;;  %s65_s28 = int_to_ptr.vmem [resolvable:$true] %s64_s28 }
   0xf   :  { %70 = dma.hbm_to_vmem [thread:$0]  %s63_s24, 3072, %s65_s28, [#allocation11], %s2570_s25, %s2570_s25, %s2571_s26  }
  0x10   :  { %2555 = dma.done.wait [#allocation5], 512  }
  0x11   :  { %2556 = vsyncadd [#allocation5], 4294966784 }
  0x12   :  { %2557 = dma.done.wait [#allocation8], 4608  }
  0x13   :  { %2558 = vsyncadd [#allocation8], 4294962688 }
  0x14   :  { %2559 = dma.done.wait [#allocation11], 3072  }
  0x15   :  { %2560 = vsyncadd [#allocation11], 4294964224  ;;  %v1998_v0 = vld [vmem:[#allocation7 + $0x30] sm:$0xf]  ;;  %v2267_v1 = vld [vmem:[#allocation7 + $0x44] sm:$0xf0] }
  0x16   :  { %v2264_v2 = vld [vmem:[#allocation7 + $0x34] sm:$0xf]  ;;  %v1999_v3 = vor.u32 %v2267_v1, %v1998_v0  ;;  %v2000_v4 = vld [vmem:[#allocation7 + $0x48] sm:$0xf0]  ;;  %v2006_v5 = vld [vmem:[#allocation7 + $0x38] sm:$0xf] }
  0x17   :  { %v2268_v6 = vld [vmem:[#allocation7 + $0x4c] sm:$0xf0]  ;;  %v2003_v7 = vor.u32 %v2264_v2, %v2000_v4  ;;  %v2265_v9 = vld [vmem:[#allocation7 + $0x3c] sm:$0xf]  ;;  %v2008_v10 = vld [vmem:[#allocation7 + $0x50] sm:$0xf0] }
  0x18   :  { %v2007_v8 = vor.u32 %v2268_v6, %v2006_v5  ;;  %v1974_v11 = vld [vmem:[#allocation7] sm:$0xf]  ;;  %227 = vmatpush.bf16.msra.mxu0 %v1999_v3  ;;  %v2011_v12 = vor.u32 %v2265_v9, %v2008_v10  ;;  %v2261_v13 = vld [vmem:[#allocation7 + $0x14] sm:$0xf0]  ;;  %v2258_v14 = vld [vmem:[#allocation7 + $0x4] sm:$0xf] }
  0x19   :  { %v1976_v15 = vld [vmem:[#allocation7 + $0x18] sm:$0xf0]  ;;  %256 = vmatpush.bf16.msra.mxu1 %v2003_v7  ;;  %v1975_v16 = vor.u32 %v2261_v13, %v1974_v11  ;;  %v1982_v18 = vld [vmem:[#allocation7 + $0x8] sm:$0xf]  ;;  %v2262_v19 = vld [vmem:[#allocation7 + $0x1c] sm:$0xf0] }
  0x1a   :  { %285 = vmatpush.bf16.msra.mxu2 %v2007_v8  ;;  %v1979_v17 = vor.u32 %v2258_v14, %v1976_v15  ;;  %v2259_v20 = vld [vmem:[#allocation7 + $0xc] sm:$0xf]  ;;  %314 = vmatpush.bf16.msra.mxu3 %v2011_v12  ;;  %v1983_v21 = vor.u32 %v2262_v19, %v1982_v18  ;;  %v1984_v22 = vld [vmem:[#allocation7 + $0x20] sm:$0xf0]  ;;  %v2014_v24 = vld [vmem:[#allocation7 + $0x40] sm:$0xf] }
  0x1b   :  { %v2634_v23 = vld [vmem:[#allocation4] sm:$0xff]  ;;  %v1987_v25 = vor.u32 %v2259_v20, %v1984_v22  ;;  %v2269_v26 = vld [vmem:[#allocation7 + $0x54] sm:$0xf0]  ;;  %v2016_v28 = vld [vmem:[#allocation7 + $0x58] sm:$0xf0]  ;;  %vm208_vm0 = vcmask 261120  }
  0x1c   :  { %v2266_v27 = vld [vmem:[#allocation7 + $0x44] sm:$0xf]  ;;  %228 = vmatpush.bf16.msra.mxu0 %v1975_v16  ;;  %v2015_v29 = vor.u32 %v2269_v26, %v2014_v24  ;;  %v2130_v31 = vld [vmem:[#allocation9 + $0xa8] sm:$0xf]  ;;  %v2292_v32 = vld [vmem:[#allocation9 + $0xb0] sm:$0xf0] }
  0x1d   :  { %v2019_v30 = vor.u32 %v2266_v27, %v2016_v28  ;;  %257 = vmatpush.bf16.msra.mxu1 %v1979_v17  ;;  %v2636_v33 = vor.u32 %v2292_v32, %v2130_v31  ;;  %v2291_v34 = vld [vmem:[#allocation9 + $0xac] sm:$0xf]  ;;  %v2132_v35 = vld [vmem:[#allocation9 + $0xb4] sm:$0xf0]  ;;  %v2118_v37 = vld [vmem:[#allocation9 + $0x90] sm:$0xf] }
  0x1e   :  { %286 = vmatpush.bf16.msra.mxu2 %v1983_v21  ;;  %315 = vmatpush.bf16.msra.mxu3 %v1987_v25  ;;  %v2638_v36 = vor.u32 %v2291_v34, %v2132_v35  ;;  %v2289_v38 = vld [vmem:[#allocation9 + $0x98] sm:$0xf0]  ;;  %v2288_v39 = vld [vmem:[#allocation9 + $0x94] sm:$0xf]  ;;  %v2120_v40 = vld [vmem:[#allocation9 + $0x9c] sm:$0xf0] }
  0x1f   :  { %2020 = vmatmul.msk.bf16.vlgmr.msra.gmra.mxu0 %vm208_vm0, %v2634_v23  ;;  %v2649_v41 = vor.u32 %v2289_v38, %v2118_v37  ;;  %v1990_v42 = vld [vmem:[#allocation7 + $0x10] sm:$0xf]  ;;  %v2263_v43 = vld [vmem:[#allocation7 + $0x24] sm:$0xf0]  ;;  %v2652_v44 = vor.u32 %v2288_v39, %v2120_v40  ;;  %v2106_v45 = vld [vmem:[#allocation9 + $0x78] sm:$0xf] }
  0x20   :  { %343 = vmatpush.bf16.msrb.mxu0 %v2015_v29  ;;  %2024 = vmatmul.msk.bf16.vlgmr.msra.gmra.mxu1 %vm208_vm0, %v2634_v23  ;;  %v2286_v46 = vld [vmem:[#allocation9 + $0x80] sm:$0xf0]  ;;  %v1991_v47 = vor.u32 %v2263_v43, %v1990_v42  ;;  %v2260_v48 = vld [vmem:[#allocation7 + $0x14] sm:$0xf]  ;;  %v2285_v49 = vld [vmem:[#allocation9 + $0x7c] sm:$0xf] }
  0x21   :  { %372 = vmatpush.bf16.msrb.mxu1 %v2019_v30  ;;  %2028 = vmatmul.msk.bf16.vlgmr.msra.gmra.mxu2 %vm208_vm0, %v2634_v23  ;;  %v2108_v50 = vld [vmem:[#allocation9 + $0x84] sm:$0xf0]  ;;  %v1992_v51 = vld [vmem:[#allocation7 + $0x28] sm:$0xf0]  ;;  %v2655_v53 = vor.u32 %v2286_v46, %v2106_v45  ;;  %v2094_v55 = vld [vmem:[#allocation9 + $0x60] sm:$0xf] }
  0x22   :  { %2032 = vmatmul.msk.bf16.vlgmr.msra.gmra.mxu3 %vm208_vm0, %v2634_v23  ;;  %656 = vmatpush.bf16.msrb.mxu2 %v2636_v33  ;;  %v1995_v52 = vor.u32 %v2260_v48, %v1992_v51  ;;  %v2658_v54 = vor.u32 %v2285_v49, %v2108_v50  ;;  %v2283_v56 = vld [vmem:[#allocation9 + $0x68] sm:$0xf0]  ;;  %v2282_v57 = vld [vmem:[#allocation9 + $0x64] sm:$0xf]  ;;  %v2096_v58 = vld [vmem:[#allocation9 + $0x6c] sm:$0xf0] }
  0x23   :  { %669 = vmatpush.bf16.msrb.mxu3 %v2638_v36  ;;  %v2661_v59 = vor.u32 %v2283_v56, %v2094_v55  ;;  %v2664_v60 = vor.u32 %v2282_v57, %v2096_v58  ;;  %v2082_v61 = vld [vmem:[#allocation9 + $0x48] sm:$0xf]  ;;  %v2280_v62 = vld [vmem:[#allocation9 + $0x50] sm:$0xf0]  ;;  %v2279_v0 = vld [vmem:[#allocation9 + $0x4c] sm:$0xf] }
  0x24   :  { %344 = vmatpush.bf16.msrb.mxu0 %v1991_v47  ;;  %v2666_v63 = vld [vmem:[#allocation4 + $0x8] sm:$0xff]  ;;  %v2084_v1 = vld [vmem:[#allocation9 + $0x54] sm:$0xf0]  ;;  %v2669_v2 = vor.u32 %v2280_v62, %v2082_v61  ;;  %v2070_v4 = vld [vmem:[#allocation9 + $0x30] sm:$0xf]  ;;  %v3647_v46 = vmov 0  }
  0x25   :  { %373 = vmatpush.bf16.msrb.mxu1 %v1995_v52  ;;  %3711 = vst [vmem:[#allocation17_spill] sm:$0xff] %v2661_v59  ;;  %v2672_v3 = vor.u32 %v2279_v0, %v2084_v1  ;;  %v2277_v5 = vld [vmem:[#allocation9 + $0x38] sm:$0xf0]  ;;  %v2276_v6 = vld [vmem:[#allocation9 + $0x34] sm:$0xf]  ;;  %2332 = vset.pattern.permute.xlu0 %v3647_v46  ;;  %s1934_s17 = sshll.u32 %s3646_s8, 4  ;;  %s1935_s17 = int_to_ptr.hbm [resolvable:$true] %s1934_s17 }
  0x26   :  { %657 = vmatpush.bf16.msrb.mxu2 %v2649_v41  ;;  %3712 = vst [vmem:[#allocation18_spill] sm:$0xff] %v2664_v60  ;;  %v2072_v7 = vld [vmem:[#allocation9 + $0x3c] sm:$0xf0]  ;;  %v2683_v8 = vor.u32 %v2277_v5, %v2070_v4  ;;  %v2058_v10 = vld [vmem:[#allocation9 + $0x18] sm:$0xf]  ;;  %v2702_v28 = vld [vmem:[#allocation4 + $0x10] sm:$0xff]  ;;  %2333 = vset.pattern.permute.xlu1 %v3647_v46 }
  0x27   :  { %670 = vmatpush.bf16.msrb.mxu3 %v2652_v44  ;;  %3713 = vst [vmem:[#allocation19_spill] sm:$0xff] %v2669_v2  ;;  %v2686_v9 = vor.u32 %v2276_v6, %v2072_v7  ;;  %v2274_v11 = vld [vmem:[#allocation9 + $0x20] sm:$0xf0]  ;;  %v2273_v12 = vld [vmem:[#allocation9 + $0x1c] sm:$0xf]  ;;  %2334 = vset.pattern.permute.xlu2 %v3647_v46  ;;  %s2575_s18 = smov 128  }
  0x28   :  { %3714 = vst [vmem:[#allocation20_spill] sm:$0xff] %v2672_v3  ;;  %v2060_v13 = vld [vmem:[#allocation9 + $0x24] sm:$0xf0]  ;;  %v2689_v14 = vor.u32 %v2274_v11, %v2058_v10  ;;  %v2046_v16 = vld [vmem:[#allocation9] sm:$0xf]  ;;  %s2576_s2 = smov 8  }
  0x29   :  { %3715 = vst [vmem:[#allocation21_spill] sm:$0xff] %v2683_v8  ;;  %v2692_v15 = vor.u32 %v2273_v12, %v2060_v13  ;;  %v2271_v17 = vld [vmem:[#allocation9 + $0x8] sm:$0xf0]  ;;  %v2138_v18 = vld [vmem:[#allocation9 + $0xb0] sm:$0xf] }
  0x2a   :  { %658 = vmatpush.bf16.msrb.mxu2 %v2655_v53  ;;  %3716 = vst [vmem:[#allocation22_spill] sm:$0xff] %v2686_v9  ;;  %v2293_v19 = vld [vmem:[#allocation9 + $0xb8] sm:$0xf0]  ;;  %v2270_v20 = vld [vmem:[#allocation9 + $0x4] sm:$0xf]  ;;  %v2695_v25 = vor.u32 %v2271_v17, %v2046_v16 }
  0x2b   :  { %671 = vmatpush.bf16.msrb.mxu3 %v2658_v54  ;;  %3717 = vst [vmem:[#allocation23_spill] sm:$0xff] %v2689_v14  ;;  %v2048_v21 = vld [vmem:[#allocation9 + $0xc] sm:$0xf0]  ;;  %v2226_v22 = vld [vmem:[#allocation10 + $0xa8] sm:$0xf]  ;;  %v2698_v26 = vor.u32 %v2293_v19, %v2138_v18  ;;  %v2752_v17 = vld [vmem:[#allocation4 + $0x18] sm:$0xff] }
  0x2c   :  { %3718 = vst [vmem:[#allocation24_spill] sm:$0xff] %v2692_v15  ;;  %v2316_v24 = vld [vmem:[#allocation10 + $0xb0] sm:$0xf0]  ;;  %v2700_v27 = vor.u32 %v2270_v20, %v2048_v21  ;;  %v2126_v30 = vld [vmem:[#allocation9 + $0x98] sm:$0xf] }
  0x2d   :  { %3719 = vst [vmem:[#allocation25_spill] sm:$0xff] %v2695_v25  ;;  %v2704_v29 = vor.u32 %v2316_v24, %v2226_v22  ;;  %v2290_v31 = vld [vmem:[#allocation9 + $0xa0] sm:$0xf0]  ;;  %v2214_v32 = vld [vmem:[#allocation10 + $0x90] sm:$0xf] }
  0x2e   :  { %659 = vmatpush.bf16.msrb.mxu2 %v2661_v59  ;;  %3720 = vst [vmem:[#allocation26_spill] sm:$0xff] %v2700_v27  ;;  %v2313_v34 = vld [vmem:[#allocation10 + $0x98] sm:$0xf0]  ;;  %v2709_v35 = vor.u32 %v2290_v31, %v2126_v30  ;;  %v2114_v38 = vld [vmem:[#allocation9 + $0x80] sm:$0xf] }
  0x2f   :  { %672 = vmatpush.bf16.msrb.mxu3 %v2664_v60  ;;  %2021 = vmatmul.msk.bf16.gmra.mxu0 %vm208_vm0, %v2666_v63  ;;  %v2714_v37 = vor.u32 %v2313_v34, %v2214_v32  ;;  %v2287_v39 = vld [vmem:[#allocation9 + $0x88] sm:$0xf0]  ;;  %v2202_v40 = vld [vmem:[#allocation10 + $0x78] sm:$0xf]  ;;  %v2310_v42 = vld [vmem:[#allocation10 + $0x80] sm:$0xf0] }
  0x30   :  { %2025 = vmatmul.msk.bf16.gmra.mxu1 %vm208_vm0, %v2666_v63  ;;  %v2315_v43 = vld [vmem:[#allocation10 + $0xac] sm:$0xf]  ;;  %v2228_v45 = vld [vmem:[#allocation10 + $0xb4] sm:$0xf0]  ;;  %v2724_v47 = vor.u32 %v2287_v39, %v2114_v38  ;;  %v2234_v49 = vld [vmem:[#allocation10 + $0xb0] sm:$0xf]  ;;  %v2730_v51 = vor.u32 %v2310_v42, %v2202_v40 }
  0x31   :  { %2029 = vmatmul.msk.bf16.gmra.mxu2 %vm208_vm0, %v2666_v63  ;;  %v2726_v48 = vor.u32 %v2315_v43, %v2228_v45  ;;  %v2317_v50 = vld [vmem:[#allocation10 + $0xb8] sm:$0xf0]  ;;  %v2102_v52 = vld [vmem:[#allocation9 + $0x68] sm:$0xf]  ;;  %v2284_v55 = vld [vmem:[#allocation9 + $0x70] sm:$0xf0] }
  0x32   :  { %2033 = vmatmul.msk.bf16.gmra.mxu3 %vm208_vm0, %v2666_v63  ;;  %660 = vmatpush.bf16.msrb.mxu2 %v2669_v2  ;;  %v2190_v56 = vld [vmem:[#allocation10 + $0x60] sm:$0xf]  ;;  %v2732_v57 = vor.u32 %v2317_v50, %v2234_v49  ;;  %v2307_v58 = vld [vmem:[#allocation10 + $0x68] sm:$0xf0]  ;;  %v2312_v61 = vld [vmem:[#allocation10 + $0x94] sm:$0xf]  ;;  %v2740_v1 = vor.u32 %v2284_v55, %v2102_v52 }
  0x33   :  { %673 = vmatpush.bf16.msrb.mxu3 %v2672_v3  ;;  %854 = vmatpush.bf16.msra.mxu0 %v2726_v48  ;;  %v2216_v62 = vld [vmem:[#allocation10 + $0x9c] sm:$0xf0]  ;;  %v2222_v4 = vld [vmem:[#allocation10 + $0x98] sm:$0xf]  ;;  %v2314_v5 = vld [vmem:[#allocation10 + $0xa0] sm:$0xf0]  ;;  %v2743_v6 = vor.u32 %v2307_v58, %v2190_v56 }
  0x34   :  { %867 = vmatpush.bf16.msra.mxu1 %v2732_v57  ;;  %v2737_v0 = vor.u32 %v2312_v61, %v2216_v62  ;;  %v2090_v7 = vld [vmem:[#allocation9 + $0x50] sm:$0xf]  ;;  %v2281_v10 = vld [vmem:[#allocation9 + $0x58] sm:$0xf0]  ;;  %v2745_v11 = vor.u32 %v2314_v5, %v2222_v4  ;;  %v2178_v12 = vld [vmem:[#allocation10 + $0x48] sm:$0xf] }
  0x35   :  { %v2304_v13 = vld [vmem:[#allocation10 + $0x50] sm:$0xf0]  ;;  %v2750_v16 = vor.u32 %v2281_v10, %v2090_v7  ;;  %v2078_v19 = vld [vmem:[#allocation9 + $0x38] sm:$0xf]  ;;  %v2278_v20 = vld [vmem:[#allocation9 + $0x40] sm:$0xf0] }
  0x36   :  { %661 = vmatpush.bf16.msrb.mxu2 %v2683_v8  ;;  %v2755_v18 = vor.u32 %v2304_v13, %v2178_v12  ;;  %v2166_v21 = vld [vmem:[#allocation10 + $0x30] sm:$0xf]  ;;  %v2301_v22 = vld [vmem:[#allocation10 + $0x38] sm:$0xf0]  ;;  %v2758_v24 = vor.u32 %v2278_v20, %v2078_v19  ;;  %v2066_v31 = vld [vmem:[#allocation9 + $0x20] sm:$0xf] }
  0x37   :  { %674 = vmatpush.bf16.msrb.mxu3 %v2686_v9  ;;  %855 = vmatpush.bf16.msra.mxu0 %v2737_v0  ;;  %v2763_v30 = vor.u32 %v2301_v22, %v2166_v21  ;;  %v2275_v32 = vld [vmem:[#allocation9 + $0x28] sm:$0xf0]  ;;  %v2154_v34 = vld [vmem:[#allocation10 + $0x18] sm:$0xf]  ;;  %v2298_v38 = vld [vmem:[#allocation10 + $0x20] sm:$0xf0] }
  0x38   :  { %868 = vmatpush.bf16.msra.mxu1 %v2745_v11  ;;  %v2309_v39 = vld [vmem:[#allocation10 + $0x7c] sm:$0xf]  ;;  %v2204_v40 = vld [vmem:[#allocation10 + $0x84] sm:$0xf0]  ;;  %v2210_v43 = vld [vmem:[#allocation10 + $0x80] sm:$0xf]  ;;  %v2774_v50 = vor.u32 %v2275_v32, %v2066_v31  ;;  %v2779_v61 = vor.u32 %v2298_v38, %v2154_v34 }
  0x39   :  { %v2771_v42 = vor.u32 %v2309_v39, %v2204_v40  ;;  %v2311_v45 = vld [vmem:[#allocation10 + $0x88] sm:$0xf0]  ;;  %v2306_v49 = vld [vmem:[#allocation10 + $0x64] sm:$0xf]  ;;  %v2192_v55 = vld [vmem:[#allocation10 + $0x6c] sm:$0xf0] }
  0x3a   :  { %662 = vmatpush.bf16.msrb.mxu2 %v2689_v14  ;;  %v2776_v52 = vor.u32 %v2311_v45, %v2210_v43  ;;  %v2198_v56 = vld [vmem:[#allocation10 + $0x68] sm:$0xf]  ;;  %v2308_v58 = vld [vmem:[#allocation10 + $0x70] sm:$0xf0]  ;;  %v2782_v5 = vor.u32 %v2306_v49, %v2192_v55  ;;  %v2142_v7 = vld [vmem:[#allocation10] sm:$0xf] }
  0x3b   :  { %675 = vmatpush.bf16.msrb.mxu3 %v2692_v15  ;;  %v2054_v62 = vld [vmem:[#allocation9 + $0x8] sm:$0xf]  ;;  %v2272_v4 = vld [vmem:[#allocation9 + $0x10] sm:$0xf0]  ;;  %856 = vmatpush.bf16.msra.mxu0 %v2771_v42  ;;  %v2295_v10 = vld [vmem:[#allocation10 + $0x8] sm:$0xf0]  ;;  %v2785_v12 = vor.u32 %v2308_v58, %v2198_v56 }
  0x3c   :  { %869 = vmatpush.bf16.msra.mxu1 %v2776_v52  ;;  %v2788_v13 = vor.u32 %v2272_v4, %v2054_v62  ;;  %v2791_v19 = vor.u32 %v2295_v10, %v2142_v7  ;;  %v2303_v20 = vld [vmem:[#allocation10 + $0x4c] sm:$0xf]  ;;  %v2180_v21 = vld [vmem:[#allocation10 + $0x54] sm:$0xf0]  ;;  %v2186_v22 = vld [vmem:[#allocation10 + $0x50] sm:$0xf] }
  0x3d   :  { %3721 = vst [vmem:[#allocation27_spill] sm:$0xff] %v2785_v12  ;;  %v2803_v31 = vor.u32 %v2303_v20, %v2180_v21  ;;  %v2305_v32 = vld [vmem:[#allocation10 + $0x58] sm:$0xf0]  ;;  %v2300_v34 = vld [vmem:[#allocation10 + $0x34] sm:$0xf]  ;;  %v2828_v49 = vld [vmem:[%s3639_s1] sm:$0xff] }
  0x3e   :  { %663 = vmatpush.bf16.msrb.mxu2 %v2695_v25  ;;  %v2168_v38 = vld [vmem:[#allocation10 + $0x3c] sm:$0xf0]  ;;  %v2806_v39 = vor.u32 %v2305_v32, %v2186_v22  ;;  %v2174_v40 = vld [vmem:[#allocation10 + $0x38] sm:$0xf]  ;;  %v2302_v43 = vld [vmem:[#allocation10 + $0x40] sm:$0xf0] }
  0x3f   :  { %676 = vmatpush.bf16.msrb.mxu3 %v2700_v27  ;;  %2022 = vmatmul.msk.bf16.gmra.mxu0 %vm208_vm0, %v2702_v28  ;;  %v2813_v45 = vor.u32 %v2302_v43, %v2174_v40  ;;  %v2297_v55 = vld [vmem:[#allocation10 + $0x1c] sm:$0xf]  ;;  %v2156_v56 = vld [vmem:[#allocation10 + $0x24] sm:$0xf0]  ;;  %vm898_vm1 = vcmp.gt.s32.totalorder %v2828_v49, 0  ;;  %vm899_vm2 = vcmp.gt.s32.totalorder %v2828_v49, 7 }
  0x40   :  { %2026 = vmatmul.msk.bf16.gmra.mxu1 %vm208_vm0, %v2702_v28  ;;  %857 = vmatpush.bf16.msra.mxu0 %v2782_v5  ;;  %3722 = vst [vmem:[#allocation28_spill] sm:$0xff] %v2806_v39  ;;  %v2835_v58 = vor.u32 %v2297_v55, %v2156_v56  ;;  %v900_v62 = vsel %vm898_vm1, 1, %v3647_v46  ;;  %v2162_v4 = vld [vmem:[#allocation10 + $0x20] sm:$0xf]  ;;  %v2299_v7 = vld [vmem:[#allocation10 + $0x28] sm:$0xf0] }
  0x41   :  { %2030 = vmatmul.msk.bf16.gmra.mxu2 %vm208_vm0, %v2702_v28  ;;  %870 = vmatpush.bf16.msra.mxu1 %v2785_v12  ;;  %3723 = vst [vmem:[#allocation29_spill] sm:$0xff] %v2813_v45  ;;  %v2839_v10 = vor.u32 %v2299_v7, %v2162_v4  ;;  %v2144_v20 = vld [vmem:[#allocation10 + $0xc] sm:$0xf0]  ;;  %v2150_v21 = vld [vmem:[#allocation10 + $0x8] sm:$0xf]  ;;  %vm1347_vm3 = vcmp.gt.s32.totalorder %v2828_v49, 3 }
  0x42   :  { %682 = vmatpush.bf16.msra.mxu2 %v2698_v26  ;;  %2034 = vmatmul.msk.bf16.gmra.mxu3 %vm208_vm0, %v2702_v28  ;;  %v2296_v32 = vld [vmem:[#allocation10 + $0x10] sm:$0xf0]  ;;  %v2908_v43 = vld [vmem:[%s3643_s5] sm:$0x3f]  ;;  %vm1047_vm6 = vcmp.gt.s32.totalorder %v2828_v49, 1  ;;  %vm1048_vm7 = vcmp.gt.s32.totalorder %v2828_v49, 6 }
  0x43   :  { %841 = vmatpush.bf16.msra.mxu3 %v2704_v29  ;;  %902 = vperm.xlu0 %2332, %v900_v62   ;;  %3724 = vst [vmem:[#allocation30_spill] sm:$0xff] %v2839_v10  ;;  %v2913_v55 = vperm.slane %v2908_v43, 3  ;;  %vm1348_vm8 = vcmp.gt.s32.totalorder %v2828_v49, 4  ;;  %vm1197_vm12 = vcmp.gt.s32.totalorder %v2828_v49, 2  ;;  %vm1198_vm13 = vcmp.gt.s32.totalorder %v2828_v49, 5 }
  0x44   :  { %858 = vmatpush.bf16.msra.mxu0 %v2803_v31 }
  0x45   :  { %871 = vmatpush.bf16.msra.mxu1 %v2806_v39  ;;  %3726 = vst [vmem:[#allocation32_spill] sm:$0xff] %v2913_v55 }
  0x46   :  { %683 = vmatpush.bf16.msra.mxu2 %v2709_v35 }
  0x47   :  { %842 = vmatpush.bf16.msra.mxu3 %v2714_v37 }
  0x49   :  { %872 = vmatpush.bf16.msra.mxu1 %v2813_v45 }
  0x4a   :  { %684 = vmatpush.bf16.msra.mxu2 %v2724_v47 }
  0x4b   :  { %843 = vmatpush.bf16.msra.mxu3 %v2730_v51 }
  0x4d   :  { %873 = vmatpush.bf16.msra.mxu1 %v2839_v10 }
  0x4e   :  { %685 = vmatpush.bf16.msra.mxu2 %v2740_v1 }
  0x4f   :  { %844 = vmatpush.bf16.msra.mxu3 %v2743_v6  ;;  %2023 = vmatmul.msk.bf16.gmra.mxu0 %vm208_vm0, %v2752_v17 }
  0x50   :  { %2027 = vmatmul.msk.bf16.gmra.mxu1 %vm208_vm0, %v2752_v17 }
  0x51   :  { %2031 = vmatmul.msk.bf16.gmra.mxu2 %vm208_vm0, %v2752_v17 }
  0x52   :  { %686 = vmatpush.bf16.msra.mxu2 %v2750_v16  ;;  %2035 = vmatmul.msk.bf16.gmra.mxu3 %vm208_vm0, %v2752_v17 }
  0x53   :  { %845 = vmatpush.bf16.msra.mxu3 %v2755_v18 }
  0x56   :  { %687 = vmatpush.bf16.msra.mxu2 %v2758_v24 }
  0x57   :  { %846 = vmatpush.bf16.msra.mxu3 %v2763_v30 }
  0x5a   :  { %688 = vmatpush.bf16.msra.mxu2 %v2774_v50 }
  0x5b   :  { %847 = vmatpush.bf16.msra.mxu3 %v2779_v61 }
  0x5e   :  { %689 = vmatpush.bf16.msra.mxu2 %v2788_v13 }
  0x5f   :  { %848 = vmatpush.bf16.msra.mxu3 %v2791_v19  ;;  %2036 = vmatmul.msk.bf16.vlgmr.msrb.gmra.mxu0 %vm208_vm0, %v2634_v23 }
  0x60   :  { %2040 = vmatmul.msk.bf16.vlgmr.msrb.gmra.mxu1 %vm208_vm0, %v2634_v23  ;;  %v2810_v23 = vor.u32 %v2300_v34, %v2168_v38  ;;  %v2846_v34 = vor.u32 %v2296_v32, %v2150_v21  ;;  %v906_v38 = vsel %vm899_vm2, 1, %v3647_v46  ;;  %v2935_v32 = vperm.slane %v2908_v43, 1 }
  0x61   :  { %664 = vmatmul.bf16.vlgmr.msrb.gmra.mxu2 %v3647_v46  ;;  %908 = vperm.xlu0 %2332, %v906_v38  }
  0x62   :  { %677 = vmatmul.bf16.vlgmr.msrb.gmra.mxu3 %v3647_v46  ;;  %932 = vmatpush.bf16.msrb.mxu2 %v2636_v33  ;;  %3725 = vst [vmem:[#allocation31_spill] sm:$0xff] %v2846_v34 }
  0x63   :  { %945 = vmatpush.bf16.msrb.mxu3 %v2638_v36  ;;  %859 = vmatpush.bf16.msra.mxu0 %v2810_v23  ;;  %3732 = vst [vmem:[#allocation38_spill] sm:$0xff] %v2935_v32 }
  0x64   :  { %874 = vmatpush.bf16.msra.mxu1 %v2846_v34 }
  0x66   :  { %933 = vmatpush.bf16.msrb.mxu2 %v2649_v41 }
  0x67   :  { %946 = vmatpush.bf16.msrb.mxu3 %v2652_v44  ;;  %860 = vmatpush.bf16.msra.mxu0 %v2835_v58 }
  0x68   :  { %990 = vmatpush.bf16.msrb.mxu1 %v2704_v29 }
  0x6a   :  { %934 = vmatpush.bf16.msrb.mxu2 %v2655_v53 }
  0x6b   :  { %947 = vmatpush.bf16.msrb.mxu3 %v2658_v54 }
  0x6c   :  { %991 = vmatpush.bf16.msrb.mxu1 %v2714_v37 }
  0x6e   :  { %935 = vmatpush.bf16.msrb.mxu2 %v2661_v59 }
  0x6f   :  { %948 = vmatpush.bf16.msrb.mxu3 %v2664_v60  ;;  %2037 = vmatmul.msk.bf16.gmra.mxu0 %vm208_vm0, %v2666_v63 }
  0x70   :  { %2041 = vmatmul.msk.bf16.gmra.mxu1 %vm208_vm0, %v2666_v63  ;;  %v2294_v63 = vld [vmem:[#allocation10 + $0x4] sm:$0xf] }
  0x71   :  { %690 = vmatmul.bf16.vlgmr.msra.gmra.mxu2 %v3647_v46  ;;  %v2843_v22 = vor.u32 %v2294_v63, %v2144_v20  ;;  %992 = vmatpush.bf16.msrb.mxu1 %v2730_v51  ;;  %v2930_v20 = vperm.slane %v2908_v43, 0 }
  0x72   :  { %849 = vmatmul.bf16.vlgmr.msra.gmra.mxu3 %v3647_v46  ;;  %936 = vmatpush.bf16.msrb.mxu2 %v2669_v2 }
  0x73   :  { %949 = vmatpush.bf16.msrb.mxu3 %v2672_v3  ;;  %861 = vmatpush.bf16.msra.mxu0 %v2843_v22  ;;  %3730 = vst [vmem:[#allocation36_spill] sm:$0xff] %v2930_v20 }
  0x75   :  { %993 = vmatpush.bf16.msrb.mxu1 %v2743_v6 }
  0x76   :  { %937 = vmatpush.bf16.msrb.mxu2 %v2683_v8 }
  0x77   :  { %950 = vmatpush.bf16.msrb.mxu3 %v2686_v9  ;;  %958 = vmatpush.bf16.msrb.mxu0 %v2698_v26 }
  0x79   :  { %994 = vmatpush.bf16.msrb.mxu1 %v2755_v18 }
  0x7a   :  { %938 = vmatpush.bf16.msrb.mxu2 %v2689_v14 }
  0x7b   :  { %951 = vmatpush.bf16.msrb.mxu3 %v2692_v15  ;;  %959 = vmatpush.bf16.msrb.mxu0 %v2709_v35 }
  0x7d   :  { %995 = vmatpush.bf16.msrb.mxu1 %v2763_v30 }
  0x7e   :  { %939 = vmatpush.bf16.msrb.mxu2 %v2695_v25 }
  0x7f   :  { %952 = vmatpush.bf16.msrb.mxu3 %v2700_v27  ;;  %2038 = vmatmul.msk.bf16.gmra.mxu0 %vm208_vm0, %v2702_v28 }
  0x80   :  { %2042 = vmatmul.msk.bf16.gmra.mxu1 %vm208_vm0, %v2702_v28  ;;  %960 = vmatpush.bf16.msrb.mxu0 %v2724_v47  ;;  %v1349_v28 = vsel %vm1347_vm3, 1, %v3647_v46 }
  0x81   :  { %1351 = vperm.xlu0 %2332, %v1349_v28   ;;  %996 = vmatpush.bf16.msrb.mxu1 %v2779_v61 }
  0x82   :  { %1003 = vmatpush.bf16.msra.mxu2 %v2726_v48 }
  0x83   :  { %1016 = vmatpush.bf16.msra.mxu3 %v2732_v57 }
  0x84   :  { %961 = vmatpush.bf16.msrb.mxu0 %v2740_v1 }
  0x85   :  { %997 = vmatpush.bf16.msrb.mxu1 %v2791_v19 }
  0x86   :  { %1004 = vmatpush.bf16.msra.mxu2 %v2737_v0 }
  0x87   :  { %1017 = vmatpush.bf16.msra.mxu3 %v2745_v11 }
  0x88   :  { %962 = vmatpush.bf16.msrb.mxu0 %v2750_v16 }
  0x8a   :  { %1005 = vmatpush.bf16.msra.mxu2 %v2771_v42 }
  0x8b   :  { %1018 = vmatpush.bf16.msra.mxu3 %v2776_v52 }
  0x8c   :  { %963 = vmatpush.bf16.msrb.mxu0 %v2758_v24 }
  0x8e   :  { %1006 = vmatpush.bf16.msra.mxu2 %v2782_v5 }
  0x8f   :  { %1019 = vmatpush.bf16.msra.mxu3 %v2785_v12  ;;  %2039 = vmatmul.msk.bf16.gmra.mxu0 %vm208_vm0, %v2752_v17 }
  0x90   :  { %2043 = vmatmul.msk.bf16.gmra.mxu1 %vm208_vm0, %v2752_v17  ;;  %964 = vmatpush.bf16.msrb.mxu0 %v2774_v50 }
  0x92   :  { %1007 = vmatpush.bf16.msra.mxu2 %v2803_v31 }
  0x93   :  { %1020 = vmatpush.bf16.msra.mxu3 %v2806_v39 }
  0x94   :  { %965 = vmatpush.bf16.msrb.mxu0 %v2788_v13 }
  0x96   :  { %1008 = vmatpush.bf16.msra.mxu2 %v2810_v23 }
  0x97   :  { %1021 = vmatpush.bf16.msra.mxu3 %v2813_v45 }
  0x9a   :  { %1009 = vmatpush.bf16.msra.mxu2 %v2835_v58 }
  0x9b   :  { %1022 = vmatpush.bf16.msra.mxu3 %v2839_v10 }
  0x9c   :  { %v2900_v17 = vpop.f32.mrf.mxu0 }
  0x9d   :  { %v2902_v40 = vpop.f32.mrf.mxu1 }
  0x9e   :  { %1010 = vmatpush.bf16.msra.mxu2 %v2843_v22 }
  0x9f   :  { %1023 = vmatpush.bf16.msra.mxu3 %v2846_v34  ;;  %862 = vmatmul.bf16.vlgmr.msra.gmra.mxu0 %v3647_v46 }
  0xa0   :  { %875 = vmatmul.bf16.vlgmr.msra.gmra.mxu1 %v3647_v46  ;;  %1082 = vmatpush.bf16.msra.mxu0 %v2636_v33 }
  0xa1   :  { %1095 = vmatpush.bf16.msra.mxu1 %v2638_v36 }
  0xa4   :  { %v2916_v56 = vpop.f32.mrf.mxu2  ;;  %v2918_v4 = vpop.f32.mrf.mxu0  ;;  %1083 = vmatpush.bf16.msra.mxu0 %v2649_v41 }
  0xa5   :  { %v317_v62 = vpop.f32.mrf.mxu3  ;;  %3727 = vst [vmem:[#allocation33_spill] sm:$0xff] %v2918_v4  ;;  %v2924_v63 = vpop.f32.mrf.mxu1  ;;  %1096 = vmatpush.bf16.msra.mxu1 %v2652_v44 }
  0xa6   :  { %v2922_v7 = vadd.f32 %v317_v62, %v2913_v55  ;;  %3729 = vst [vmem:[#allocation35_spill] sm:$0xff] %v2924_v63 }
  0xa8   :  { %3728 = vst [vmem:[#allocation34_spill] sm:$0xff] %v2922_v7  ;;  %1084 = vmatpush.bf16.msra.mxu0 %v2655_v53 }
  0xa9   :  { %1097 = vmatpush.bf16.msra.mxu1 %v2658_v54 }
  0xac   :  { %v2932_v21 = vpop.f32.mrf.mxu2  ;;  %v235_v28 = vpop.f32.mrf.mxu0  ;;  %1085 = vmatpush.bf16.msra.mxu0 %v2661_v59 }
  0xad   :  { %3731 = vst [vmem:[#allocation37_spill] sm:$0xff] %v2932_v21  ;;  %v2937_v38 = vpop.f32.mrf.mxu3  ;;  %v2941_v62 = vadd.f32 %v235_v28, %v2930_v20  ;;  %v264_v46 = vpop.f32.mrf.mxu1  ;;  %1098 = vmatpush.bf16.msra.mxu1 %v2664_v60  ;;  %v2950_v21 = vperm.slane %v2908_v43, 2 }
  0xae   :  { %3733 = vst [vmem:[#allocation39_spill] sm:$0xff] %v2937_v38  ;;  %v2945_v7 = vadd.f32 %v264_v46, %v2935_v32 }
  0xaf   :  { %3734 = vst [vmem:[#allocation40_spill] sm:$0xff] %v2941_v62 }
  0xb0   :  { %3735 = vst [vmem:[#allocation41_spill] sm:$0xff] %v2945_v7  ;;  %1086 = vmatpush.bf16.msra.mxu0 %v2669_v2 }
  0xb1   :  { %1099 = vmatpush.bf16.msra.mxu1 %v2672_v3  ;;  %3736 = vst [vmem:[#allocation42_spill] sm:$0xff] %v2950_v21 }
  0xb4   :  { %v293_v38 = vpop.f32.mrf.mxu2  ;;  %v2955_v28 = vpop.f32.mrf.mxu0  ;;  %1087 = vmatpush.bf16.msra.mxu0 %v2683_v8 }
  0xb5   :  { %v2953_v63 = vadd.f32 %v293_v38, %v2950_v21  ;;  %v322_v4 = vpop.f32.mrf.mxu3  ;;  %3738 = vst [vmem:[#allocation44_spill] sm:$0xff] %v2955_v28  ;;  %v2961_v46 = vpop.f32.mrf.mxu1  ;;  %1100 = vmatpush.bf16.msra.mxu1 %v2686_v9 }
  0xb6   :  { %v2959_v62 = vadd.f32 %v322_v4, %v2913_v55  ;;  %3740 = vst [vmem:[#allocation46_spill] sm:$0xff] %v2961_v46 }
  0xb7   :  { %3737 = vst [vmem:[#allocation43_spill] sm:$0xff] %v2953_v63 }
  0xb8   :  { %3739 = vst [vmem:[#allocation45_spill] sm:$0xff] %v2959_v62  ;;  %1088 = vmatpush.bf16.msra.mxu0 %v2689_v14 }
  0xb9   :  { %1101 = vmatpush.bf16.msra.mxu1 %v2692_v15 }
  0xbc   :  { %v2966_v7 = vpop.f32.mrf.mxu2  ;;  %v240_v63 = vpop.f32.mrf.mxu0  ;;  %1089 = vmatpush.bf16.msra.mxu0 %v2695_v25 }
  0xbd   :  { %3741 = vst [vmem:[#allocation47_spill] sm:$0xff] %v2966_v7  ;;  %v2968_v38 = vpop.f32.mrf.mxu3  ;;  %v2972_v28 = vadd.f32 %v240_v63, %v2930_v20  ;;  %v269_v4 = vpop.f32.mrf.mxu1  ;;  %1102 = vmatpush.bf16.msra.mxu1 %v2700_v27 }
  0xbe   :  { %3742 = vst [vmem:[#allocation48_spill] sm:$0xff] %v2968_v38  ;;  %v2976_v62 = vadd.f32 %v269_v4, %v2935_v32 }
  0xbf   :  { %3743 = vst [vmem:[#allocation49_spill] sm:$0xff] %v2972_v28 }
  0xc0   :  { %3744 = vst [vmem:[#allocation50_spill] sm:$0xff] %v2976_v62 }
  0xc4   :  { %v298_v46 = vpop.f32.mrf.mxu2  ;;  %v2981_v7 = vpop.f32.mrf.mxu0 }
  0xc5   :  { %v2979_v34 = vadd.f32 %v298_v46, %v2950_v21  ;;  %v327_v15 = vpop.f32.mrf.mxu3  ;;  %3746 = vst [vmem:[#allocation52_spill] sm:$0xff] %v2981_v7  ;;  %v2986_v25 = vpop.f32.mrf.mxu1 }
  0xc6   :  { %v2984_v38 = vadd.f32 %v327_v15, %v2913_v55  ;;  %3748 = vst [vmem:[#allocation54_spill] sm:$0xff] %v2986_v25 }
  0xc7   :  { %3745 = vst [vmem:[#allocation51_spill] sm:$0xff] %v2979_v34 }
  0xc8   :  { %3747 = vst [vmem:[#allocation53_spill] sm:$0xff] %v2984_v38 }
  0xcc   :  { %v2988_v63 = vpop.f32.mrf.mxu2  ;;  %v245_v27 = vpop.f32.mrf.mxu0 }
  0xcd   :  { %3749 = vst [vmem:[#allocation55_spill] sm:$0xff] %v2988_v63  ;;  %v2990_v28 = vpop.f32.mrf.mxu3  ;;  %v2993_v4 = vadd.f32 %v245_v27, %v2930_v20  ;;  %v274_v62 = vpop.f32.mrf.mxu1  ;;  %v3012_v27 = vperm.slane %v2908_v43, 5 }
  0xce   :  { %3750 = vst [vmem:[#allocation56_spill] sm:$0xff] %v2990_v28  ;;  %v2996_v46 = vadd.f32 %v274_v62, %v2935_v32  ;;  %v3009_v28 = vperm.slane %v2908_v43, 4 }
  0xcf   :  { %3751 = vst [vmem:[#allocation57_spill] sm:$0xff] %v2993_v4 }
  0xd0   :  { %3752 = vst [vmem:[#allocation58_spill] sm:$0xff] %v2996_v46 }
  0xd1   :  { %3757 = vst [vmem:[#allocation63_spill] sm:$0xff] %v3009_v28 }
  0xd2   :  { %3758 = vst [vmem:[#allocation64_spill] sm:$0xff] %v3012_v27 }
  0xd4   :  { %v303_v34 = vpop.f32.mrf.mxu2  ;;  %v3001_v38 = vpop.f32.mrf.mxu0 }
  0xd5   :  { %v2999_v7 = vadd.f32 %v303_v34, %v2950_v21  ;;  %v332_v15 = vpop.f32.mrf.mxu3  ;;  %3754 = vst [vmem:[#allocation60_spill] sm:$0xff] %v3001_v38  ;;  %v3006_v63 = vpop.f32.mrf.mxu1 }
  0xd6   :  { %v3004_v25 = vadd.f32 %v332_v15, %v2913_v55  ;;  %3756 = vst [vmem:[#allocation62_spill] sm:$0xff] %v3006_v63  ;;  %v231_v15 = vadd.f32 %v2900_v17, %v2930_v20 }
  0xd7   :  { %3753 = vst [vmem:[#allocation59_spill] sm:$0xff] %v2999_v7 }
  0xd8   :  { %3755 = vst [vmem:[#allocation61_spill] sm:$0xff] %v3004_v25  ;;  %v260_v25 = vadd.f32 %v2902_v40, %v2935_v32 }
  0xdc   :  { %v3014_v62 = vpop.f32.mrf.mxu2  ;;  %v346_v4 = vpop.f32.mrf.mxu0 }
  0xdd   :  { %3759 = vst [vmem:[#allocation65_spill] sm:$0xff] %v3014_v62  ;;  %v334_v46 = vpop.f32.mrf.mxu3  ;;  %v3017_v34 = vadd.f32 %v346_v4, %v3009_v28  ;;  %v375_v7 = vpop.f32.mrf.mxu1 }
  0xde   :  { %v3020_v38 = vadd.f32 %v375_v7, %v3012_v27 }
  0xdf   :  { %3760 = vst [vmem:[#allocation66_spill] sm:$0xff] %v3017_v34 }
  0xe0   :  { %3761 = vst [vmem:[#allocation67_spill] sm:$0xff] %v3020_v38 }
  0xe4   :  { %v665_v63 = vpop.f32.mrf.mxu2  ;;  %v3026_v10 = vpop.f32.mrf.mxu0 }
  0xe5   :  { %v695_v43 = vadd.f32 %v665_v63, %v231_v15  ;;  %v678_v14 = vpop.f32.mrf.mxu3  ;;  %3762 = vst [vmem:[#allocation68_spill] sm:$0xff] %v3026_v10  ;;  %v3028_v62 = vpop.f32.mrf.mxu1  ;;  %v3039_v15 = vld [vmem:[%s3644_s6] ss:$0 sm:$0xff] }
  0xe6   :  { %3763 = vst [vmem:[#allocation69_spill] sm:$0xff] %v3028_v62  ;;  %v700_v4 = vadd.f32 %v678_v14, %v260_v25 }
  0xe7   :  { %v696_v9 = vmul.f32 0.5, %v695_v43  ;;  %3766 = vst [vmem:[#allocation72_spill] sm:$0xff] %v3039_v15 }
  0xe8   :  { %v701_v34 = vmul.f32 0.5, %v700_v4 }
  0xe9   :  { %2337 = vtanh.f32 %v696_v9 }
  0xea   :  { %2339 = vtanh.f32 %v701_v34  ;;  %v289_v34 = vadd.f32 %v2916_v56, %v2950_v21 }
  0xec   :  { %v667_v8 = vpop.f32.mrf.mxu2  ;;  %v351_v7 = vpop.f32.mrf.mxu0 }
  0xed   :  { %v680_v38 = vpop.f32.mrf.mxu3  ;;  %v3031_v45 = vadd.f32 %v351_v7, %v3009_v28  ;;  %v380_v17 = vpop.f32.mrf.mxu1 }
  0xee   :  { %v3034_v40 = vadd.f32 %v380_v17, %v3012_v27 }
  0xef   :  { %3764 = vst [vmem:[#allocation70_spill] sm:$0xff] %v3031_v45  ;;  %v2338_v20 = vpop.eup %2337 }
  0xf0   :  { %3765 = vst [vmem:[#allocation71_spill] sm:$0xff] %v3034_v40  ;;  %v698_v63 = vadd.f32 1.0, %v2338_v20  ;;  %v2340_v14 = vpop.eup %2339 }
  0xf1   :  { %v703_v20 = vadd.f32 1.0, %v2340_v14 }
  0xf2   :  { %v699_v8 = vmul.f32 0.5, %v698_v63 }
  0xf3   :  { %v704_v62 = vmul.f32 0.5, %v703_v20 }
  0xf4   :  { %v691_v9 = vpop.f32.mrf.mxu2  ;;  %v3042_v38 = vpop.f32.mrf.mxu0 }
  0xf5   :  { %v705_v25 = vadd.f32 %v3039_v15, %v691_v9  ;;  %3767 = vst [vmem:[#allocation73_spill] sm:$0xff] %v3042_v38  ;;  %v850_v43 = vpop.f32.mrf.mxu3  ;;  %v3044_v4 = vpop.f32.mrf.mxu1  ;;  %v711_v56 = vmul.f32 0.0, %v704_v62 }
  0xf6   :  { %3768 = vst [vmem:[#allocation74_spill] sm:$0xff] %v3044_v4  ;;  %v3054_v15 = vpop.permute.xlu0 %902  ;;  %v709_v4 = vsub.f32 1.0, %v704_v62 }
  0xf7   :  { %v706_v7 = vmul.f32 %v705_v25, %v699_v8  ;;  %3771 = vst [vmem:[#allocation77_spill] sm:$0xff] %v3054_v15  ;;  %vm904_vm4 = vcmp.eq.s32.totalorder %v3054_v15, 1 }
  0xf8   :  { %vm2236_vm5 = vmpackc.low %vm904_vm4, %vm904_vm4 }
  0xf9   :  { %v707_v17 = vadd.f32 %v706_v7, %v289_v34 }
  0xfb   :  { %2341 = vtanh.f32 %v707_v17 }
  0xfc   :  { %v693_v10 = vpop.f32.mrf.mxu2  ;;  %v356_v40 = vpop.f32.mrf.mxu0 }
  0xfd   :  { %v852_v45 = vpop.f32.mrf.mxu3  ;;  %v3049_v63 = vadd.f32 %v356_v40, %v3009_v28  ;;  %v385_v9 = vpop.f32.mrf.mxu1 }
  0xfe   :  { %v3052_v38 = vadd.f32 %v385_v9, %v3012_v27  ;;  %v335_v45 = vadd.f32 %v334_v46, %v2913_v55  ;;  %v3787_v55 = vld [vmem:[#allocation38_spill] sm:$0xff] }
  0xff   :  { %3769 = vst [vmem:[#allocation75_spill] sm:$0xff] %v3049_v63 }
 0x100   :  { %3770 = vst [vmem:[#allocation76_spill] sm:$0xff] %v3052_v38 }
 0x101   :  { %v2342_v32 = vpop.eup %2341 }
 0x102   :  { %v710_v8 = vmul.f32 %v2342_v32, %v709_v4  ;;  %v880_v4 = vadd.f32 %v850_v43, %v335_v45  ;;  %v3774_v43 = vmov 0  }
 0x103   :  { %v1055_v45 = vsel %vm1048_vm7, 1, %v3774_v43 }
 0x104   :  { %v712_v14 = vadd.f32 %v711_v56, %v710_v8  ;;  %v3057_v25 = vpop.f32.mrf.mxu0  ;;  %v881_v7 = vmul.f32 0.5, %v880_v4  ;;  %v1049_v56 = vsel %vm1047_vm6, 1, %v3774_v43 }
 0x105   :  { %3772 = vst [vmem:[#allocation78_spill] sm:$0xff] %v3057_v25  ;;  %v3067_v34 = vpop.f32.mrf.mxu1  ;;  %1051 = vperm.xlu1 %2333, %v1049_v56   ;;  %v1355_v56 = vsel %vm1348_vm8, 1, %v3774_v43  ;;  %v3788_v25 = vld [vmem:[#allocation35_spill] sm:$0xff] }
 0x106   :  { %v3065_v10 = vsel %vm904_vm4, %v712_v14, 0.0  ;;  %v2237_v40 = vpack.c.bf16 %v712_v14, %v712_v14  ;;  %3773 = vst [vmem:[#allocation79_spill] sm:$0xff] %v3067_v34  ;;  %2343 = vtanh.f32 %v881_v7  ;;  %v3786_v34 = vld [vmem:[#allocation33_spill] sm:$0xff] }
 0x107   :  { %v912_v32 = vmul.f32 0.5, %v3065_v10 }
 0x108   :  { %2238 = vmatmul.msk.bf16.vlgmr.msrb.gmra.mxu2 %vm2236_vm5, %v2237_v40  ;;  %2241 = vmatmul.msk.bf16.vlgmr.msrb.gmra.mxu3 %vm2236_vm5, %v2237_v40 }
 0x109   :  { %v913_v62 = vsel %vm904_vm4, %v912_v32, 0.0  ;;  %2244 = vmatmul.msk.bf16.vlgmr.msrb.gmra.mxu0 %vm2236_vm5, %v2237_v40  ;;  %1108 = vmatpush.bf16.msrb.mxu2 %v2698_v26 }
 0x10a   :  { %914 = vst [vmem:[#allocation12] sm:$0xff] %v913_v62  ;;  %1140 = vmatpush.bf16.msrb.mxu3 %v2704_v29  ;;  %1153 = vmatpush.bf16.msrb.mxu0 %v2726_v48  ;;  %v3100_v62 = vld [vmem:[%s3645_s7] ss:$0 sm:$0xff] }
 0x10c   :  { %v361_v46 = vpop.f32.mrf.mxu0  ;;  %v2344_v40 = vpop.eup %2343 }
 0x10d   :  { %1109 = vmatpush.bf16.msrb.mxu2 %v2709_v35  ;;  %v3077_v20 = vadd.f32 %v361_v46, %v3009_v28  ;;  %v390_v17 = vpop.f32.mrf.mxu1  ;;  %1057 = vperm.xlu1 %2333, %v1055_v45   ;;  %v883_v32 = vadd.f32 1.0, %v2344_v40 }
 0x10e   :  { %1141 = vmatpush.bf16.msrb.mxu3 %v2714_v37  ;;  %1154 = vmatpush.bf16.msrb.mxu0 %v2737_v0  ;;  %v3082_v9 = vadd.f32 %v390_v17, %v3012_v27 }
 0x10f   :  { %v884_v45 = vmul.f32 0.5, %v883_v32 }
 0x111   :  { %1110 = vmatpush.bf16.msrb.mxu2 %v2724_v47 }
 0x112   :  { %1142 = vmatpush.bf16.msrb.mxu3 %v2730_v51  ;;  %1155 = vmatpush.bf16.msrb.mxu0 %v2771_v42 }
 0x114   :  { %v363_v8 = vpop.f32.mrf.mxu0 }
 0x115   :  { %1111 = vmatpush.bf16.msrb.mxu2 %v2740_v1  ;;  %v392_v14 = vpop.f32.mrf.mxu1  ;;  %v364_v4 = vadd.f32 %v363_v8, %v3009_v28  ;;  %1357 = vperm.xlu1 %2333, %v1355_v56   ;;  %v262_v28 = vadd.f32 %v3788_v25, %v3787_v55 }
 0x116   :  { %1143 = vmatpush.bf16.msrb.mxu3 %v2743_v6  ;;  %1156 = vmatpush.bf16.msrb.mxu0 %v2782_v5  ;;  %v393_v8 = vadd.f32 %v392_v14, %v3012_v27 }
 0x119   :  { %1112 = vmatpush.bf16.msrb.mxu2 %v2750_v16 }
 0x11a   :  { %1144 = vmatpush.bf16.msrb.mxu3 %v2755_v18  ;;  %1157 = vmatpush.bf16.msrb.mxu0 %v2803_v31 }
 0x11c   :  { %v863_v46 = vpop.f32.mrf.mxu0 }
 0x11d   :  { %1113 = vmatpush.bf16.msrb.mxu2 %v2758_v24  ;;  %v885_v7 = vadd.f32 %v863_v46, %v364_v4  ;;  %v876_v17 = vpop.f32.mrf.mxu1 }
 0x11e   :  { %1145 = vmatpush.bf16.msrb.mxu3 %v2763_v30  ;;  %1158 = vmatpush.bf16.msrb.mxu0 %v2810_v23  ;;  %v890_v40 = vadd.f32 %v3100_v62, %v876_v17 }
 0x11f   :  { %v886_v15 = vmul.f32 0.5, %v885_v7 }
 0x120   :  { %v891_v38 = vmul.f32 %v890_v40, %v884_v45  ;;  %v3116_v40 = vpop.permute.xlu0 %908 }
 0x121   :  { %1114 = vmatpush.bf16.msrb.mxu2 %v2774_v50  ;;  %2345 = vtanh.f32 %v886_v15  ;;  %3775 = vst [vmem:[#allocation80_spill] sm:$0xff] %v3116_v40  ;;  %vm910_vm9 = vcmp.eq.s32.totalorder %v3116_v40, 1 }
 0x122   :  { %1146 = vmatpush.bf16.msrb.mxu3 %v2779_v61  ;;  %1159 = vmatpush.bf16.msrb.mxu0 %v2835_v58  ;;  %v892_v4 = vadd.f32 %v891_v38, %v393_v8  ;;  %vm2245_vm10 = vmpackc.low %vm910_vm9, %vm910_vm9  ;;  %v3776_v8 = vld [vmem:[#allocation29_spill] sm:$0xff] }
 0x124   :  { %v865_v46 = vpop.f32.mrf.mxu0  ;;  %2347 = vtanh.f32 %v892_v4  ;;  %v3777_v4 = vld [vmem:[#allocation21_spill] sm:$0xff] }
 0x125   :  { %1115 = vmatpush.bf16.msrb.mxu2 %v2788_v13  ;;  %v878_v63 = vpop.f32.mrf.mxu1  ;;  %v3778_v46 = vld [vmem:[#allocation22_spill] sm:$0xff] }
 0x126   :  { %1147 = vmatpush.bf16.msrb.mxu3 %v2791_v19  ;;  %1160 = vmatpush.bf16.msrb.mxu0 %v2843_v22 }
 0x127   :  { %v2346_v32 = vpop.eup %2345 }
 0x128   :  { %v888_v7 = vadd.f32 1.0, %v2346_v32  ;;  %v3779_v32 = vld [vmem:[#allocation30_spill] sm:$0xff] }
 0x12a   :  { %v889_v17 = vmul.f32 0.5, %v888_v7  ;;  %v2348_v14 = vpop.eup %2347  ;;  %v3780_v7 = vld [vmem:[#allocation23_spill] sm:$0xff] }
 0x12c   :  { %v894_v56 = vsub.f32 1.0, %v889_v17  ;;  %v896_v15 = vmul.f32 0.0, %v889_v17  ;;  %v3781_v17 = vld [vmem:[#allocation24_spill] sm:$0xff] }
 0x12e   :  { %v895_v45 = vmul.f32 %v2348_v14, %v894_v56  ;;  %v3782_v56 = vld [vmem:[#allocation31_spill] sm:$0xff]  ;;  %v3783_v14 = vld [vmem:[#allocation25_spill] sm:$0xff] }
 0x130   :  { %v3119_v38 = vadd.f32 %v896_v15, %v895_v45  ;;  %v3784_v15 = vld [vmem:[#allocation26_spill] sm:$0xff] }
 0x132   :  { %v2246_v63 = vpack.c.bf16 %v3119_v38, %v3119_v38 }
 0x134   :  { %2247 = vmatmul.msk.bf16.vlgmr.msrb.gmra.mxu1 %vm2245_vm10, %v2246_v63  ;;  %2250 = vmatmul.msk.bf16.vlgmr.msra.gmra.mxu2 %vm2245_vm10, %v2246_v63 }
 0x135   :  { %2253 = vmatmul.msk.bf16.vlgmr.msra.gmra.mxu3 %vm2245_vm10, %v2246_v63  ;;  %1166 = vmatpush.bf16.msrb.mxu1 %v2732_v57  ;;  %v3785_v63 = vld [vmem:[#allocation36_spill] sm:$0xff] }
 0x136   :  { %1232 = vmatpush.bf16.msra.mxu2 %v2636_v33  ;;  %1245 = vmatpush.bf16.msra.mxu3 %v2638_v36  ;;  %v233_v27 = vadd.f32 %v3786_v34, %v3785_v63  ;;  %v3790_v63 = vld [vmem:[#allocation37_spill] sm:$0xff] }
 0x137   :  { %v291_v25 = vadd.f32 %v3790_v63, %v2950_v21 }
 0x139   :  { %1167 = vmatpush.bf16.msrb.mxu1 %v2745_v11 }
 0x13a   :  { %1233 = vmatpush.bf16.msra.mxu2 %v2649_v41  ;;  %1246 = vmatpush.bf16.msra.mxu3 %v2652_v44 }
 0x13d   :  { %1168 = vmatpush.bf16.msrb.mxu1 %v2776_v52 }
 0x13e   :  { %1234 = vmatpush.bf16.msra.mxu2 %v2655_v53  ;;  %1247 = vmatpush.bf16.msra.mxu3 %v2658_v54 }
 0x141   :  { %1169 = vmatpush.bf16.msrb.mxu1 %v2785_v12 }
 0x142   :  { %1235 = vmatpush.bf16.msra.mxu2 %v2661_v59  ;;  %1248 = vmatpush.bf16.msra.mxu3 %v2664_v60  ;;  %v3789_v60 = vld [vmem:[#allocation72_spill] sm:$0xff] }
 0x145   :  { %1170 = vmatpush.bf16.msrb.mxu1 %v2806_v39 }
 0x146   :  { %1236 = vmatpush.bf16.msra.mxu2 %v2669_v2  ;;  %1249 = vmatpush.bf16.msra.mxu3 %v2672_v3 }
 0x149   :  { %1171 = vmatpush.bf16.msrb.mxu1 %v3776_v8 }
 0x14a   :  { %1237 = vmatpush.bf16.msra.mxu2 %v3777_v4  ;;  %1250 = vmatpush.bf16.msra.mxu3 %v3778_v46 }
 0x14d   :  { %1172 = vmatpush.bf16.msrb.mxu1 %v3779_v32 }
 0x14e   :  { %1238 = vmatpush.bf16.msra.mxu2 %v3780_v7  ;;  %1251 = vmatpush.bf16.msra.mxu3 %v3781_v17 }
 0x151   :  { %1173 = vmatpush.bf16.msrb.mxu1 %v3782_v56 }
 0x152   :  { %1239 = vmatpush.bf16.msra.mxu2 %v3783_v14  ;;  %1252 = vmatpush.bf16.msra.mxu3 %v3784_v15 }
 0x186   :  { %v967_v45 = vpop.f32.mrf.mxu0 }
 0x187   :  { %v981_v59 = vadd.f32 %v3789_v60, %v967_v45 }
 0x18b   :  { %v941_v46 = vpop.f32.mrf.mxu2  ;;  %v954_v4 = vpop.f32.mrf.mxu3 }
 0x18c   :  { %v971_v32 = vadd.f32 %v941_v46, %v233_v27  ;;  %v976_v8 = vadd.f32 %v954_v4, %v262_v28 }
 0x18e   :  { %v972_v7 = vmul.f32 0.5, %v971_v32  ;;  %v969_v3 = vpop.f32.mrf.mxu0  ;;  %v977_v17 = vmul.f32 0.5, %v976_v8  ;;  %v3157_v8 = vpop.permute.xlu1 %1051 }
 0x18f   :  { %3791 = vst [vmem:[#allocation33_spill] sm:$0xff] %v3157_v8  ;;  %vm1053_vm11 = vcmp.eq.s32.totalorder %v3157_v8, 1 }
 0x190   :  { %2349 = vtanh.f32 %v972_v7 }
 0x191   :  { %2351 = vtanh.f32 %v977_v17 }
 0x193   :  { %v943_v56 = vpop.f32.mrf.mxu2  ;;  %v956_v14 = vpop.f32.mrf.mxu3 }
 0x194   :  { %v1199_v14 = vsel %vm1197_vm12, 1, %v3774_v43 }
 0x195   :  { %1201 = vperm.xlu2 %2334, %v1199_v14  }
 0x196   :  { %v2350_v2 = vpop.eup %2349 }
 0x197   :  { %v974_v15 = vadd.f32 1.0, %v2350_v2  ;;  %v2352_v39 = vpop.eup %2351 }
 0x198   :  { %v979_v12 = vadd.f32 1.0, %v2352_v39 }
 0x199   :  { %v975_v34 = vmul.f32 0.5, %v974_v15 }
 0x19a   :  { %v980_v28 = vmul.f32 0.5, %v979_v12 }
 0x19b   :  { %v982_v55 = vmul.f32 %v981_v59, %v975_v34 }
 0x19c   :  { %v985_v3 = vsub.f32 1.0, %v980_v28  ;;  %v987_v32 = vmul.f32 %v980_v28, %v3065_v10 }
 0x19d   :  { %v983_v27 = vadd.f32 %v982_v55, %v291_v25 }
 0x19f   :  { %2353 = vtanh.f32 %v983_v27  ;;  %v1205_v27 = vsel %vm1198_vm13, 1, %v3774_v43 }
 0x1a0   :  { %1207 = vperm.xlu2 %2334, %v1205_v27   ;;  %v3800_v27 = vld [vmem:[#allocation19_spill] sm:$0xff] }
 0x1a5   :  { %v2354_v4 = vpop.eup %2353 }
 0x1a6   :  { %v986_v46 = vmul.f32 %v2354_v4, %v985_v3 }
 0x1a8   :  { %v988_v2 = vadd.f32 %v987_v32, %v986_v46 }
 0x1aa   :  { %v3164_v7 = vsel %vm1053_vm11, %v988_v2, %v3065_v10  ;;  %v3792_v10 = vld [vmem:[#allocation61_spill] sm:$0xff] }
 0x1ab   :  { %v1061_v59 = vmul.f32 0.5, %v3164_v7  ;;  %v1081_v12 = vpack.c.bf16 %v3164_v7, %v3164_v7 }
 0x1ad   :  { %v1062_v39 = vsel %vm1053_vm11, %v1061_v59, 0.0  ;;  %1090 = vmatmul.bf16.vlgmr.msra.gmra.mxu0 %v1081_v12  ;;  %1103 = vmatmul.bf16.vlgmr.msra.gmra.mxu1 %v1081_v12 }
 0x1ae   :  { %1064 = vst [vmem:[#allocation12 + $0x8] sm:$0xff] %v1062_v39  ;;  %1116 = vmatmul.bf16.vlgmr.msrb.gmra.mxu2 %v1081_v12  ;;  %1258 = vmatpush.bf16.msra.mxu0 %v2698_v26 }
 0x1af   :  { %1290 = vmatpush.bf16.msra.mxu1 %v2704_v29  ;;  %1303 = vmatpush.bf16.msrb.mxu2 %v2726_v48 }
 0x1b1   :  { %v999_v55 = vpop.f32.mrf.mxu1 }
 0x1b2   :  { %1259 = vmatpush.bf16.msra.mxu0 %v2709_v35  ;;  %v1029_v17 = vadd.f32 %v999_v55, %v3792_v10 }
 0x1b3   :  { %1291 = vmatpush.bf16.msra.mxu1 %v2714_v37  ;;  %1304 = vmatpush.bf16.msrb.mxu2 %v2737_v0 }
 0x1b4   :  { %v1030_v56 = vmul.f32 0.5, %v1029_v17 }
 0x1b6   :  { %1260 = vmatpush.bf16.msra.mxu0 %v2724_v47  ;;  %2355 = vtanh.f32 %v1030_v56  ;;  %v3209_v56 = vpop.permute.xlu1 %1057 }
 0x1b7   :  { %1292 = vmatpush.bf16.msra.mxu1 %v2730_v51  ;;  %v1012_v15 = vpop.f32.mrf.mxu2  ;;  %1305 = vmatpush.bf16.msrb.mxu2 %v2771_v42  ;;  %3794 = vst [vmem:[#allocation72_spill] sm:$0xff] %v3209_v56  ;;  %vm1059_vm14 = vcmp.eq.s32.totalorder %v3209_v56, 1 }
 0x1b8   :  { %v1034_v45 = vadd.f32 %v1012_v15, %v3077_v20  ;;  %v1025_v63 = vpop.f32.mrf.mxu3 }
 0x1b9   :  { %v1001_v34 = vpop.f32.mrf.mxu1  ;;  %v1039_v49 = vadd.f32 %v3100_v62, %v1025_v63  ;;  %v3797_v63 = vld [vmem:[#allocation17_spill] sm:$0xff] }
 0x1ba   :  { %1261 = vmatpush.bf16.msra.mxu0 %v2740_v1  ;;  %v1035_v25 = vmul.f32 0.5, %v1034_v45  ;;  %v3798_v34 = vld [vmem:[#allocation18_spill] sm:$0xff] }
 0x1bb   :  { %1293 = vmatpush.bf16.msra.mxu1 %v2743_v6  ;;  %1306 = vmatpush.bf16.msrb.mxu2 %v2782_v5 }
 0x1bc   :  { %v2356_v28 = vpop.eup %2355  ;;  %2357 = vtanh.f32 %v1035_v25  ;;  %v3799_v25 = vld [vmem:[#allocation28_spill] sm:$0xff] }
 0x1bd   :  { %v1032_v3 = vadd.f32 1.0, %v2356_v28  ;;  %v3801_v28 = vld [vmem:[#allocation20_spill] sm:$0xff] }
 0x1be   :  { %1262 = vmatpush.bf16.msra.mxu0 %v2750_v16 }
 0x1bf   :  { %1294 = vmatpush.bf16.msra.mxu1 %v2755_v18  ;;  %v1033_v20 = vmul.f32 0.5, %v1032_v3  ;;  %v1014_v4 = vpop.f32.mrf.mxu2  ;;  %1307 = vmatpush.bf16.msrb.mxu2 %v2803_v31  ;;  %v3802_v3 = vld [vmem:[#allocation29_spill] sm:$0xff] }
 0x1c0   :  { %v1027_v46 = vpop.f32.mrf.mxu3  ;;  %v3805_v4 = vld [vmem:[#allocation30_spill] sm:$0xff] }
 0x1c1   :  { %v1040_v32 = vmul.f32 %v1039_v49, %v1033_v20  ;;  %v3803_v20 = vld [vmem:[#allocation21_spill] sm:$0xff]  ;;  %v3804_v49 = vld [vmem:[#allocation22_spill] sm:$0xff]  ;;  %v3806_v46 = vld [vmem:[#allocation23_spill] sm:$0xff] }
 0x1c2   :  { %1263 = vmatpush.bf16.msra.mxu0 %v2758_v24  ;;  %v2358_v43 = vpop.eup %2357 }
 0x1c3   :  { %1295 = vmatpush.bf16.msra.mxu1 %v2763_v30  ;;  %v1037_v2 = vadd.f32 1.0, %v2358_v43  ;;  %v1041_v59 = vadd.f32 %v1040_v32, %v3082_v9  ;;  %1308 = vmatpush.bf16.msrb.mxu2 %v2810_v23  ;;  %v3205_v9 = vsel %vm910_vm9, %v3119_v38, 0.0  ;;  %v3796_v38 = vld [vmem:[#allocation27_spill] sm:$0xff]  ;;  %v3807_v32 = vld [vmem:[#allocation24_spill] sm:$0xff] }
 0x1c4   :  { %3793 = vst [vmem:[#allocation35_spill] sm:$0xff] %v3205_v9  ;;  %v3808_v43 = vld [vmem:[#allocation31_spill] sm:$0xff] }
 0x1c5   :  { %2359 = vtanh.f32 %v1041_v59  ;;  %v1038_v12 = vmul.f32 0.5, %v1037_v2  ;;  %v3809_v2 = vld [vmem:[#allocation25_spill] sm:$0xff]  ;;  %v3810_v59 = vld [vmem:[#allocation26_spill] sm:$0xff] }
 0x1c6   :  { %1264 = vmatpush.bf16.msra.mxu0 %v2774_v50 }
 0x1c7   :  { %1296 = vmatpush.bf16.msra.mxu1 %v2779_v61  ;;  %1309 = vmatpush.bf16.msrb.mxu2 %v2835_v58  ;;  %v1043_v39 = vsub.f32 1.0, %v1038_v12  ;;  %v1045_v10 = vmul.f32 %v1038_v12, %v3205_v9 }
 0x1ca   :  { %1265 = vmatpush.bf16.msra.mxu0 %v2788_v13 }
 0x1cb   :  { %1297 = vmatpush.bf16.msra.mxu1 %v2791_v19  ;;  %v2360_v55 = vpop.eup %2359  ;;  %1310 = vmatpush.bf16.msrb.mxu2 %v2843_v22 }
 0x1cc   :  { %v1044_v17 = vmul.f32 %v2360_v55, %v1043_v39  ;;  %v3811_v55 = vld [vmem:[#allocation40_spill] sm:$0xff] }
 0x1ce   :  { %v1046_v14 = vadd.f32 %v1045_v10, %v1044_v17  ;;  %v3812_v17 = vld [vmem:[#allocation41_spill] sm:$0xff] }
 0x1d0   :  { %v3215_v15 = vsel %vm1059_vm14, %v1046_v14, %v3205_v9 }
 0x1d1   :  { %3795 = vst [vmem:[#allocation37_spill] sm:$0xff] %v3215_v15  ;;  %v1139_v45 = vpack.c.bf16 %v3215_v15, %v3215_v15 }
 0x1d3   :  { %1148 = vmatmul.bf16.vlgmr.msrb.gmra.mxu3 %v1139_v45  ;;  %1161 = vmatmul.bf16.vlgmr.msrb.gmra.mxu0 %v1139_v45 }
 0x1d4   :  { %1174 = vmatmul.bf16.vlgmr.msrb.gmra.mxu1 %v1139_v45  ;;  %1316 = vmatpush.bf16.msrb.mxu3 %v2732_v57 }
 0x1d5   :  { %1376 = vmatpush.bf16.msrb.mxu0 %v2636_v33  ;;  %1389 = vmatpush.bf16.msrb.mxu1 %v2638_v36 }
 0x1d8   :  { %1317 = vmatpush.bf16.msrb.mxu3 %v2745_v11 }
 0x1d9   :  { %1377 = vmatpush.bf16.msrb.mxu0 %v2649_v41  ;;  %1390 = vmatpush.bf16.msrb.mxu1 %v2652_v44 }
 0x1dc   :  { %1318 = vmatpush.bf16.msrb.mxu3 %v2776_v52 }
 0x1dd   :  { %1378 = vmatpush.bf16.msrb.mxu0 %v2655_v53  ;;  %1391 = vmatpush.bf16.msrb.mxu1 %v2658_v54 }
 0x1e0   :  { %1319 = vmatpush.bf16.msrb.mxu3 %v3796_v38 }
 0x1e1   :  { %1379 = vmatpush.bf16.msrb.mxu0 %v3797_v63  ;;  %1392 = vmatpush.bf16.msrb.mxu1 %v3798_v34 }
 0x1e4   :  { %1320 = vmatpush.bf16.msrb.mxu3 %v3799_v25 }
 0x1e5   :  { %1380 = vmatpush.bf16.msrb.mxu0 %v3800_v27  ;;  %1393 = vmatpush.bf16.msrb.mxu1 %v3801_v28 }
 0x1e8   :  { %1321 = vmatpush.bf16.msrb.mxu3 %v3802_v3 }
 0x1e9   :  { %1381 = vmatpush.bf16.msrb.mxu0 %v3803_v20  ;;  %1394 = vmatpush.bf16.msrb.mxu1 %v3804_v49  ;;  %v3813_v20 = vld [vmem:[#allocation43_spill] sm:$0xff] }
 0x1ec   :  { %1322 = vmatpush.bf16.msrb.mxu3 %v3805_v4 }
 0x1ed   :  { %1382 = vmatpush.bf16.msrb.mxu0 %v3806_v46  ;;  %1395 = vmatpush.bf16.msrb.mxu1 %v3807_v32 }
 0x1f0   :  { %1323 = vmatpush.bf16.msrb.mxu3 %v3808_v43 }
 0x1f1   :  { %1383 = vmatpush.bf16.msrb.mxu0 %v3809_v2  ;;  %1396 = vmatpush.bf16.msrb.mxu1 %v3810_v59 }
 0x22a   :  { %v1091_v12 = vpop.f32.mrf.mxu0  ;;  %v1104_v39 = vpop.f32.mrf.mxu1 }
 0x22b   :  { %v1121_v10 = vadd.f32 %v1091_v12, %v3811_v55  ;;  %v1126_v14 = vadd.f32 %v1104_v39, %v3812_v17 }
 0x22d   :  { %v1122_v45 = vmul.f32 0.5, %v1121_v10  ;;  %v1127_v40 = vmul.f32 0.5, %v1126_v14  ;;  %v3247_v10 = vpop.permute.xlu2 %1201 }
 0x22e   :  { %3814 = vst [vmem:[#allocation61_spill] sm:$0xff] %v3247_v10  ;;  %vm1203_vm15 = vcmp.eq.s32.totalorder %v3247_v10, 1 }
 0x22f   :  { %2361 = vtanh.f32 %v1122_v45 }
 0x230   :  { %2363 = vtanh.f32 %v1127_v40 }
 0x231   :  { %v1117_v9 = vpop.f32.mrf.mxu2 }
 0x232   :  { %v1093_v8 = vpop.f32.mrf.mxu0  ;;  %v1106_v56 = vpop.f32.mrf.mxu1  ;;  %v1131_v2 = vadd.f32 %v3789_v60, %v1117_v9 }
 0x235   :  { %v2362_v21 = vpop.eup %2361 }
 0x236   :  { %v1124_v32 = vadd.f32 1.0, %v2362_v21  ;;  %v2364_v43 = vpop.eup %2363 }
 0x237   :  { %v1129_v49 = vadd.f32 1.0, %v2364_v43  ;;  %v3819_v43 = vld [vmem:[#allocation56_spill] sm:$0xff] }
 0x238   :  { %v1125_v46 = vmul.f32 0.5, %v1124_v32  ;;  %v3818_v32 = vld [vmem:[#allocation32_spill] sm:$0xff] }
 0x239   :  { %v1119_v59 = vpop.f32.mrf.mxu2  ;;  %v1130_v39 = vmul.f32 0.5, %v1129_v49 }
 0x23a   :  { %v1132_v4 = vmul.f32 %v1131_v2, %v1125_v46  ;;  %v330_v2 = vadd.f32 %v3819_v43, %v3818_v32  ;;  %v3821_v43 = vld [vmem:[#allocation79_spill] sm:$0xff] }
 0x23b   :  { %v1135_v55 = vsub.f32 1.0, %v1130_v39  ;;  %v1137_v40 = vmul.f32 %v1130_v39, %v3164_v7 }
 0x23c   :  { %v1133_v12 = vadd.f32 %v1132_v4, %v3813_v20  ;;  %v3817_v4 = vld [vmem:[#allocation78_spill] sm:$0xff] }
 0x23e   :  { %2365 = vtanh.f32 %v1133_v12 }
 0x244   :  { %v2366_v17 = vpop.eup %2365 }
 0x245   :  { %v1136_v8 = vmul.f32 %v2366_v17, %v1135_v55 }
 0x247   :  { %v1138_v21 = vadd.f32 %v1137_v40, %v1136_v8 }
 0x249   :  { %v3254_v9 = vsel %vm1203_vm15, %v1138_v21, %v3164_v7  ;;  %v3816_v7 = vld [vmem:[#allocation63_spill] sm:$0xff] }
 0x24a   :  { %3815 = vst [vmem:[#allocation27_spill] sm:$0xff] %v3254_v9  ;;  %v1231_v56 = vpack.c.bf16 %v3254_v9, %v3254_v9  ;;  %v359_v46 = vadd.f32 %v3817_v4, %v3816_v7 }
 0x24c   :  { %1240 = vmatmul.bf16.vlgmr.msra.gmra.mxu2 %v1231_v56  ;;  %1253 = vmatmul.bf16.vlgmr.msra.gmra.mxu3 %v1231_v56 }
 0x24d   :  { %1266 = vmatmul.bf16.vlgmr.msra.gmra.mxu0 %v1231_v56  ;;  %1402 = vmatpush.bf16.msra.mxu2 %v2698_v26 }
 0x24e   :  { %1434 = vmatpush.bf16.msra.mxu3 %v2704_v29  ;;  %1447 = vmatpush.bf16.msra.mxu0 %v2726_v48 }
 0x250   :  { %v1162_v20 = vpop.f32.mrf.mxu0 }
 0x251   :  { %1403 = vmatpush.bf16.msra.mxu2 %v2709_v35  ;;  %v1175_v49 = vpop.f32.mrf.mxu1  ;;  %v1184_v59 = vadd.f32 %v1162_v20, %v359_v46  ;;  %v3820_v46 = vld [vmem:[#allocation64_spill] sm:$0xff] }
 0x252   :  { %1435 = vmatpush.bf16.msra.mxu3 %v2714_v37  ;;  %1448 = vmatpush.bf16.msra.mxu0 %v2737_v0  ;;  %v1189_v20 = vadd.f32 %v3100_v62, %v1175_v49 }
 0x253   :  { %v1185_v17 = vmul.f32 0.5, %v1184_v59 }
 0x255   :  { %1404 = vmatpush.bf16.msra.mxu2 %v2724_v47 }
 0x256   :  { %1436 = vmatpush.bf16.msra.mxu3 %v2730_v51  ;;  %1449 = vmatpush.bf16.msra.mxu0 %v2771_v42  ;;  %v1149_v14 = vpop.f32.mrf.mxu3 }
 0x257   :  { %v1179_v45 = vadd.f32 %v1149_v14, %v330_v2  ;;  %v388_v2 = vadd.f32 %v3821_v43, %v3820_v46  ;;  %v3826_v43 = vld [vmem:[#allocation30_spill] sm:$0xff] }
 0x258   :  { %v1164_v12 = vpop.f32.mrf.mxu0 }
 0x259   :  { %1405 = vmatpush.bf16.msra.mxu2 %v2740_v1  ;;  %v1180_v39 = vmul.f32 0.5, %v1179_v45  ;;  %v1177_v55 = vpop.f32.mrf.mxu1 }
 0x25a   :  { %1437 = vmatpush.bf16.msra.mxu3 %v2743_v6  ;;  %1450 = vmatpush.bf16.msra.mxu0 %v2782_v5 }
 0x25b   :  { %2367 = vtanh.f32 %v1180_v39 }
 0x25c   :  { %2369 = vtanh.f32 %v1185_v17  ;;  %v3290_v17 = vpop.permute.xlu2 %1207 }
 0x25d   :  { %1406 = vmatpush.bf16.msra.mxu2 %v2750_v16  ;;  %3822 = vst [vmem:[#allocation17_spill] sm:$0xff] %v3290_v17  ;;  %vm1209_vm0 = vcmp.eq.s32.totalorder %v3290_v17, 1 }
 0x25e   :  { %1438 = vmatpush.bf16.msra.mxu3 %v2755_v18  ;;  %1451 = vmatpush.bf16.msra.mxu0 %v2803_v31  ;;  %v1151_v40 = vpop.f32.mrf.mxu3 }
 0x261   :  { %1407 = vmatpush.bf16.msra.mxu2 %v2758_v24  ;;  %v2368_v8 = vpop.eup %2367 }
 0x262   :  { %1439 = vmatpush.bf16.msra.mxu3 %v2763_v30  ;;  %1452 = vmatpush.bf16.msra.mxu0 %v2810_v23  ;;  %v1182_v21 = vadd.f32 1.0, %v2368_v8  ;;  %v2370_v56 = vpop.eup %2369 }
 0x263   :  { %v1187_v14 = vadd.f32 1.0, %v2370_v56 }
 0x264   :  { %v1183_v4 = vmul.f32 0.5, %v1182_v21 }
 0x265   :  { %1408 = vmatpush.bf16.msra.mxu2 %v2774_v50  ;;  %v1188_v49 = vmul.f32 0.5, %v1187_v14  ;;  %v3829_v14 = vld [vmem:[#allocation31_spill] sm:$0xff] }
 0x266   :  { %1440 = vmatpush.bf16.msra.mxu3 %v2779_v61  ;;  %1453 = vmatpush.bf16.msra.mxu0 %v2835_v58  ;;  %v1190_v59 = vmul.f32 %v1189_v20, %v1183_v4  ;;  %v3824_v20 = vld [vmem:[#allocation21_spill] sm:$0xff]  ;;  %v3825_v4 = vld [vmem:[#allocation22_spill] sm:$0xff] }
 0x267   :  { %v1193_v12 = vsub.f32 1.0, %v1188_v49  ;;  %v1195_v55 = vmul.f32 %v1188_v49, %v3215_v15  ;;  %v3831_v49 = vld [vmem:[#allocation26_spill] sm:$0xff] }
 0x268   :  { %v1191_v45 = vadd.f32 %v1190_v59, %v388_v2  ;;  %v3827_v2 = vld [vmem:[#allocation23_spill] sm:$0xff]  ;;  %v3828_v59 = vld [vmem:[#allocation24_spill] sm:$0xff] }
 0x269   :  { %1409 = vmatpush.bf16.msra.mxu2 %v2788_v13 }
 0x26a   :  { %1441 = vmatpush.bf16.msra.mxu3 %v2791_v19  ;;  %1454 = vmatpush.bf16.msra.mxu0 %v2843_v22  ;;  %2371 = vtanh.f32 %v1191_v45  ;;  %v3830_v45 = vld [vmem:[#allocation25_spill] sm:$0xff] }
 0x270   :  { %v2372_v39 = vpop.eup %2371 }
 0x271   :  { %v1194_v40 = vmul.f32 %v2372_v39, %v1193_v12  ;;  %v3832_v39 = vld [vmem:[#allocation36_spill] sm:$0xff] }
 0x273   :  { %v1196_v8 = vadd.f32 %v1195_v55, %v1194_v40  ;;  %v3833_v55 = vld [vmem:[#allocation44_spill] sm:$0xff] }
 0x274   :  { %v238_v40 = vadd.f32 %v3833_v55, %v3832_v39  ;;  %v3836_v39 = vld [vmem:[#allocation42_spill] sm:$0xff] }
 0x275   :  { %v3296_v21 = vsel %vm1209_vm0, %v1196_v8, %v3215_v15  ;;  %v3834_v8 = vld [vmem:[#allocation38_spill] sm:$0xff] }
 0x276   :  { %3823 = vst [vmem:[#allocation18_spill] sm:$0xff] %v3296_v21  ;;  %v1289_v56 = vpack.c.bf16 %v3296_v21, %v3296_v21 }
 0x278   :  { %1298 = vmatmul.bf16.vlgmr.msra.gmra.mxu1 %v1289_v56  ;;  %1311 = vmatmul.bf16.vlgmr.msrb.gmra.mxu2 %v1289_v56 }
 0x279   :  { %1324 = vmatmul.bf16.vlgmr.msrb.gmra.mxu3 %v1289_v56  ;;  %1460 = vmatpush.bf16.msra.mxu1 %v2732_v57  ;;  %v3835_v56 = vld [vmem:[#allocation46_spill] sm:$0xff] }
 0x27a   :  { %1508 = vmatpush.bf16.msrb.mxu2 %v2636_v33  ;;  %1521 = vmatpush.bf16.msrb.mxu3 %v2638_v36  ;;  %v267_v15 = vadd.f32 %v3835_v56, %v3834_v8 }
 0x27d   :  { %1461 = vmatpush.bf16.msra.mxu1 %v2745_v11 }
 0x27e   :  { %1509 = vmatpush.bf16.msrb.mxu2 %v2649_v41  ;;  %1522 = vmatpush.bf16.msrb.mxu3 %v2652_v44 }
 0x281   :  { %1462 = vmatpush.bf16.msra.mxu1 %v2776_v52 }
 0x282   :  { %1510 = vmatpush.bf16.msrb.mxu2 %v2655_v53  ;;  %1523 = vmatpush.bf16.msrb.mxu3 %v2658_v54 }
 0x285   :  { %1463 = vmatpush.bf16.msra.mxu1 %v3796_v38 }
 0x286   :  { %1511 = vmatpush.bf16.msrb.mxu2 %v3797_v63  ;;  %1524 = vmatpush.bf16.msrb.mxu3 %v3798_v34 }
 0x289   :  { %1464 = vmatpush.bf16.msra.mxu1 %v3799_v25 }
 0x28a   :  { %1512 = vmatpush.bf16.msrb.mxu2 %v3800_v27  ;;  %1525 = vmatpush.bf16.msrb.mxu3 %v3801_v28 }
 0x28d   :  { %1465 = vmatpush.bf16.msra.mxu1 %v3802_v3  ;;  %v3837_v3 = vld [vmem:[#allocation47_spill] sm:$0xff] }
 0x28e   :  { %1513 = vmatpush.bf16.msrb.mxu2 %v3824_v20  ;;  %1526 = vmatpush.bf16.msrb.mxu3 %v3825_v4  ;;  %v296_v56 = vadd.f32 %v3837_v3, %v3836_v39 }
 0x291   :  { %1466 = vmatpush.bf16.msra.mxu1 %v3826_v43 }
 0x292   :  { %1514 = vmatpush.bf16.msrb.mxu2 %v3827_v2  ;;  %1527 = vmatpush.bf16.msrb.mxu3 %v3828_v59 }
 0x295   :  { %1467 = vmatpush.bf16.msra.mxu1 %v3829_v14 }
 0x296   :  { %1515 = vmatpush.bf16.msrb.mxu2 %v3830_v45  ;;  %1528 = vmatpush.bf16.msrb.mxu3 %v3831_v49 }
 0x2ca   :  { %v1267_v12 = vpop.f32.mrf.mxu0 }
 0x2cb   :  { %v1281_v20 = vadd.f32 %v3789_v60, %v1267_v12 }
 0x2cf   :  { %v1241_v10 = vpop.f32.mrf.mxu2  ;;  %v1254_v17 = vpop.f32.mrf.mxu3 }
 0x2d0   :  { %v1271_v46 = vadd.f32 %v1241_v10, %v238_v40  ;;  %v1276_v32 = vadd.f32 %v1254_v17, %v267_v15 }
 0x2d2   :  { %v1272_v7 = vmul.f32 0.5, %v1271_v46  ;;  %v1269_v2 = vpop.f32.mrf.mxu0  ;;  %v1277_v59 = vmul.f32 0.5, %v1276_v32 }
 0x2d4   :  { %2373 = vtanh.f32 %v1272_v7  ;;  %v3331_v7 = vpop.permute.xlu0 %1351 }
 0x2d5   :  { %2375 = vtanh.f32 %v1277_v59  ;;  %vm1353_vm1 = vcmp.eq.s32.totalorder %v3331_v7, 1  ;;  %v3868_v7 = vld [vmem:[#allocation52_spill] sm:$0xff] }
 0x2d7   :  { %v1243_v14 = vpop.f32.mrf.mxu2  ;;  %v1256_v45 = vpop.f32.mrf.mxu3 }
 0x2d8   :  { %v3839_v45 = vld [vmem:[#allocation75_spill] sm:$0xff] }
 0x2da   :  { %v2374_v43 = vpop.eup %2373 }
 0x2db   :  { %v1274_v49 = vadd.f32 1.0, %v2374_v43  ;;  %v2376_v4 = vpop.eup %2375 }
 0x2dc   :  { %v1279_v28 = vadd.f32 1.0, %v2376_v4 }
 0x2dd   :  { %v1275_v55 = vmul.f32 0.5, %v1274_v49 }
 0x2de   :  { %v1280_v15 = vmul.f32 0.5, %v1279_v28 }
 0x2df   :  { %v1282_v8 = vmul.f32 %v1281_v20, %v1275_v55  ;;  %v3838_v20 = vld [vmem:[#allocation53_spill] sm:$0xff] }
 0x2e0   :  { %v1285_v46 = vsub.f32 1.0, %v1280_v15  ;;  %v1287_v2 = vmul.f32 %v1280_v15, %v3254_v9 }
 0x2e1   :  { %v1283_v10 = vadd.f32 %v1282_v8, %v296_v56 }
 0x2e3   :  { %2377 = vtanh.f32 %v1283_v10 }
 0x2e9   :  { %v2378_v32 = vpop.eup %2377 }
 0x2ea   :  { %v1286_v17 = vmul.f32 %v2378_v32, %v1285_v46 }
 0x2ec   :  { %v1288_v43 = vadd.f32 %v1287_v2, %v1286_v17 }
 0x2ee   :  { %v3338_v60 = vsel %vm1353_vm1, %v1288_v43, %v3254_v9 }
 0x2ef   :  { %v1375_v3 = vpack.c.bf16 %v3338_v60, %v3338_v60 }
 0x2f1   :  { %1384 = vmatmul.bf16.vlgmr.msrb.gmra.mxu0 %v1375_v3  ;;  %1397 = vmatmul.bf16.vlgmr.msrb.gmra.mxu1 %v1375_v3 }
 0x2f2   :  { %1410 = vmatmul.bf16.vlgmr.msra.gmra.mxu2 %v1375_v3  ;;  %1534 = vmatpush.bf16.msrb.mxu0 %v2698_v26  ;;  %v3840_v3 = vld [vmem:[#allocation76_spill] sm:$0xff] }
 0x2f3   :  { %1566 = vmatpush.bf16.msrb.mxu1 %v2704_v29  ;;  %1579 = vmatpush.bf16.msra.mxu2 %v2726_v48 }
 0x2f5   :  { %v1299_v28 = vpop.f32.mrf.mxu1 }
 0x2f6   :  { %1535 = vmatpush.bf16.msrb.mxu0 %v2709_v35  ;;  %v1329_v4 = vadd.f32 %v1299_v28, %v3838_v20 }
 0x2f7   :  { %1567 = vmatpush.bf16.msrb.mxu1 %v2714_v37  ;;  %1580 = vmatpush.bf16.msra.mxu2 %v2737_v0 }
 0x2f8   :  { %v1330_v59 = vmul.f32 0.5, %v1329_v4 }
 0x2fa   :  { %1536 = vmatpush.bf16.msrb.mxu0 %v2724_v47  ;;  %2379 = vtanh.f32 %v1330_v59 }
 0x2fb   :  { %1568 = vmatpush.bf16.msrb.mxu1 %v2730_v51  ;;  %1581 = vmatpush.bf16.msra.mxu2 %v2771_v42  ;;  %v1312_v14 = vpop.f32.mrf.mxu2 }
 0x2fc   :  { %v1334_v49 = vadd.f32 %v1312_v14, %v3839_v45  ;;  %v1325_v12 = vpop.f32.mrf.mxu3  ;;  %v3370_v14 = vpop.permute.xlu1 %1357 }
 0x2fd   :  { %v1301_v40 = vpop.f32.mrf.mxu1  ;;  %v1339_v15 = vadd.f32 %v3100_v62, %v1325_v12  ;;  %vm1359_vm2 = vcmp.eq.s32.totalorder %v3370_v14, 1  ;;  %v3854_v14 = vld [vmem:[#allocation63_spill] sm:$0xff] }
 0x2fe   :  { %1537 = vmatpush.bf16.msrb.mxu0 %v2740_v1  ;;  %v1335_v8 = vmul.f32 0.5, %v1334_v49 }
 0x2ff   :  { %1569 = vmatpush.bf16.msrb.mxu1 %v2743_v6  ;;  %1582 = vmatpush.bf16.msra.mxu2 %v2782_v5 }
 0x300   :  { %v2380_v55 = vpop.eup %2379  ;;  %2381 = vtanh.f32 %v1335_v8 }
 0x301   :  { %v1332_v56 = vadd.f32 1.0, %v2380_v55  ;;  %v3841_v55 = vld [vmem:[#allocation20_spill] sm:$0xff] }
 0x302   :  { %1538 = vmatpush.bf16.msrb.mxu0 %v2750_v16 }
 0x303   :  { %1570 = vmatpush.bf16.msrb.mxu1 %v2755_v18  ;;  %1583 = vmatpush.bf16.msra.mxu2 %v2803_v31  ;;  %v1333_v10 = vmul.f32 0.5, %v1332_v56  ;;  %v1314_v46 = vpop.f32.mrf.mxu2  ;;  %v3842_v56 = vld [vmem:[#allocation29_spill] sm:$0xff] }
 0x304   :  { %v1327_v32 = vpop.f32.mrf.mxu3  ;;  %v3845_v46 = vld [vmem:[#allocation30_spill] sm:$0xff] }
 0x305   :  { %v1340_v17 = vmul.f32 %v1339_v15, %v1333_v10  ;;  %v3843_v10 = vld [vmem:[#allocation21_spill] sm:$0xff]  ;;  %v3844_v15 = vld [vmem:[#allocation22_spill] sm:$0xff]  ;;  %v3846_v32 = vld [vmem:[#allocation23_spill] sm:$0xff] }
 0x306   :  { %1539 = vmatpush.bf16.msrb.mxu0 %v2758_v24  ;;  %v2382_v2 = vpop.eup %2381 }
 0x307   :  { %1571 = vmatpush.bf16.msrb.mxu1 %v2763_v30  ;;  %1584 = vmatpush.bf16.msra.mxu2 %v2810_v23  ;;  %v1337_v43 = vadd.f32 1.0, %v2382_v2  ;;  %v1341_v28 = vadd.f32 %v1340_v17, %v3840_v3  ;;  %v3847_v17 = vld [vmem:[#allocation24_spill] sm:$0xff]  ;;  %v3848_v2 = vld [vmem:[#allocation31_spill] sm:$0xff]  ;;  %v3850_v3 = vld [vmem:[#allocation26_spill] sm:$0xff] }
 0x309   :  { %2383 = vtanh.f32 %v1341_v28  ;;  %v1338_v20 = vmul.f32 0.5, %v1337_v43  ;;  %v3849_v43 = vld [vmem:[#allocation25_spill] sm:$0xff] }
 0x30a   :  { %1540 = vmatpush.bf16.msrb.mxu0 %v2774_v50 }
 0x30b   :  { %1572 = vmatpush.bf16.msrb.mxu1 %v2779_v61  ;;  %1585 = vmatpush.bf16.msra.mxu2 %v2835_v58  ;;  %v1343_v4 = vsub.f32 1.0, %v1338_v20  ;;  %v1345_v45 = vmul.f32 %v1338_v20, %v3296_v21 }
 0x30e   :  { %1541 = vmatpush.bf16.msrb.mxu0 %v2788_v13 }
 0x30f   :  { %1573 = vmatpush.bf16.msrb.mxu1 %v2791_v19  ;;  %1586 = vmatpush.bf16.msra.mxu2 %v2843_v22  ;;  %v2384_v59 = vpop.eup %2383 }
 0x310   :  { %v1344_v49 = vmul.f32 %v2384_v59, %v1343_v4  ;;  %v3851_v4 = vld [vmem:[#allocation49_spill] sm:$0xff] }
 0x312   :  { %v1346_v12 = vadd.f32 %v1345_v45, %v1344_v49  ;;  %v3852_v45 = vld [vmem:[#allocation50_spill] sm:$0xff] }
 0x314   :  { %v3377_v40 = vsel %vm1359_vm2, %v1346_v12, %v3296_v21 }
 0x315   :  { %v1433_v8 = vpack.c.bf16 %v3377_v40, %v3377_v40 }
 0x317   :  { %1442 = vmatmul.bf16.vlgmr.msra.gmra.mxu3 %v1433_v8  ;;  %1455 = vmatmul.bf16.vlgmr.msra.gmra.mxu0 %v1433_v8 }
 0x318   :  { %1468 = vmatmul.bf16.vlgmr.msra.gmra.mxu1 %v1433_v8  ;;  %1592 = vmatpush.bf16.msra.mxu3 %v2732_v57 }
 0x319   :  { %1640 = vmatpush.bf16.msra.mxu0 %v2636_v33  ;;  %1653 = vmatpush.bf16.msra.mxu1 %v2638_v36 }
 0x31c   :  { %1593 = vmatpush.bf16.msra.mxu3 %v2745_v11 }
 0x31d   :  { %1641 = vmatpush.bf16.msra.mxu0 %v2649_v41  ;;  %1654 = vmatpush.bf16.msra.mxu1 %v2652_v44 }
 0x320   :  { %1594 = vmatpush.bf16.msra.mxu3 %v2776_v52 }
 0x321   :  { %1642 = vmatpush.bf16.msra.mxu0 %v2655_v53  ;;  %1655 = vmatpush.bf16.msra.mxu1 %v2658_v54 }
 0x324   :  { %1595 = vmatpush.bf16.msra.mxu3 %v3796_v38 }
 0x325   :  { %1643 = vmatpush.bf16.msra.mxu0 %v3797_v63  ;;  %1656 = vmatpush.bf16.msra.mxu1 %v3798_v34 }
 0x328   :  { %1596 = vmatpush.bf16.msra.mxu3 %v3799_v25 }
 0x329   :  { %1644 = vmatpush.bf16.msra.mxu0 %v3800_v27  ;;  %1657 = vmatpush.bf16.msra.mxu1 %v3841_v55 }
 0x32c   :  { %1597 = vmatpush.bf16.msra.mxu3 %v3842_v56 }
 0x32d   :  { %1645 = vmatpush.bf16.msra.mxu0 %v3843_v10  ;;  %1658 = vmatpush.bf16.msra.mxu1 %v3844_v15 }
 0x330   :  { %1598 = vmatpush.bf16.msra.mxu3 %v3845_v46 }
 0x331   :  { %1646 = vmatpush.bf16.msra.mxu0 %v3846_v32  ;;  %1659 = vmatpush.bf16.msra.mxu1 %v3847_v17 }
 0x334   :  { %1599 = vmatpush.bf16.msra.mxu3 %v3848_v2 }
 0x335   :  { %1647 = vmatpush.bf16.msra.mxu0 %v3849_v43  ;;  %1660 = vmatpush.bf16.msra.mxu1 %v3850_v3  ;;  %v3410_v3 = vld [vmem:[%s3644_s6] ss:$0 sm:$0xff]  ;;  %v1365_v43 = vmul.f32 0.5, %v3377_v40 }
 0x36e   :  { %v1385_v28 = vpop.f32.mrf.mxu0  ;;  %v1398_v20 = vpop.f32.mrf.mxu1 }
 0x36f   :  { %v1415_v59 = vadd.f32 %v1385_v28, %v3851_v4  ;;  %v1420_v49 = vadd.f32 %v1398_v20, %v3852_v45  ;;  %v3853_v45 = vld [vmem:[#allocation51_spill] sm:$0xff] }
 0x371   :  { %v1416_v12 = vmul.f32 0.5, %v1415_v59  ;;  %v1421_v8 = vmul.f32 0.5, %v1420_v49 }
 0x373   :  { %2385 = vtanh.f32 %v1416_v12 }
 0x374   :  { %2387 = vtanh.f32 %v1421_v8 }
 0x375   :  { %v1411_v9 = vpop.f32.mrf.mxu2 }
 0x376   :  { %v1387_v21 = vpop.f32.mrf.mxu0  ;;  %v1400_v39 = vpop.f32.mrf.mxu1  ;;  %v1425_v28 = vadd.f32 %v3410_v3, %v1411_v9 }
 0x379   :  { %v2386_v17 = vpop.eup %2385 }
 0x37a   :  { %v1418_v32 = vadd.f32 1.0, %v2386_v17  ;;  %v2388_v2 = vpop.eup %2387 }
 0x37b   :  { %v1423_v59 = vadd.f32 1.0, %v2388_v2  ;;  %v1366_v2 = vsel %vm1359_vm2, %v1365_v43, 0.0  ;;  %v3855_v43 = vld [vmem:[#allocation73_spill] sm:$0xff] }
 0x37c   :  { %v1419_v46 = vmul.f32 0.5, %v1418_v32 }
 0x37d   :  { %v1413_v4 = vpop.f32.mrf.mxu2  ;;  %v1424_v12 = vmul.f32 0.5, %v1423_v59 }
 0x37e   :  { %v1426_v20 = vmul.f32 %v1425_v28, %v1419_v46 }
 0x37f   :  { %v1429_v21 = vsub.f32 1.0, %v1424_v12  ;;  %v1431_v17 = vmul.f32 %v1424_v12, %v3338_v60  ;;  %v3857_v12 = vld [vmem:[#allocation48_spill] sm:$0xff] }
 0x380   :  { %v1427_v49 = vadd.f32 %v1426_v20, %v3853_v45  ;;  %v354_v45 = vadd.f32 %v3855_v43, %v3854_v14 }
 0x382   :  { %2389 = vtanh.f32 %v1427_v49  ;;  %v3856_v49 = vld [vmem:[#allocation32_spill] sm:$0xff] }
 0x388   :  { %v2390_v39 = vpop.eup %2389 }
 0x389   :  { %v1430_v8 = vmul.f32 %v2390_v39, %v1429_v21  ;;  %v325_v21 = vadd.f32 %v3857_v12, %v3856_v49 }
 0x38b   :  { %v1432_v32 = vadd.f32 %v1431_v17, %v1430_v8 }
 0x38d   :  { %v3419_v15 = vsel %vm1359_vm2, %v1432_v32, %v3338_v60 }
 0x38e   :  { %v1493_v9 = vmul.f32 0.5, %v3419_v15  ;;  %v1507_v46 = vpack.c.bf16 %v3419_v15, %v3419_v15 }
 0x390   :  { %v1494_v28 = vsel %vm1359_vm2, %v1493_v9, 0.0  ;;  %1516 = vmatmul.bf16.vlgmr.msrb.gmra.mxu2 %v1507_v46  ;;  %1529 = vmatmul.bf16.vlgmr.msrb.gmra.mxu3 %v1507_v46 }
 0x391   :  { %v1916_v4 = vadd.f32 %v1494_v28, %v1366_v2  ;;  %1542 = vmatmul.bf16.vlgmr.msrb.gmra.mxu0 %v1507_v46  ;;  %1666 = vmatpush.bf16.msrb.mxu2 %v2698_v26 }
 0x392   :  { %1698 = vmatpush.bf16.msrb.mxu3 %v2704_v29  ;;  %1711 = vmatpush.bf16.msrb.mxu0 %v2726_v48 }
 0x393   :  { %1924 = vst [vmem:[#allocation12 + $0x20] sm:$0xff] %v1916_v4 }
 0x394   :  { %v1456_v20 = vpop.f32.mrf.mxu0 }
 0x395   :  { %1667 = vmatpush.bf16.msrb.mxu2 %v2709_v35  ;;  %v1469_v59 = vpop.f32.mrf.mxu1  ;;  %v1478_v39 = vadd.f32 %v1456_v20, %v354_v45 }
 0x396   :  { %1699 = vmatpush.bf16.msrb.mxu3 %v2714_v37  ;;  %1712 = vmatpush.bf16.msrb.mxu0 %v2737_v0  ;;  %v1483_v45 = vadd.f32 %v3100_v62, %v1469_v59 }
 0x397   :  { %v1479_v2 = vmul.f32 0.5, %v1478_v39  ;;  %v3859_v39 = vld [vmem:[#allocation74_spill] sm:$0xff] }
 0x399   :  { %1668 = vmatpush.bf16.msrb.mxu2 %v2724_v47 }
 0x39a   :  { %1700 = vmatpush.bf16.msrb.mxu3 %v2730_v51  ;;  %1713 = vmatpush.bf16.msrb.mxu0 %v2771_v42  ;;  %v1443_v17 = vpop.f32.mrf.mxu3 }
 0x39b   :  { %v1473_v8 = vadd.f32 %v1443_v17, %v325_v21  ;;  %v3858_v21 = vld [vmem:[#allocation64_spill] sm:$0xff] }
 0x39c   :  { %v1458_v32 = vpop.f32.mrf.mxu0  ;;  %v383_v17 = vadd.f32 %v3859_v39, %v3858_v21 }
 0x39d   :  { %1669 = vmatpush.bf16.msrb.mxu2 %v2740_v1  ;;  %v1474_v9 = vmul.f32 0.5, %v1473_v8  ;;  %v1471_v46 = vpop.f32.mrf.mxu1 }
 0x39e   :  { %1701 = vmatpush.bf16.msrb.mxu3 %v2743_v6  ;;  %1714 = vmatpush.bf16.msrb.mxu0 %v2782_v5 }
 0x39f   :  { %2391 = vtanh.f32 %v1474_v9 }
 0x3a0   :  { %2393 = vtanh.f32 %v1479_v2 }
 0x3a1   :  { %1670 = vmatpush.bf16.msrb.mxu2 %v2750_v16 }
 0x3a2   :  { %1702 = vmatpush.bf16.msrb.mxu3 %v2755_v18  ;;  %1715 = vmatpush.bf16.msrb.mxu0 %v2803_v31  ;;  %v1445_v28 = vpop.f32.mrf.mxu3 }
 0x3a5   :  { %1671 = vmatpush.bf16.msrb.mxu2 %v2758_v24  ;;  %v2392_v4 = vpop.eup %2391 }
 0x3a6   :  { %1703 = vmatpush.bf16.msrb.mxu3 %v2763_v30  ;;  %1716 = vmatpush.bf16.msrb.mxu0 %v2810_v23  ;;  %v1476_v20 = vadd.f32 1.0, %v2392_v4  ;;  %v2394_v43 = vpop.eup %2393 }
 0x3a7   :  { %v1481_v32 = vadd.f32 1.0, %v2394_v43 }
 0x3a8   :  { %v1477_v12 = vmul.f32 0.5, %v1476_v20  ;;  %v1361_v20 = vmul.f32 0.5, %v3338_v60 }
 0x3a9   :  { %1672 = vmatpush.bf16.msrb.mxu2 %v2774_v50  ;;  %v1482_v62 = vmul.f32 0.5, %v1481_v32 }
 0x3aa   :  { %1704 = vmatpush.bf16.msrb.mxu3 %v2779_v61  ;;  %1717 = vmatpush.bf16.msrb.mxu0 %v2835_v58  ;;  %v1484_v8 = vmul.f32 %v1483_v45, %v1477_v12  ;;  %v1362_v39 = vsel %vm1353_vm1, %v1361_v20, 0.0 }
 0x3ab   :  { %v1487_v59 = vsub.f32 1.0, %v1482_v62  ;;  %v1489_v2 = vmul.f32 %v1482_v62, %v3377_v40 }
 0x3ac   :  { %v1485_v9 = vadd.f32 %v1484_v8, %v383_v17 }
 0x3ad   :  { %1673 = vmatpush.bf16.msrb.mxu2 %v2788_v13 }
 0x3ae   :  { %1705 = vmatpush.bf16.msrb.mxu3 %v2791_v19  ;;  %1718 = vmatpush.bf16.msrb.mxu0 %v2843_v22  ;;  %2395 = vtanh.f32 %v1485_v9 }
 0x3b4   :  { %v2396_v46 = vpop.eup %2395 }
 0x3b5   :  { %v1488_v28 = vmul.f32 %v2396_v46, %v1487_v59 }
 0x3b7   :  { %v1490_v4 = vadd.f32 %v1489_v2, %v1488_v28 }
 0x3b9   :  { %v3464_v43 = vsel %vm1353_vm1, %v1490_v4, %v3377_v40  ;;  %v3869_v40 = vld [vmem:[#allocation38_spill] sm:$0xff] }
 0x3ba   :  { %v1497_v45 = vmul.f32 0.5, %v3464_v43  ;;  %v1565_v12 = vpack.c.bf16 %v3464_v43, %v3464_v43 }
 0x3bc   :  { %v1498_v17 = vsel %vm1353_vm1, %v1497_v45, 0.0  ;;  %1574 = vmatmul.bf16.vlgmr.msrb.gmra.mxu1 %v1565_v12  ;;  %1587 = vmatmul.bf16.vlgmr.msra.gmra.mxu2 %v1565_v12 }
 0x3bd   :  { %v1915_v8 = vadd.f32 %v1498_v17, %v1362_v39  ;;  %1600 = vmatmul.bf16.vlgmr.msra.gmra.mxu3 %v1565_v12  ;;  %1724 = vmatpush.bf16.msrb.mxu1 %v2732_v57 }
 0x3be   :  { %1772 = vmatpush.bf16.msra.mxu2 %v2636_v33  ;;  %1785 = vmatpush.bf16.msra.mxu3 %v2638_v36  ;;  %v3860_v33 = vld [vmem:[#allocation22_spill] sm:$0xff] }
 0x3bf   :  { %1923 = vst [vmem:[#allocation12 + $0x18] sm:$0xff] %v1915_v8  ;;  %v3861_v36 = vld [vmem:[#allocation30_spill] sm:$0xff] }
 0x3c1   :  { %1725 = vmatpush.bf16.msrb.mxu1 %v2745_v11 }
 0x3c2   :  { %1773 = vmatpush.bf16.msra.mxu2 %v2649_v41  ;;  %1786 = vmatpush.bf16.msra.mxu3 %v2652_v44  ;;  %v3862_v41 = vld [vmem:[#allocation23_spill] sm:$0xff]  ;;  %v3863_v44 = vld [vmem:[#allocation24_spill] sm:$0xff] }
 0x3c5   :  { %1726 = vmatpush.bf16.msrb.mxu1 %v2776_v52 }
 0x3c6   :  { %1774 = vmatpush.bf16.msra.mxu2 %v2655_v53  ;;  %1787 = vmatpush.bf16.msra.mxu3 %v2658_v54  ;;  %v3864_v53 = vld [vmem:[#allocation31_spill] sm:$0xff]  ;;  %v3865_v54 = vld [vmem:[#allocation25_spill] sm:$0xff] }
 0x3c9   :  { %1727 = vmatpush.bf16.msrb.mxu1 %v3796_v38 }
 0x3ca   :  { %1775 = vmatpush.bf16.msra.mxu2 %v3797_v63  ;;  %1788 = vmatpush.bf16.msra.mxu3 %v3798_v34  ;;  %v3866_v63 = vld [vmem:[#allocation26_spill] sm:$0xff] }
 0x3cd   :  { %1728 = vmatpush.bf16.msrb.mxu1 %v3799_v25 }
 0x3ce   :  { %1776 = vmatpush.bf16.msra.mxu2 %v3800_v27  ;;  %1789 = vmatpush.bf16.msra.mxu3 %v3841_v55  ;;  %v3867_v27 = vld [vmem:[#allocation36_spill] sm:$0xff]  ;;  %v3870_v55 = vld [vmem:[#allocation54_spill] sm:$0xff] }
 0x3cf   :  { %v243_v60 = vadd.f32 %v3868_v7, %v3867_v27 }
 0x3d1   :  { %1729 = vmatpush.bf16.msrb.mxu1 %v3842_v56 }
 0x3d2   :  { %1777 = vmatpush.bf16.msra.mxu2 %v3843_v10  ;;  %1790 = vmatpush.bf16.msra.mxu3 %v3860_v33  ;;  %v272_v10 = vadd.f32 %v3870_v55, %v3869_v40  ;;  %v3871_v33 = vld [vmem:[#allocation42_spill] sm:$0xff] }
 0x3d5   :  { %1730 = vmatpush.bf16.msrb.mxu1 %v3861_v36 }
 0x3d6   :  { %1778 = vmatpush.bf16.msra.mxu2 %v3862_v41  ;;  %1791 = vmatpush.bf16.msra.mxu3 %v3863_v44  ;;  %v3872_v41 = vld [vmem:[#allocation55_spill] sm:$0xff] }
 0x3d7   :  { %v301_v44 = vadd.f32 %v3872_v41, %v3871_v33 }
 0x3d9   :  { %1731 = vmatpush.bf16.msrb.mxu1 %v3864_v53 }
 0x3da   :  { %1779 = vmatpush.bf16.msra.mxu2 %v3865_v54  ;;  %1792 = vmatpush.bf16.msra.mxu3 %v3866_v63 }
 0x40e   :  { %v1543_v34 = vpop.f32.mrf.mxu0 }
 0x40f   :  { %v1557_v17 = vadd.f32 %v3410_v3, %v1543_v34 }
 0x413   :  { %v1517_v32 = vpop.f32.mrf.mxu2  ;;  %v1530_v9 = vpop.f32.mrf.mxu3 }
 0x414   :  { %v1547_v62 = vadd.f32 %v1517_v32, %v243_v60  ;;  %v1552_v59 = vadd.f32 %v1530_v9, %v272_v10 }
 0x416   :  { %v1548_v46 = vmul.f32 0.5, %v1547_v62  ;;  %v1545_v2 = vpop.f32.mrf.mxu0  ;;  %v1553_v28 = vmul.f32 0.5, %v1552_v59  ;;  %v3873_v59 = vld [vmem:[#allocation18_spill] sm:$0xff] }
 0x418   :  { %2397 = vtanh.f32 %v1548_v46  ;;  %v1215_v46 = vmul.f32 0.5, %v3873_v59 }
 0x419   :  { %2399 = vtanh.f32 %v1553_v28 }
 0x41b   :  { %v1519_v4 = vpop.f32.mrf.mxu2  ;;  %v1532_v20 = vpop.f32.mrf.mxu3 }
 0x41c   :  { %v1216_v20 = vsel %vm1209_vm0, %v1215_v46, 0.0 }
 0x41e   :  { %v2398_v45 = vpop.eup %2397 }
 0x41f   :  { %v1550_v12 = vadd.f32 1.0, %v2398_v45  ;;  %v2400_v39 = vpop.eup %2399 }
 0x420   :  { %v1555_v63 = vadd.f32 1.0, %v2400_v39  ;;  %v3875_v39 = vld [vmem:[#allocation45_spill] sm:$0xff] }
 0x421   :  { %v1551_v8 = vmul.f32 0.5, %v1550_v12 }
 0x422   :  { %v1556_v60 = vmul.f32 0.5, %v1555_v63 }
 0x423   :  { %v1558_v54 = vmul.f32 %v1557_v17, %v1551_v8 }
 0x424   :  { %v1561_v55 = vsub.f32 1.0, %v1556_v60  ;;  %v1563_v9 = vmul.f32 %v1556_v60, %v3419_v15 }
 0x425   :  { %v1559_v7 = vadd.f32 %v1558_v54, %v301_v44 }
 0x427   :  { %2401 = vtanh.f32 %v1559_v7 }
 0x42d   :  { %v2402_v10 = vpop.eup %2401 }
 0x42e   :  { %v1562_v32 = vmul.f32 %v2402_v10, %v1561_v55  ;;  %v3878_v55 = vld [vmem:[#allocation27_spill] sm:$0xff] }
 0x42f   :  { %v1211_v10 = vmul.f32 0.5, %v3878_v55 }
 0x430   :  { %v1564_v62 = vadd.f32 %v1563_v9, %v1562_v32 }
 0x432   :  { %v3509_v34 = vsel %vm1209_vm0, %v1564_v62, %v3419_v15  ;;  %v3880_v62 = vld [vmem:[#allocation57_spill] sm:$0xff] }
 0x433   :  { %v1625_v28 = vmul.f32 0.5, %v3509_v34  ;;  %v1639_v4 = vpack.c.bf16 %v3509_v34, %v3509_v34 }
 0x435   :  { %v1626_v45 = vsel %vm1209_vm0, %v1625_v28, 0.0  ;;  %1648 = vmatmul.bf16.vlgmr.msra.gmra.mxu0 %v1639_v4  ;;  %1661 = vmatmul.bf16.vlgmr.msra.gmra.mxu1 %v1639_v4 }
 0x436   :  { %v1917_v12 = vadd.f32 %v1626_v45, %v1216_v20  ;;  %1674 = vmatmul.bf16.vlgmr.msrb.gmra.mxu2 %v1639_v4  ;;  %1798 = vmatpush.bf16.msra.mxu0 %v2698_v26 }
 0x437   :  { %1830 = vmatpush.bf16.msra.mxu1 %v2704_v29  ;;  %1843 = vmatpush.bf16.msrb.mxu2 %v2726_v48  ;;  %v3876_v29 = vld [vmem:[#allocation70_spill] sm:$0xff] }
 0x438   :  { %1925 = vst [vmem:[#allocation12 + $0x28] sm:$0xff] %v1917_v12 }
 0x439   :  { %v1575_v15 = vpop.f32.mrf.mxu1 }
 0x43a   :  { %1799 = vmatpush.bf16.msra.mxu0 %v2709_v35  ;;  %v1605_v17 = vadd.f32 %v1575_v15, %v3875_v39  ;;  %v3882_v15 = vld [vmem:[#allocation59_spill] sm:$0xff] }
 0x43b   :  { %1831 = vmatpush.bf16.msra.mxu1 %v2714_v37  ;;  %1844 = vmatpush.bf16.msrb.mxu2 %v2737_v0  ;;  %v3538_v0 = vld [vmem:[%s3645_s7] ss:$0 sm:$0xff]  ;;  %s2574_s7 = smov [#allocation12]  }
 0x43c   :  { %v1606_v8 = vmul.f32 0.5, %v1605_v17  ;;  %s1932_s14 = sshll.u32 %s2574_s7, 4  ;;  %s1933_s14 = int_to_ptr.vmem [resolvable:$true] %s1932_s14 }
 0x43e   :  { %1800 = vmatpush.bf16.msra.mxu0 %v2724_v47  ;;  %2403 = vtanh.f32 %v1606_v8 }
 0x43f   :  { %1832 = vmatpush.bf16.msra.mxu1 %v2730_v51  ;;  %1845 = vmatpush.bf16.msrb.mxu2 %v2771_v42  ;;  %v1588_v26 = vpop.f32.mrf.mxu2 }
 0x440   :  { %v1610_v48 = vadd.f32 %v1588_v26, %v3876_v29  ;;  %v1601_v41 = vpop.f32.mrf.mxu3 }
 0x441   :  { %v1577_v44 = vpop.f32.mrf.mxu1 }
 0x442   :  { %1801 = vmatpush.bf16.msra.mxu0 %v2740_v1  ;;  %v1611_v35 = vmul.f32 0.5, %v1610_v48  ;;  %v1615_v1 = vadd.f32 %v3538_v0, %v1601_v41  ;;  %v3883_v44 = vld [vmem:[#allocation37_spill] sm:$0xff] }
 0x443   :  { %1833 = vmatpush.bf16.msra.mxu1 %v2743_v6  ;;  %1846 = vmatpush.bf16.msrb.mxu2 %v2782_v5 }
 0x444   :  { %v2404_v37 = vpop.eup %2403  ;;  %2405 = vtanh.f32 %v1611_v35  ;;  %v1065_v35 = vmul.f32 0.5, %v3883_v44 }
 0x445   :  { %v1608_v47 = vadd.f32 1.0, %v2404_v37 }
 0x446   :  { %1802 = vmatpush.bf16.msra.mxu0 %v2750_v16 }
 0x447   :  { %1834 = vmatpush.bf16.msra.mxu1 %v2755_v18  ;;  %1847 = vmatpush.bf16.msrb.mxu2 %v2803_v31  ;;  %v1609_v51 = vmul.f32 0.5, %v1608_v47  ;;  %v1590_v6 = vpop.f32.mrf.mxu2  ;;  %v3877_v18 = vld [vmem:[#allocation71_spill] sm:$0xff] }
 0x448   :  { %v1603_v42 = vpop.f32.mrf.mxu3  ;;  %v1066_v6 = vsel %vm1059_vm14, %v1065_v35, 0.0 }
 0x449   :  { %v1616_v5 = vmul.f32 %v1615_v1, %v1609_v51 }
 0x44a   :  { %1803 = vmatpush.bf16.msra.mxu0 %v2758_v24  ;;  %v2406_v54 = vpop.eup %2405 }
 0x44b   :  { %1835 = vmatpush.bf16.msra.mxu1 %v2763_v30  ;;  %1848 = vmatpush.bf16.msrb.mxu2 %v2810_v23  ;;  %v1613_v16 = vadd.f32 1.0, %v2406_v54  ;;  %v1617_v31 = vadd.f32 %v1616_v5, %v3877_v18 }
 0x44d   :  { %2407 = vtanh.f32 %v1617_v31  ;;  %v1614_v63 = vmul.f32 0.5, %v1613_v16  ;;  %v3886_v31 = vld [vmem:[#allocation39_spill] sm:$0xff] }
 0x44e   :  { %1804 = vmatpush.bf16.msra.mxu0 %v2774_v50 }
 0x44f   :  { %1836 = vmatpush.bf16.msra.mxu1 %v2779_v61  ;;  %1849 = vmatpush.bf16.msrb.mxu2 %v2835_v58  ;;  %v1619_v7 = vsub.f32 1.0, %v1614_v63  ;;  %v1621_v30 = vmul.f32 %v1614_v63, %v3464_v43  ;;  %v320_v63 = vadd.f32 %v3886_v31, %v3856_v49 }
 0x452   :  { %1805 = vmatpush.bf16.msra.mxu0 %v2788_v13 }
 0x453   :  { %1837 = vmatpush.bf16.msra.mxu1 %v2791_v19  ;;  %1850 = vmatpush.bf16.msrb.mxu2 %v2843_v22  ;;  %v2408_v24 = vpop.eup %2407  ;;  %v1212_v19 = vsel %vm1203_vm15, %v1211_v10, 0.0 }
 0x454   :  { %v1620_v23 = vmul.f32 %v2408_v24, %v1619_v7 }
 0x456   :  { %v1622_v60 = vadd.f32 %v1621_v30, %v1620_v23 }
 0x458   :  { %v3556_v61 = vsel %vm1203_vm15, %v1622_v60, %v3464_v43 }
 0x459   :  { %v1629_v58 = vmul.f32 0.5, %v3556_v61  ;;  %v1697_v13 = vpack.c.bf16 %v3556_v61, %v3556_v61 }
 0x45b   :  { %v1630_v22 = vsel %vm1203_vm15, %v1629_v58, 0.0  ;;  %1706 = vmatmul.bf16.vlgmr.msrb.gmra.mxu3 %v1697_v13  ;;  %1719 = vmatmul.bf16.vlgmr.msrb.gmra.mxu0 %v1697_v13 }
 0x45c   :  { %v1914_v32 = vadd.f32 %v1630_v22, %v1212_v19  ;;  %1732 = vmatmul.bf16.vlgmr.msrb.gmra.mxu1 %v1697_v13  ;;  %1856 = vmatpush.bf16.msrb.mxu3 %v2732_v57  ;;  %v3881_v57 = vld [vmem:[#allocation58_spill] sm:$0xff] }
 0x45e   :  { %1922 = vst [vmem:[#allocation12 + $0x10] sm:$0xff] %v1914_v32 }
 0x460   :  { %1857 = vmatpush.bf16.msrb.mxu3 %v2745_v11 }
 0x464   :  { %1858 = vmatpush.bf16.msrb.mxu3 %v2776_v52 }
 0x468   :  { %1859 = vmatpush.bf16.msrb.mxu3 %v3796_v38 }
 0x46c   :  { %1860 = vmatpush.bf16.msrb.mxu3 %v3799_v25 }
 0x470   :  { %1861 = vmatpush.bf16.msrb.mxu3 %v3842_v56 }
 0x474   :  { %1862 = vmatpush.bf16.msrb.mxu3 %v3861_v36 }
 0x478   :  { %1863 = vmatpush.bf16.msrb.mxu3 %v3864_v53 }
 0x4b2   :  { %v1649_v43 = vpop.f32.mrf.mxu0  ;;  %v1662_v9 = vpop.f32.mrf.mxu1 }
 0x4b3   :  { %v1679_v59 = vadd.f32 %v1649_v43, %v3880_v62  ;;  %v1684_v46 = vadd.f32 %v1662_v9, %v3881_v57 }
 0x4b5   :  { %v1680_v2 = vmul.f32 0.5, %v1679_v59  ;;  %v1685_v11 = vmul.f32 0.5, %v1684_v46 }
 0x4b7   :  { %2409 = vtanh.f32 %v1680_v2 }
 0x4b8   :  { %2411 = vtanh.f32 %v1685_v11 }
 0x4b9   :  { %v1675_v52 = vpop.f32.mrf.mxu2 }
 0x4ba   :  { %v1651_v38 = vpop.f32.mrf.mxu0  ;;  %v1664_v28 = vpop.f32.mrf.mxu1  ;;  %v1689_v36 = vadd.f32 %v3410_v3, %v1675_v52 }
 0x4bd   :  { %v2410_v25 = vpop.eup %2409 }
 0x4be   :  { %v1682_v4 = vadd.f32 1.0, %v2410_v25  ;;  %v2412_v56 = vpop.eup %2411 }
 0x4bf   :  { %v1687_v12 = vadd.f32 1.0, %v2412_v56  ;;  %v1897_v56 = vld [vmem:[#allocation12 + $0x8] sm:$0xff] }
 0x4c0   :  { %v1683_v20 = vmul.f32 0.5, %v1682_v4 }
 0x4c1   :  { %v1677_v53 = vpop.f32.mrf.mxu2  ;;  %v1688_v17 = vmul.f32 0.5, %v1687_v12 }
 0x4c2   :  { %v1690_v45 = vmul.f32 %v1689_v36, %v1683_v20  ;;  %v3889_v53 = vld [vmem:[#allocation60_spill] sm:$0xff] }
 0x4c3   :  { %v1693_v8 = vsub.f32 1.0, %v1688_v17  ;;  %v1695_v29 = vmul.f32 %v1688_v17, %v3509_v34 }
 0x4c4   :  { %v1691_v39 = vadd.f32 %v1690_v45, %v3882_v15  ;;  %v248_v45 = vadd.f32 %v3889_v53, %v3867_v27 }
 0x4c6   :  { %2413 = vtanh.f32 %v1691_v39 }
 0x4cc   :  { %v2414_v26 = vpop.eup %2413 }
 0x4cd   :  { %v1694_v48 = vmul.f32 %v2414_v26, %v1693_v8 }
 0x4cf   :  { %v1696_v41 = vadd.f32 %v1695_v29, %v1694_v48 }
 0x4d1   :  { %v3582_v47 = vsel %vm1059_vm14, %v1696_v41, %v3509_v34  ;;  %v3885_v34 = vld [vmem:[#allocation68_spill] sm:$0xff] }
 0x4d2   :  { %v1757_v51 = vmul.f32 0.5, %v3582_v47  ;;  %v1771_v1 = vpack.c.bf16 %v3582_v47, %v3582_v47  ;;  %v349_v18 = vadd.f32 %v3885_v34, %v3854_v14  ;;  %v3887_v14 = vld [vmem:[#allocation69_spill] sm:$0xff] }
 0x4d3   :  { %v378_v43 = vadd.f32 %v3887_v14, %v3858_v21 }
 0x4d4   :  { %v1758_v42 = vsel %vm1059_vm14, %v1757_v51, 0.0  ;;  %1780 = vmatmul.bf16.vlgmr.msra.gmra.mxu2 %v1771_v1  ;;  %1793 = vmatmul.bf16.vlgmr.msra.gmra.mxu3 %v1771_v1 }
 0x4d5   :  { %v1918_v5 = vadd.f32 %v1758_v42, %v1066_v6  ;;  %1806 = vmatmul.bf16.vlgmr.msra.gmra.mxu0 %v1771_v1  ;;  %v3891_v6 = vld [vmem:[#allocation65_spill] sm:$0xff] }
 0x4d7   :  { %1926 = vst [vmem:[#allocation12 + $0x30] sm:$0xff] %v1918_v5 }
 0x4d8   :  { %v1720_v54 = vpop.f32.mrf.mxu0 }
 0x4d9   :  { %v1733_v16 = vpop.f32.mrf.mxu1  ;;  %v1742_v7 = vadd.f32 %v1720_v54, %v349_v18 }
 0x4da   :  { %v1747_v22 = vadd.f32 %v3538_v0, %v1733_v16 }
 0x4db   :  { %v1743_v10 = vmul.f32 0.5, %v1742_v7 }
 0x4de   :  { %v1707_v24 = vpop.f32.mrf.mxu3 }
 0x4df   :  { %v1737_v30 = vadd.f32 %v1707_v24, %v320_v63  ;;  %v3892_v24 = vld [vmem:[#allocation35_spill] sm:$0xff] }
 0x4e0   :  { %v1722_v23 = vpop.f32.mrf.mxu0 }
 0x4e1   :  { %v1738_v60 = vmul.f32 0.5, %v1737_v30  ;;  %v1735_v55 = vpop.f32.mrf.mxu1  ;;  %v915_v30 = vmul.f32 0.5, %v3892_v24 }
 0x4e3   :  { %2415 = vtanh.f32 %v1738_v60 }
 0x4e4   :  { %2417 = vtanh.f32 %v1743_v10 }
 0x4e6   :  { %v1709_v50 = vpop.f32.mrf.mxu3 }
 0x4e9   :  { %v2416_v58 = vpop.eup %2415 }
 0x4ea   :  { %v1740_v13 = vadd.f32 1.0, %v2416_v58  ;;  %v2418_v19 = vpop.eup %2417  ;;  %v3894_v58 = vld [vmem:[#allocation34_spill] sm:$0xff] }
 0x4eb   :  { %v1745_v9 = vadd.f32 1.0, %v2418_v19 }
 0x4ec   :  { %v1741_v32 = vmul.f32 0.5, %v1740_v13 }
 0x4ed   :  { %v1746_v59 = vmul.f32 0.5, %v1745_v9 }
 0x4ee   :  { %v1748_v49 = vmul.f32 %v1747_v22, %v1741_v32  ;;  %v3895_v32 = vld [vmem:[#allocation66_spill] sm:$0xff] }
 0x4ef   :  { %v1751_v57 = vsub.f32 1.0, %v1746_v59  ;;  %v1753_v2 = vmul.f32 %v1746_v59, %v3556_v61 }
 0x4f0   :  { %v1749_v62 = vadd.f32 %v1748_v49, %v378_v43 }
 0x4f2   :  { %2419 = vtanh.f32 %v1749_v62 }
 0x4f8   :  { %v2420_v46 = vpop.eup %2419 }
 0x4f9   :  { %v1752_v11 = vmul.f32 %v2420_v46, %v1751_v57 }
 0x4fb   :  { %v1754_v52 = vadd.f32 %v1753_v2, %v1752_v11 }
 0x4fd   :  { %v3602_v28 = vsel %vm1053_vm11, %v1754_v52, %v3556_v61  ;;  %v3890_v61 = vld [vmem:[#allocation62_spill] sm:$0xff] }
 0x4fe   :  { %v1761_v25 = vmul.f32 0.5, %v3602_v28  ;;  %v1829_v21 = vpack.c.bf16 %v3602_v28, %v3602_v28  ;;  %v277_v12 = vadd.f32 %v3890_v61, %v3869_v40  ;;  %v306_v40 = vadd.f32 %v3891_v6, %v3871_v33 }
 0x4ff   :  { %v916_v33 = vsel %vm910_vm9, %v915_v30, 0.0 }
 0x500   :  { %v1762_v4 = vsel %vm1053_vm11, %v1761_v25, 0.0  ;;  %1838 = vmatmul.bf16.vlgmr.msra.gmra.mxu1 %v1829_v21  ;;  %1851 = vmatmul.bf16.vlgmr.msrb.gmra.mxu2 %v1829_v21  ;;  %v3896_v25 = vld [vmem:[#allocation67_spill] sm:$0xff] }
 0x501   :  { %v1913_v20 = vadd.f32 %v1897_v56, %v1762_v4  ;;  %1864 = vmatmul.bf16.vlgmr.msrb.gmra.mxu3 %v1829_v21 }
 0x503   :  { %1921 = vst [vmem:[#allocation12 + $0x8] sm:$0xff] %v1913_v20 }
 0x552   :  { %v1807_v36 = vpop.f32.mrf.mxu0 }
 0x553   :  { %v1821_v1 = vadd.f32 %v3410_v3, %v1807_v36 }
 0x557   :  { %v1781_v15 = vpop.f32.mrf.mxu2  ;;  %v1794_v39 = vpop.f32.mrf.mxu3 }
 0x558   :  { %v1811_v17 = vadd.f32 %v1781_v15, %v248_v45  ;;  %v1816_v8 = vadd.f32 %v1794_v39, %v277_v12  ;;  %v1896_v39 = vld [vmem:[#allocation12] sm:$0xff] }
 0x55a   :  { %v1812_v26 = vmul.f32 0.5, %v1811_v17  ;;  %v1809_v29 = vpop.f32.mrf.mxu0  ;;  %v1817_v48 = vmul.f32 0.5, %v1816_v8 }
 0x55c   :  { %2421 = vtanh.f32 %v1812_v26 }
 0x55d   :  { %2423 = vtanh.f32 %v1817_v48 }
 0x55f   :  { %v1783_v41 = vpop.f32.mrf.mxu2  ;;  %v1796_v44 = vpop.f32.mrf.mxu3 }
 0x562   :  { %v2422_v35 = vpop.eup %2421 }
 0x563   :  { %v1814_v37 = vadd.f32 1.0, %v2422_v35  ;;  %v2424_v51 = vpop.eup %2423 }
 0x564   :  { %v1819_v5 = vadd.f32 1.0, %v2424_v51 }
 0x565   :  { %v1815_v27 = vmul.f32 0.5, %v1814_v37 }
 0x566   :  { %v1820_v16 = vmul.f32 0.5, %v1819_v5 }
 0x567   :  { %v1822_v42 = vmul.f32 %v1821_v1, %v1815_v27 }
 0x568   :  { %v1825_v34 = vsub.f32 1.0, %v1820_v16  ;;  %v1827_v63 = vmul.f32 %v1820_v16, %v3582_v47 }
 0x569   :  { %v1823_v54 = vadd.f32 %v1822_v42, %v306_v40 }
 0x56b   :  { %2425 = vtanh.f32 %v1823_v54 }
 0x571   :  { %v2426_v18 = vpop.eup %2425 }
 0x572   :  { %v1826_v31 = vmul.f32 %v2426_v18, %v1825_v34 }
 0x574   :  { %v1828_v7 = vadd.f32 %v1827_v63, %v1826_v31 }
 0x576   :  { %v1887_v3 = vsel %vm910_vm9, %v1828_v7, %v3582_v47 }
 0x577   :  { %v1889_v60 = vmul.f32 0.5, %v1887_v3 }
 0x579   :  { %v1890_v55 = vsel %vm910_vm9, %v1889_v60, 0.0 }
 0x57a   :  { %v1919_v10 = vadd.f32 %v1890_v55, %v916_v33 }
 0x57c   :  { %1927 = vst [vmem:[#allocation12 + $0x38] sm:$0xff] %v1919_v10 }
 0x57d   :  { %v1839_v50 = vpop.f32.mrf.mxu1 }
 0x57e   :  { %v1869_v13 = vadd.f32 %v1839_v50, %v3894_v58 }
 0x580   :  { %v1870_v19 = vmul.f32 0.5, %v1869_v13 }
 0x582   :  { %2427 = vtanh.f32 %v1870_v19 }
 0x583   :  { %v1852_v22 = vpop.f32.mrf.mxu2 }
 0x584   :  { %v1874_v14 = vadd.f32 %v1852_v22, %v3895_v32  ;;  %v1865_v43 = vpop.f32.mrf.mxu3 }
 0x585   :  { %v1841_v49 = vpop.f32.mrf.mxu1  ;;  %v1879_v57 = vadd.f32 %v3538_v0, %v1865_v43 }
 0x586   :  { %v1875_v47 = vmul.f32 0.5, %v1874_v14 }
 0x588   :  { %v2428_v9 = vpop.eup %2427  ;;  %2429 = vtanh.f32 %v1875_v47 }
 0x589   :  { %v1872_v62 = vadd.f32 1.0, %v2428_v9 }
 0x58b   :  { %v1873_v59 = vmul.f32 0.5, %v1872_v62  ;;  %v1854_v46 = vpop.f32.mrf.mxu2 }
 0x58c   :  { %v1867_v2 = vpop.f32.mrf.mxu3 }
 0x58d   :  { %v1880_v11 = vmul.f32 %v1879_v57, %v1873_v59 }
 0x58e   :  { %v2430_v52 = vpop.eup %2429 }
 0x58f   :  { %v1877_v38 = vadd.f32 1.0, %v2430_v52  ;;  %v1881_v21 = vadd.f32 %v1880_v11, %v3896_v25 }
 0x591   :  { %2431 = vtanh.f32 %v1881_v21  ;;  %v1878_v4 = vmul.f32 0.5, %v1877_v38 }
 0x593   :  { %v1883_v56 = vsub.f32 1.0, %v1878_v4  ;;  %v1885_v36 = vmul.f32 %v1878_v4, %v3602_v28 }
 0x597   :  { %v2432_v20 = vpop.eup %2431 }
 0x598   :  { %v1884_v53 = vmul.f32 %v2432_v20, %v1883_v56 }
 0x59a   :  { %v1886_v45 = vadd.f32 %v1885_v36, %v1884_v53 }
 0x59c   :  { %v1888_v12 = vsel %vm904_vm4, %v1886_v45, %v3602_v28 }
 0x59d   :  { %v1893_v0 = vmul.f32 0.5, %v1888_v12 }
 0x59f   :  { %v1894_v15 = vsel %vm904_vm4, %v1893_v0, 0.0 }
 0x5a0   :  { %v1912_v17 = vadd.f32 %v1896_v39, %v1894_v15 }
 0x5a2   :  { %1920 = vst [vmem:[#allocation12] sm:$0xff] %v1912_v17 }
 0x5a3   :  { %1940 = dma.vmem_to_hbm [thread:$0]  %s1933_s14, 1024, %s1935_s17, [#allocation6], %s2575_s18, %s2575_s18, %s2576_s2  }
 0x5a4   :  { %2561 = dma.done.wait [#allocation6], 1024  }
 0x5a5   :  { %2562 = vsyncadd [#allocation6], 4294966272 }
 0x5a6   :  { %1945 = vsyncpa [#allocation5], 1 }
 0x5a7   :  { %1946 = vsyncpa [#allocation8], 1 }
 0x5a8   :  { %1947 = vsyncpa [#allocation11], 1 }
 0x5a9   :  { %1948 = vsyncpa [#allocation6], 1 }

</bundles_post_ra>
